<compile_context>
chip_gen: v7x
topology: tpu7x:2x2x1
jax: 0.10.0
libtpu: 0.0.40
codegen_flags: <defaults>
</compile_context>

<pallas_src>
import numpy as np
import jax
import jax.numpy as jnp
from jax.experimental import pallas as pl
from jax.experimental.pallas import tpu as pltpu

H = 16            # spatial height
W = 16            # spatial width  (W * CPAD must equal 128 lanes)
CPAD = 8          # channels padded to 8 inside the conv stage
LANES = W * CPAD  # 128
NH = 512          # fc hidden width padded 500 -> 512
NO = 128          # fc output width padded 5 -> 128


# ----------------------------------------------------------------------------
# Fully fused kernel: conv stack + fc stack, both siamese branches at once
# ----------------------------------------------------------------------------
def _siamese_kernel(x1_ref, x2_ref, wc_ref, ep_ref, w1_ref, w2_ref, w3_ref,
                    b_ref, o_ref, sa_ref, sb_ref):
    # x1/x2 : (N, 1, H, W) f32 raw inputs (both branches)
    # wc    : (9, 128, 128) bf16 banded conv weights, index = layer*3 + kh
    # ep    : (3, 3, 128) f32 per-layer [conv bias, bn scale, bn shift] rows
    # w1    : (H, 128, 512) bf16 fc1 weights (rows permuted to conv lane order)
    # w2    : (512, 512) bf16, w3 : (512, 128) bf16, b: (3, 512) f32 biases
    # o     : (2N, 128) f32 output (first 5 lanes are the real logits)
    # sa/sb : (2N, H+2, 128) f32 ping-pong scratch (row-reflected activations)
    b = o_ref.shape[0]
    nh = w2_ref.shape[0]

    # ---- in-kernel input prep: concat branches, reflect-pad rows ------------
    x1 = x1_ref[...].reshape(x1_ref.shape[0], H, W)
    x2 = x2_ref[...].reshape(x2_ref.shape[0], H, W)
    x = jnp.concatenate([x1, x2], axis=0)                       # (b, H, W)
    xr = jnp.concatenate([x[:, 1:2, :], x, x[:, H - 2:H - 1, :]], axis=1)
    sa_ref[...] = jnp.zeros_like(sa_ref)                        # lanes >= W stay 0
    sa_ref[:, :, 0:W] = xr

    def conv_layer(src_ref, layer):
        # kw taps + left/right reflection are folded into the banded weights,
        # so only 3 lane-aligned matmuls per layer (slab offsets are sublanes).
        acc = jnp.zeros((b * H, LANES), jnp.float32)
        for kh in range(3):
            slab = src_ref[:, kh:kh + H, :].reshape(b * H, LANES)
            acc = acc + jnp.dot(slab.astype(jnp.bfloat16),
                                wc_ref[layer * 3 + kh],
                                preferred_element_type=jnp.float32)
        y = jnp.maximum(acc + ep_ref[layer, 0:1], 0.0)          # conv bias + ReLU
        y = y * ep_ref[layer, 1:2] + ep_ref[layer, 2:3]         # BN (eval) affine
        return y.reshape(b, H, LANES)

    def store_row_reflect(dst_ref, y):
        # top/bottom reflection from the in-register y (no dst read-back)
        dst_ref[...] = jnp.concatenate(
            [y[:, 1:2, :], y, y[:, H - 2:H - 1, :]], axis=1)

    y1 = conv_layer(sa_ref, 0)
    store_row_reflect(sb_ref, y1)
    y2 = conv_layer(sb_ref, 1)
    store_row_reflect(sa_ref, y2)
    y3 = conv_layer(sa_ref, 2)                                  # (b, H, 128) f32

    # ---- fused fc stack: fc1 accumulated over the H row-groups of the flatten
    h1 = jnp.zeros((b, nh), jnp.float32)
    for h in range(H):
        h1 = h1 + jnp.dot(y3[:, h, :].astype(jnp.bfloat16), w1_ref[h],
                          preferred_element_type=jnp.float32)
    h1 = jnp.maximum(h1 + b_ref[0:1], 0.0)
    h2 = jnp.dot(h1.astype(jnp.bfloat16), w2_ref[...],
                 preferred_element_type=jnp.float32)
    h2 = jnp.maximum(h2 + b_ref[1:2], 0.0)
    o = jnp.dot(h2.astype(jnp.bfloat16), w3_ref[...],
                preferred_element_type=jnp.float32)
    o_ref[...] = o + b_ref[2:3, 0:o_ref.shape[1]]


def siamese_forward(prep, input1, input2):
    """input1, input2: (N, 1, H, W) f32 -> two (N, 5) f32 outputs."""
    n = input1.shape[0]
    b = 2 * n

    flops = (2 * 9 * b * H * LANES * LANES
             + 2 * b * (H * LANES * NH + NH * NH + NH * NO))
    bytes_accessed = int(
        input1.size * 4 + input2.size * 4
        + prep["wc"].size * 2 + prep["conv_ep"].size * 4
        + prep["fc1_w"].size * 2 + prep["fc2_w"].size * 2
        + prep["fc3_w"].size * 2 + prep["fc_b"].size * 4 + b * NO * 4)

    out = pl.pallas_call(
        _siamese_kernel,
        out_shape=jax.ShapeDtypeStruct((b, NO), jnp.float32),
        grid=(1,),
        in_specs=[
            pl.BlockSpec((n, 1, H, W), lambda i: (0, 0, 0, 0)),
            pl.BlockSpec((n, 1, H, W), lambda i: (0, 0, 0, 0)),
            pl.BlockSpec((9, LANES, LANES), lambda i: (0, 0, 0)),
            pl.BlockSpec((3, 3, LANES), lambda i: (0, 0, 0)),
            pl.BlockSpec((H, LANES, NH), lambda i: (0, 0, 0)),
            pl.BlockSpec((NH, NH), lambda i: (0, 0)),
            pl.BlockSpec((NH, NO), lambda i: (0, 0)),
            pl.BlockSpec((3, NH), lambda i: (0, 0)),
        ],
        out_specs=pl.BlockSpec((b, NO), lambda i: (0, 0)),
        scratch_shapes=[
            pltpu.VMEM((b, H + 2, LANES), jnp.float32),
            pltpu.VMEM((b, H + 2, LANES), jnp.float32),
        ],
        compiler_params=pltpu.CompilerParams(
            dimension_semantics=("arbitrary",),
            vmem_limit_bytes=16 * 1024 * 1024),
        cost_estimate=pl.CostEstimate(flops=flops, transcendentals=0,
                                      bytes_accessed=bytes_accessed),
    )(input1, input2, prep["wc"], prep["conv_ep"], prep["fc1_w"],
      prep["fc2_w"], prep["fc3_w"], prep["fc_b"])

    return out[:n, :5], out[n:, :5]


# ----------------------------------------------------------------------------
# Parameter init (PyTorch-shaped) and one-time kernel-layout preparation
# ----------------------------------------------------------------------------
def init_params(key, h, w):
    ks = list(jax.random.split(key, 24))

    def uni(k, shape, fan_in):
        bound = float(fan_in) ** -0.5
        return jax.random.uniform(k, shape, jnp.float32, -bound, bound)

    p = {}
    p["c1_w"] = uni(ks[0], (4, 1, 3, 3), 1 * 9)
    p["c1_b"] = uni(ks[1], (4,), 1 * 9)
    p["c2_w"] = uni(ks[2], (8, 4, 3, 3), 4 * 9)
    p["c2_b"] = uni(ks[3], (8,), 4 * 9)
    p["c3_w"] = uni(ks[4], (8, 8, 3, 3), 8 * 9)
    p["c3_b"] = uni(ks[5], (8,), 8 * 9)
    for i, (c, kg, kb, km, kv) in enumerate(
            [(4, ks[6], ks[7], ks[8], ks[9]),
             (8, ks[10], ks[11], ks[12], ks[13]),
             (8, ks[14], ks[15], ks[16], ks[17])], start=1):
        p[f"bn{i}_g"] = 1.0 + 0.1 * jax.random.normal(kg, (c,), jnp.float32)
        p[f"bn{i}_b"] = 0.1 * jax.random.normal(kb, (c,), jnp.float32)
        p[f"bn{i}_m"] = 0.05 * jax.random.normal(km, (c,), jnp.float32)
        p[f"bn{i}_v"] = 1.0 + 0.1 * jax.random.uniform(kv, (c,), jnp.float32)
    fc_in = 8 * h * w
    p["fc1_w"] = uni(ks[18], (fc_in, 500), fc_in)
    p["fc1_b"] = uni(ks[19], (500,), fc_in)
    p["fc2_w"] = uni(ks[20], (500, 500), 500)
    p["fc2_b"] = uni(ks[21], (500,), 500)
    p["fc3_w"] = uni(ks[22], (500, 5), 500)
    p["fc3_b"] = uni(ks[23], (5,), 500)
    return p


def prepare_params(raw, eps=1e-5):
    """Fold BN, build banded bf16 conv weights, pad/permute/cast fc weights."""
    prep = {}

    # reflection selection matrices: sel[kw][xin, x] = 1 iff reflect(x+kw-1)==xin
    sel_np = np.zeros((3, W, W), np.float32)
    for kw in range(3):
        for x in range(W):
            xin = x + kw - 1
            if xin < 0:
                xin = -xin
            elif xin >= W:
                xin = 2 * W - 2 - xin
            sel_np[kw, xin, x] += 1.0
    sel = jnp.asarray(sel_np)

    bands, ep_rows = [], []
    for (c, bn, cin, cout) in (("c1", "bn1", 1, 4), ("c2", "bn2", 4, 8),
                               ("c3", "bn3", 8, 8)):
        wr = raw[f"{c}_w"]                                     # (cout, cin, 3, 3)
        wt = jnp.transpose(wr, (2, 3, 1, 0))                   # (3, 3, cin, cout)
        wp = jnp.zeros((3, 3, CPAD, CPAD),
                       jnp.float32).at[:, :, :cin, :cout].set(wt)
        band = jnp.zeros((3, LANES, LANES), jnp.float32)
        for kh in range(3):
            for kw in range(3):
                if cin == 1:
                    # layer-1 input lanes are plain x positions 0..W-1
                    blk = jnp.kron(sel[kw], wp[kh, kw, 0:1, :])   # (W, 128)
                    band = band.at[kh, :W, :].add(blk)
                else:
                    # interleaved input lanes xin*8 + ci
                    band = band.at[kh].add(jnp.kron(sel[kw], wp[kh, kw]))
        bands.append(band)

        scale = raw[f"{bn}_g"] / jnp.sqrt(raw[f"{bn}_v"] + eps)
        shift = raw[f"{bn}_b"] - raw[f"{bn}_m"] * scale

        def pad8(v):
            return jnp.zeros((CPAD,), jnp.float32).at[:cout].set(v)

        ep_rows.append(jnp.stack([jnp.tile(pad8(raw[f"{c}_b"]), W),
                                  jnp.tile(pad8(scale), W),
                                  jnp.tile(pad8(shift), W)]))

    prep["wc"] = jnp.concatenate(bands, axis=0).astype(jnp.bfloat16)  # (9,128,128)
    prep["conv_ep"] = jnp.stack(ep_rows)                              # (3,3,128)

    hw = H * W
    # permute fc1 rows once: PyTorch NCHW flatten (c*hw+s) -> kernel (s*8+c)
    w1 = raw["fc1_w"].reshape(CPAD, hw, 500).transpose(1, 0, 2).reshape(CPAD * hw, 500)
    w1 = jnp.pad(w1, ((0, 0), (0, NH - 500))).astype(jnp.bfloat16)    # (2048, 512)
    prep["fc1_w"] = w1.reshape(H, LANES, NH)                          # (16,128,512)
    prep["fc2_w"] = jnp.pad(raw["fc2_w"],
                            ((0, NH - 500), (0, NH - 500))).astype(jnp.bfloat16)
    prep["fc3_w"] = jnp.pad(raw["fc3_w"],
                            ((0, NH - 500), (0, NO - 5))).astype(jnp.bfloat16)
    prep["fc_b"] = jnp.stack([jnp.pad(raw["fc1_b"], (0, NH - 500)),
                              jnp.pad(raw["fc2_b"], (0, NH - 500)),
                              jnp.pad(raw["fc3_b"], (0, NH - 5))]).astype(jnp.float32)
    return prep


# ----------------------------------------------------------------------------
# Plain-JAX reference (PyTorch eval semantics; bf16 weights like the kernel)
# ----------------------------------------------------------------------------
def reference_forward(raw, x1, x2, eps=1e-5):
    def bf(a):  # kernel path uses bf16 matmul operands with f32 accumulation
        return a.astype(jnp.bfloat16).astype(jnp.float32)

    def conv_bn(x, wk, b, g, bt, m, v):
        xp = jnp.pad(x, ((0, 0), (0, 0), (1, 1), (1, 1)), mode="reflect")
        wq = bf(wk)
        y = b[None, :, None, None]
        for kh in range(3):
            for kw in range(3):
                y = y + jnp.einsum("nihw,oi->nohw",
                                   xp[:, :, kh:kh + H, kw:kw + W],
                                   wq[:, :, kh, kw])
        y = jnp.maximum(y, 0.0)
        s = g / jnp.sqrt(v + eps)
        t = bt - m * s
        return y * s[None, :, None, None] + t[None, :, None, None]

    def once(x):
        o = conv_bn(x, raw["c1_w"], raw["c1_b"], raw["bn1_g"], raw["bn1_b"],
                    raw["bn1_m"], raw["bn1_v"])
        o = conv_bn(o, raw["c2_w"], raw["c2_b"], raw["bn2_g"], raw["bn2_b"],
                    raw["bn2_m"], raw["bn2_v"])
        o = conv_bn(o, raw["c3_w"], raw["c3_b"], raw["bn3_g"], raw["bn3_b"],
                    raw["bn3_m"], raw["bn3_v"])
        o = bf(o.reshape(o.shape[0], -1))            # NCHW flatten, as in module
        o = jnp.maximum(o @ bf(raw["fc1_w"]) + raw["fc1_b"], 0.0)
        o = jnp.maximum(o @ bf(raw["fc2_w"]) + raw["fc2_b"], 0.0)
        return o @ bf(raw["fc3_w"]) + raw["fc3_b"]

    return once(x1), once(x2)


if __name__ == "__main__":
    N, C = 2, 1
    key = jax.random.PRNGKey(0)
    kp, k1, k2 = jax.random.split(key, 3)
    raw = init_params(kp, H, W)
    prep = prepare_params(raw)
    x1 = jax.random.normal(k1, (N, C, H, W), jnp.float32)
    x2 = jax.random.normal(k2, (N, C, H, W), jnp.float32)

    fwd = jax.jit(siamese_forward)
    out1, out2 = fwd(prep, x1, x2)
    jax.block_until_ready((out1, out2))

    assert out1.shape == (N, 5) and out2.shape == (N, 5)
    assert out1.dtype == jnp.float32 and out2.dtype == jnp.float32
    assert bool(jnp.isfinite(out1).all()) and bool(jnp.isfinite(out2).all())

    # loose sanity check against a plain-JAX reference of the same semantics
    r1, r2 = reference_forward(raw, x1, x2)
    for got, ref in ((out1, r1), (out2, r2)):
        err = float(jnp.max(jnp.abs(got - ref)))
        scale = float(jnp.max(jnp.abs(ref)))
        assert err <= 5e-2 * max(scale, 1.0), (err, scale)

    print("KERNEL_OK")
</pallas_src>

<mosaic_0001>
module attributes {stable_mosaic.version = 11 : i64} {
  func.func @_siamese_kernel(%arg0: i32, %arg1: memref<2x1x16x16xf32, #tpu.memory_space<vmem>>, %arg2: memref<2x1x16x16xf32, #tpu.memory_space<vmem>>, %arg3: memref<9x128x128xbf16, #tpu.memory_space<vmem>>, %arg4: memref<3x3x128xf32, #tpu.memory_space<vmem>>, %arg5: memref<16x128x512xbf16, #tpu.memory_space<vmem>>, %arg6: memref<512x512xbf16, #tpu.memory_space<vmem>>, %arg7: memref<512x128xbf16, #tpu.memory_space<vmem>>, %arg8: memref<3x512xf32, #tpu.memory_space<vmem>>, %arg9: memref<4x128xf32, #tpu.memory_space<vmem>>, %arg10: memref<4x18x128xf32, #tpu.memory_space<vmem>>, %arg11: memref<4x18x128xf32, #tpu.memory_space<vmem>>) attributes {dimension_semantics = [#tpu.dimension_semantics<arbitrary>], iteration_bounds = array<i64: 1>, scalar_prefetch = 0 : i64, scratch_operands = 2 : i64, tpu.core_type = #tpu.core_type<tc>, window_params = [{pipeline_mode = #tpu.pipeline_mode<synchronous>, transform_indices = @transform_0, window_bounds = array<i64: 2, 1, 16, 16>}, {pipeline_mode = #tpu.pipeline_mode<synchronous>, transform_indices = @transform_1, window_bounds = array<i64: 2, 1, 16, 16>}, {pipeline_mode = #tpu.pipeline_mode<synchronous>, transform_indices = @transform_2, window_bounds = array<i64: 9, 128, 128>}, {pipeline_mode = #tpu.pipeline_mode<synchronous>, transform_indices = @transform_3, window_bounds = array<i64: 3, 3, 128>}, {pipeline_mode = #tpu.pipeline_mode<synchronous>, transform_indices = @transform_4, window_bounds = array<i64: 16, 128, 512>}, {pipeline_mode = #tpu.pipeline_mode<synchronous>, transform_indices = @transform_5, window_bounds = array<i64: 512, 512>}, {pipeline_mode = #tpu.pipeline_mode<synchronous>, transform_indices = @transform_6, window_bounds = array<i64: 512, 128>}, {pipeline_mode = #tpu.pipeline_mode<synchronous>, transform_indices = @transform_7, window_bounds = array<i64: 3, 512>}, {pipeline_mode = #tpu.pipeline_mode<synchronous>, transform_indices = @transform_8, window_bounds = array<i64: 4, 128>}]} {
    %c0 = arith.constant 0 : index
    %c0_0 = arith.constant 0 : index
    %c0_1 = arith.constant 0 : index
    %c0_2 = arith.constant 0 : index
    %0 = vector.load %arg1[%c0, %c0_0, %c0_1, %c0_2] : memref<2x1x16x16xf32, #tpu.memory_space<vmem>>, vector<2x1x16x16xf32>
    %1 = vector.shape_cast %0 : vector<2x1x16x16xf32> to vector<2x16x16xf32>
    %c0_3 = arith.constant 0 : index
    %c0_4 = arith.constant 0 : index
    %c0_5 = arith.constant 0 : index
    %c0_6 = arith.constant 0 : index
    %2 = vector.load %arg2[%c0_3, %c0_4, %c0_5, %c0_6] : memref<2x1x16x16xf32, #tpu.memory_space<vmem>>, vector<2x1x16x16xf32>
    %3 = vector.shape_cast %2 : vector<2x1x16x16xf32> to vector<2x16x16xf32>
    %4 = tpu.concatenate %1, %3 in 0 : vector<2x16x16xf32>, vector<2x16x16xf32> -> vector<4x16x16xf32>
    %5 = vector.extract_strided_slice %4 {offsets = [0, 1, 0], sizes = [4, 1, 16], strides = [1, 1, 1]} : vector<4x16x16xf32> to vector<4x1x16xf32>
    %6 = vector.extract_strided_slice %4 {offsets = [0, 14, 0], sizes = [4, 1, 16], strides = [1, 1, 1]} : vector<4x16x16xf32> to vector<4x1x16xf32>
    %7 = tpu.concatenate %5, %4, %6 in 1 : vector<4x1x16xf32>, vector<4x16x16xf32>, vector<4x1x16xf32> -> vector<4x18x16xf32>
    %cst = arith.constant 0.000000e+00 : f32
    %8 = vector.broadcast %cst : f32 to vector<4x18x128xf32>
    %c0_7 = arith.constant 0 : index
    %c0_8 = arith.constant 0 : index
    %c0_9 = arith.constant 0 : index
    %9 = vector.load %arg10[%c0_7, %c0_8, %c0_9] : memref<4x18x128xf32, #tpu.memory_space<vmem>>, vector<4x18x128xf32>
    tpu.vector_store %arg10[%c0_7, %c0_8, %c0_9], %8 {strides = array<i32>} : memref<4x18x128xf32, #tpu.memory_space<vmem>>, vector<4x18x128xf32>,
    %c0_10 = arith.constant 0 : index
    %c0_11 = arith.constant 0 : index
    %c0_12 = arith.constant 0 : index
    %10 = vector.load %arg10[%c0_10, %c0_11, %c0_12] : memref<4x18x128xf32, #tpu.memory_space<vmem>>, vector<4x18x16xf32>
    tpu.vector_store %arg10[%c0_10, %c0_11, %c0_12], %7 {strides = array<i32>} : memref<4x18x128xf32, #tpu.memory_space<vmem>>, vector<4x18x16xf32>,
    %cst_13 = arith.constant 0.000000e+00 : f32
    %11 = vector.broadcast %cst_13 : f32 to vector<64x128xf32>
    %c0_14 = arith.constant 0 : index
    %c0_15 = arith.constant 0 : index
    %c0_16 = arith.constant 0 : index
    %12 = vector.load %arg10[%c0_14, %c0_15, %c0_16] : memref<4x18x128xf32, #tpu.memory_space<vmem>>, vector<4x16x128xf32>
    %13 = vector.shape_cast %12 : vector<4x16x128xf32> to vector<64x128xf32>
    %14 = arith.truncf %13 : vector<64x128xf32> to vector<64x128xbf16>
    %c0_17 = arith.constant 0 : index
    %c0_18 = arith.constant 0 : index
    %c0_19 = arith.constant 0 : index
    %15 = vector.load %arg3[%c0_17, %c0_18, %c0_19] : memref<9x128x128xbf16, #tpu.memory_space<vmem>>, vector<1x128x128xbf16>
    %16 = vector.shape_cast %15 : vector<1x128x128xbf16> to vector<128x128xbf16>
    %cst_20 = arith.constant dense<0.000000e+00> : vector<64x128xf32>
    %17 = tpu.matmul %14, %16, %cst_20 {dimension_numbers = #tpu.dot_dimension_numbers<[1], [0], [0], [1], [0, 0, 1, 1], [], []>} : vector<64x128xbf16>, vector<128x128xbf16>, vector<64x128xf32> -> vector<64x128xf32>
    %18 = arith.addf %11, %17 : vector<64x128xf32>
    %c0_21 = arith.constant 0 : index
    %c1 = arith.constant 1 : index
    %c0_22 = arith.constant 0 : index
    %19 = vector.load %arg10[%c0_21, %c1, %c0_22] : memref<4x18x128xf32, #tpu.memory_space<vmem>>, vector<4x16x128xf32>
    %20 = vector.shape_cast %19 : vector<4x16x128xf32> to vector<64x128xf32>
    %21 = arith.truncf %20 : vector<64x128xf32> to vector<64x128xbf16>
    %c1_23 = arith.constant 1 : index
    %c0_24 = arith.constant 0 : index
    %c0_25 = arith.constant 0 : index
    %22 = vector.load %arg3[%c1_23, %c0_24, %c0_25] : memref<9x128x128xbf16, #tpu.memory_space<vmem>>, vector<1x128x128xbf16>
    %23 = vector.shape_cast %22 : vector<1x128x128xbf16> to vector<128x128xbf16>
    %cst_26 = arith.constant dense<0.000000e+00> : vector<64x128xf32>
    %24 = tpu.matmul %21, %23, %cst_26 {dimension_numbers = #tpu.dot_dimension_numbers<[1], [0], [0], [1], [0, 0, 1, 1], [], []>} : vector<64x128xbf16>, vector<128x128xbf16>, vector<64x128xf32> -> vector<64x128xf32>
    %25 = arith.addf %18, %24 : vector<64x128xf32>
    %c0_27 = arith.constant 0 : index
    %c2 = arith.constant 2 : index
    %c0_28 = arith.constant 0 : index
    %26 = vector.load %arg10[%c0_27, %c2, %c0_28] : memref<4x18x128xf32, #tpu.memory_space<vmem>>, vector<4x16x128xf32>
    %27 = vector.shape_cast %26 : vector<4x16x128xf32> to vector<64x128xf32>
    %28 = arith.truncf %27 : vector<64x128xf32> to vector<64x128xbf16>
    %c2_29 = arith.constant 2 : index
    %c0_30 = arith.constant 0 : index
    %c0_31 = arith.constant 0 : index
    %29 = vector.load %arg3[%c2_29, %c0_30, %c0_31] : memref<9x128x128xbf16, #tpu.memory_space<vmem>>, vector<1x128x128xbf16>
    %30 = vector.shape_cast %29 : vector<1x128x128xbf16> to vector<128x128xbf16>
    %cst_32 = arith.constant dense<0.000000e+00> : vector<64x128xf32>
    %31 = tpu.matmul %28, %30, %cst_32 {dimension_numbers = #tpu.dot_dimension_numbers<[1], [0], [0], [1], [0, 0, 1, 1], [], []>} : vector<64x128xbf16>, vector<128x128xbf16>, vector<64x128xf32> -> vector<64x128xf32>
    %32 = arith.addf %25, %31 : vector<64x128xf32>
    %c0_33 = arith.constant 0 : index
    %c0_34 = arith.constant 0 : index
    %c0_35 = arith.constant 0 : index
    %33 = vector.load %arg4[%c0_33, %c0_34, %c0_35] : memref<3x3x128xf32, #tpu.memory_space<vmem>>, vector<1x1x128xf32>
    %34 = vector.shape_cast %33 : vector<1x1x128xf32> to vector<1x128xf32>
    %35 = vector.broadcast %34 : vector<1x128xf32> to vector<64x128xf32>
    %36 = arith.addf %32, %35 : vector<64x128xf32>
    %cst_36 = arith.constant 0.000000e+00 : f32
    %37 = vector.broadcast %cst_36 : f32 to vector<64x128xf32>
    %38 = arith.maximumf %36, %37 : vector<64x128xf32>
    %c0_37 = arith.constant 0 : index
    %c1_38 = arith.constant 1 : index
    %c0_39 = arith.constant 0 : index
    %39 = vector.load %arg4[%c0_37, %c1_38, %c0_39] : memref<3x3x128xf32, #tpu.memory_space<vmem>>, vector<1x1x128xf32>
    %40 = vector.shape_cast %39 : vector<1x1x128xf32> to vector<1x128xf32>
    %41 = vector.broadcast %40 : vector<1x128xf32> to vector<64x128xf32>
    %42 = arith.mulf %38, %41 : vector<64x128xf32>
    %c0_40 = arith.constant 0 : index
    %c2_41 = arith.constant 2 : index
    %c0_42 = arith.constant 0 : index
    %43 = vector.load %arg4[%c0_40, %c2_41, %c0_42] : memref<3x3x128xf32, #tpu.memory_space<vmem>>, vector<1x1x128xf32>
    %44 = vector.shape_cast %43 : vector<1x1x128xf32> to vector<1x128xf32>
    %45 = vector.broadcast %44 : vector<1x128xf32> to vector<64x128xf32>
    %46 = arith.addf %42, %45 : vector<64x128xf32>
    %47 = vector.shape_cast %46 : vector<64x128xf32> to vector<4x16x128xf32>
    %48 = vector.extract_strided_slice %47 {offsets = [0, 1, 0], sizes = [4, 1, 128], strides = [1, 1, 1]} : vector<4x16x128xf32> to vector<4x1x128xf32>
    %49 = vector.extract_strided_slice %47 {offsets = [0, 14, 0], sizes = [4, 1, 128], strides = [1, 1, 1]} : vector<4x16x128xf32> to vector<4x1x128xf32>
    %50 = tpu.concatenate %48, %47, %49 in 1 : vector<4x1x128xf32>, vector<4x16x128xf32>, vector<4x1x128xf32> -> vector<4x18x128xf32>
    %c0_43 = arith.constant 0 : index
    %c0_44 = arith.constant 0 : index
    %c0_45 = arith.constant 0 : index
    %51 = vector.load %arg11[%c0_43, %c0_44, %c0_45] : memref<4x18x128xf32, #tpu.memory_space<vmem>>, vector<4x18x128xf32>
    tpu.vector_store %arg11[%c0_43, %c0_44, %c0_45], %50 {strides = array<i32>} : memref<4x18x128xf32, #tpu.memory_space<vmem>>, vector<4x18x128xf32>,
    %cst_46 = arith.constant 0.000000e+00 : f32
    %52 = vector.broadcast %cst_46 : f32 to vector<64x128xf32>
    %c0_47 = arith.constant 0 : index
    %c0_48 = arith.constant 0 : index
    %c0_49 = arith.constant 0 : index
    %53 = vector.load %arg11[%c0_47, %c0_48, %c0_49] : memref<4x18x128xf32, #tpu.memory_space<vmem>>, vector<4x16x128xf32>
    %54 = vector.shape_cast %53 : vector<4x16x128xf32> to vector<64x128xf32>
    %55 = arith.truncf %54 : vector<64x128xf32> to vector<64x128xbf16>
    %c3 = arith.constant 3 : index
    %c0_50 = arith.constant 0 : index
    %c0_51 = arith.constant 0 : index
    %56 = vector.load %arg3[%c3, %c0_50, %c0_51] : memref<9x128x128xbf16, #tpu.memory_space<vmem>>, vector<1x128x128xbf16>
    %57 = vector.shape_cast %56 : vector<1x128x128xbf16> to vector<128x128xbf16>
    %cst_52 = arith.constant dense<0.000000e+00> : vector<64x128xf32>
    %58 = tpu.matmul %55, %57, %cst_52 {dimension_numbers = #tpu.dot_dimension_numbers<[1], [0], [0], [1], [0, 0, 1, 1], [], []>} : vector<64x128xbf16>, vector<128x128xbf16>, vector<64x128xf32> -> vector<64x128xf32>
    %59 = arith.addf %52, %58 : vector<64x128xf32>
    %c0_53 = arith.constant 0 : index
    %c1_54 = arith.constant 1 : index
    %c0_55 = arith.constant 0 : index
    %60 = vector.load %arg11[%c0_53, %c1_54, %c0_55] : memref<4x18x128xf32, #tpu.memory_space<vmem>>, vector<4x16x128xf32>
    %61 = vector.shape_cast %60 : vector<4x16x128xf32> to vector<64x128xf32>
    %62 = arith.truncf %61 : vector<64x128xf32> to vector<64x128xbf16>
    %c4 = arith.constant 4 : index
    %c0_56 = arith.constant 0 : index
    %c0_57 = arith.constant 0 : index
    %63 = vector.load %arg3[%c4, %c0_56, %c0_57] : memref<9x128x128xbf16, #tpu.memory_space<vmem>>, vector<1x128x128xbf16>
    %64 = vector.shape_cast %63 : vector<1x128x128xbf16> to vector<128x128xbf16>
    %cst_58 = arith.constant dense<0.000000e+00> : vector<64x128xf32>
    %65 = tpu.matmul %62, %64, %cst_58 {dimension_numbers = #tpu.dot_dimension_numbers<[1], [0], [0], [1], [0, 0, 1, 1], [], []>} : vector<64x128xbf16>, vector<128x128xbf16>, vector<64x128xf32> -> vector<64x128xf32>
    %66 = arith.addf %59, %65 : vector<64x128xf32>
    %c0_59 = arith.constant 0 : index
    %c2_60 = arith.constant 2 : index
    %c0_61 = arith.constant 0 : index
    %67 = vector.load %arg11[%c0_59, %c2_60, %c0_61] : memref<4x18x128xf32, #tpu.memory_space<vmem>>, vector<4x16x128xf32>
    %68 = vector.shape_cast %67 : vector<4x16x128xf32> to vector<64x128xf32>
    %69 = arith.truncf %68 : vector<64x128xf32> to vector<64x128xbf16>
    %c5 = arith.constant 5 : index
    %c0_62 = arith.constant 0 : index
    %c0_63 = arith.constant 0 : index
    %70 = vector.load %arg3[%c5, %c0_62, %c0_63] : memref<9x128x128xbf16, #tpu.memory_space<vmem>>, vector<1x128x128xbf16>
    %71 = vector.shape_cast %70 : vector<1x128x128xbf16> to vector<128x128xbf16>
    %cst_64 = arith.constant dense<0.000000e+00> : vector<64x128xf32>
    %72 = tpu.matmul %69, %71, %cst_64 {dimension_numbers = #tpu.dot_dimension_numbers<[1], [0], [0], [1], [0, 0, 1, 1], [], []>} : vector<64x128xbf16>, vector<128x128xbf16>, vector<64x128xf32> -> vector<64x128xf32>
    %73 = arith.addf %66, %72 : vector<64x128xf32>
    %c1_65 = arith.constant 1 : index
    %c0_66 = arith.constant 0 : index
    %c0_67 = arith.constant 0 : index
    %74 = vector.load %arg4[%c1_65, %c0_66, %c0_67] : memref<3x3x128xf32, #tpu.memory_space<vmem>>, vector<1x1x128xf32>
    %75 = vector.shape_cast %74 : vector<1x1x128xf32> to vector<1x128xf32>
    %76 = vector.broadcast %75 : vector<1x128xf32> to vector<64x128xf32>
    %77 = arith.addf %73, %76 : vector<64x128xf32>
    %cst_68 = arith.constant 0.000000e+00 : f32
    %78 = vector.broadcast %cst_68 : f32 to vector<64x128xf32>
    %79 = arith.maximumf %77, %78 : vector<64x128xf32>
    %c1_69 = arith.constant 1 : index
    %c1_70 = arith.constant 1 : index
    %c0_71 = arith.constant 0 : index
    %80 = vector.load %arg4[%c1_69, %c1_70, %c0_71] : memref<3x3x128xf32, #tpu.memory_space<vmem>>, vector<1x1x128xf32>
    %81 = vector.shape_cast %80 : vector<1x1x128xf32> to vector<1x128xf32>
    %82 = vector.broadcast %81 : vector<1x128xf32> to vector<64x128xf32>
    %83 = arith.mulf %79, %82 : vector<64x128xf32>
    %c1_72 = arith.constant 1 : index
    %c2_73 = arith.constant 2 : index
    %c0_74 = arith.constant 0 : index
    %84 = vector.load %arg4[%c1_72, %c2_73, %c0_74] : memref<3x3x128xf32, #tpu.memory_space<vmem>>, vector<1x1x128xf32>
    %85 = vector.shape_cast %84 : vector<1x1x128xf32> to vector<1x128xf32>
    %86 = vector.broadcast %85 : vector<1x128xf32> to vector<64x128xf32>
    %87 = arith.addf %83, %86 : vector<64x128xf32>
    %88 = vector.shape_cast %87 : vector<64x128xf32> to vector<4x16x128xf32>
    %89 = vector.extract_strided_slice %88 {offsets = [0, 1, 0], sizes = [4, 1, 128], strides = [1, 1, 1]} : vector<4x16x128xf32> to vector<4x1x128xf32>
    %90 = vector.extract_strided_slice %88 {offsets = [0, 14, 0], sizes = [4, 1, 128], strides = [1, 1, 1]} : vector<4x16x128xf32> to vector<4x1x128xf32>
    %91 = tpu.concatenate %89, %88, %90 in 1 : vector<4x1x128xf32>, vector<4x16x128xf32>, vector<4x1x128xf32> -> vector<4x18x128xf32>
    %c0_75 = arith.constant 0 : index
    %c0_76 = arith.constant 0 : index
    %c0_77 = arith.constant 0 : index
    %92 = vector.load %arg10[%c0_75, %c0_76, %c0_77] : memref<4x18x128xf32, #tpu.memory_space<vmem>>, vector<4x18x128xf32>
    tpu.vector_store %arg10[%c0_75, %c0_76, %c0_77], %91 {strides = array<i32>} : memref<4x18x128xf32, #tpu.memory_space<vmem>>, vector<4x18x128xf32>,
    %cst_78 = arith.constant 0.000000e+00 : f32
    %93 = vector.broadcast %cst_78 : f32 to vector<64x128xf32>
    %c0_79 = arith.constant 0 : index
    %c0_80 = arith.constant 0 : index
    %c0_81 = arith.constant 0 : index
    %94 = vector.load %arg10[%c0_79, %c0_80, %c0_81] : memref<4x18x128xf32, #tpu.memory_space<vmem>>, vector<4x16x128xf32>
    %95 = vector.shape_cast %94 : vector<4x16x128xf32> to vector<64x128xf32>
    %96 = arith.truncf %95 : vector<64x128xf32> to vector<64x128xbf16>
    %c6 = arith.constant 6 : index
    %c0_82 = arith.constant 0 : index
    %c0_83 = arith.constant 0 : index
    %97 = vector.load %arg3[%c6, %c0_82, %c0_83] : memref<9x128x128xbf16, #tpu.memory_space<vmem>>, vector<1x128x128xbf16>
    %98 = vector.shape_cast %97 : vector<1x128x128xbf16> to vector<128x128xbf16>
    %cst_84 = arith.constant dense<0.000000e+00> : vector<64x128xf32>
    %99 = tpu.matmul %96, %98, %cst_84 {dimension_numbers = #tpu.dot_dimension_numbers<[1], [0], [0], [1], [0, 0, 1, 1], [], []>} : vector<64x128xbf16>, vector<128x128xbf16>, vector<64x128xf32> -> vector<64x128xf32>
    %100 = arith.addf %93, %99 : vector<64x128xf32>
    %c0_85 = arith.constant 0 : index
    %c1_86 = arith.constant 1 : index
    %c0_87 = arith.constant 0 : index
    %101 = vector.load %arg10[%c0_85, %c1_86, %c0_87] : memref<4x18x128xf32, #tpu.memory_space<vmem>>, vector<4x16x128xf32>
    %102 = vector.shape_cast %101 : vector<4x16x128xf32> to vector<64x128xf32>
    %103 = arith.truncf %102 : vector<64x128xf32> to vector<64x128xbf16>
    %c7 = arith.constant 7 : index
    %c0_88 = arith.constant 0 : index
    %c0_89 = arith.constant 0 : index
    %104 = vector.load %arg3[%c7, %c0_88, %c0_89] : memref<9x128x128xbf16, #tpu.memory_space<vmem>>, vector<1x128x128xbf16>
    %105 = vector.shape_cast %104 : vector<1x128x128xbf16> to vector<128x128xbf16>
    %cst_90 = arith.constant dense<0.000000e+00> : vector<64x128xf32>
    %106 = tpu.matmul %103, %105, %cst_90 {dimension_numbers = #tpu.dot_dimension_numbers<[1], [0], [0], [1], [0, 0, 1, 1], [], []>} : vector<64x128xbf16>, vector<128x128xbf16>, vector<64x128xf32> -> vector<64x128xf32>
    %107 = arith.addf %100, %106 : vector<64x128xf32>
    %c0_91 = arith.constant 0 : index
    %c2_92 = arith.constant 2 : index
    %c0_93 = arith.constant 0 : index
    %108 = vector.load %arg10[%c0_91, %c2_92, %c0_93] : memref<4x18x128xf32, #tpu.memory_space<vmem>>, vector<4x16x128xf32>
    %109 = vector.shape_cast %108 : vector<4x16x128xf32> to vector<64x128xf32>
    %110 = arith.truncf %109 : vector<64x128xf32> to vector<64x128xbf16>
    %c8 = arith.constant 8 : index
    %c0_94 = arith.constant 0 : index
    %c0_95 = arith.constant 0 : index
    %111 = vector.load %arg3[%c8, %c0_94, %c0_95] : memref<9x128x128xbf16, #tpu.memory_space<vmem>>, vector<1x128x128xbf16>
    %112 = vector.shape_cast %111 : vector<1x128x128xbf16> to vector<128x128xbf16>
    %cst_96 = arith.constant dense<0.000000e+00> : vector<64x128xf32>
    %113 = tpu.matmul %110, %112, %cst_96 {dimension_numbers = #tpu.dot_dimension_numbers<[1], [0], [0], [1], [0, 0, 1, 1], [], []>} : vector<64x128xbf16>, vector<128x128xbf16>, vector<64x128xf32> -> vector<64x128xf32>
    %114 = arith.addf %107, %113 : vector<64x128xf32>
    %c2_97 = arith.constant 2 : index
    %c0_98 = arith.constant 0 : index
    %c0_99 = arith.constant 0 : index
    %115 = vector.load %arg4[%c2_97, %c0_98, %c0_99] : memref<3x3x128xf32, #tpu.memory_space<vmem>>, vector<1x1x128xf32>
    %116 = vector.shape_cast %115 : vector<1x1x128xf32> to vector<1x128xf32>
    %117 = vector.broadcast %116 : vector<1x128xf32> to vector<64x128xf32>
    %118 = arith.addf %114, %117 : vector<64x128xf32>
    %cst_100 = arith.constant 0.000000e+00 : f32
    %119 = vector.broadcast %cst_100 : f32 to vector<64x128xf32>
    %120 = arith.maximumf %118, %119 : vector<64x128xf32>
    %c2_101 = arith.constant 2 : index
    %c1_102 = arith.constant 1 : index
    %c0_103 = arith.constant 0 : index
    %121 = vector.load %arg4[%c2_101, %c1_102, %c0_103] : memref<3x3x128xf32, #tpu.memory_space<vmem>>, vector<1x1x128xf32>
    %122 = vector.shape_cast %121 : vector<1x1x128xf32> to vector<1x128xf32>
    %123 = vector.broadcast %122 : vector<1x128xf32> to vector<64x128xf32>
    %124 = arith.mulf %120, %123 : vector<64x128xf32>
    %c2_104 = arith.constant 2 : index
    %c2_105 = arith.constant 2 : index
    %c0_106 = arith.constant 0 : index
    %125 = vector.load %arg4[%c2_104, %c2_105, %c0_106] : memref<3x3x128xf32, #tpu.memory_space<vmem>>, vector<1x1x128xf32>
    %126 = vector.shape_cast %125 : vector<1x1x128xf32> to vector<1x128xf32>
    %127 = vector.broadcast %126 : vector<1x128xf32> to vector<64x128xf32>
    %128 = arith.addf %124, %127 : vector<64x128xf32>
    %129 = vector.shape_cast %128 : vector<64x128xf32> to vector<4x16x128xf32>
    %cst_107 = arith.constant 0.000000e+00 : f32
    %130 = vector.broadcast %cst_107 : f32 to vector<4x512xf32>
    %131 = vector.extract_strided_slice %129 {offsets = [0, 0, 0], sizes = [4, 1, 128], strides = [1, 1, 1]} : vector<4x16x128xf32> to vector<4x1x128xf32>
    %132 = vector.shape_cast %131 : vector<4x1x128xf32> to vector<4x128xf32>
    %133 = arith.truncf %132 : vector<4x128xf32> to vector<4x128xbf16>
    %c0_108 = arith.constant 0 : index
    %c0_109 = arith.constant 0 : index
    %c0_110 = arith.constant 0 : index
    %134 = vector.load %arg5[%c0_108, %c0_109, %c0_110] : memref<16x128x512xbf16, #tpu.memory_space<vmem>>, vector<1x128x512xbf16>
    %135 = vector.shape_cast %134 : vector<1x128x512xbf16> to vector<128x512xbf16>
    %cst_111 = arith.constant dense<0.000000e+00> : vector<4x512xf32>
    %136 = tpu.matmul %133, %135, %cst_111 {dimension_numbers = #tpu.dot_dimension_numbers<[1], [0], [0], [1], [0, 0, 1, 1], [], []>} : vector<4x128xbf16>, vector<128x512xbf16>, vector<4x512xf32> -> vector<4x512xf32>
    %137 = arith.addf %130, %136 : vector<4x512xf32>
    %138 = vector.extract_strided_slice %129 {offsets = [0, 1, 0], sizes = [4, 1, 128], strides = [1, 1, 1]} : vector<4x16x128xf32> to vector<4x1x128xf32>
    %139 = vector.shape_cast %138 : vector<4x1x128xf32> to vector<4x128xf32>
    %140 = arith.truncf %139 : vector<4x128xf32> to vector<4x128xbf16>
    %c1_112 = arith.constant 1 : index
    %c0_113 = arith.constant 0 : index
    %c0_114 = arith.constant 0 : index
    %141 = vector.load %arg5[%c1_112, %c0_113, %c0_114] : memref<16x128x512xbf16, #tpu.memory_space<vmem>>, vector<1x128x512xbf16>
    %142 = vector.shape_cast %141 : vector<1x128x512xbf16> to vector<128x512xbf16>
    %cst_115 = arith.constant dense<0.000000e+00> : vector<4x512xf32>
    %143 = tpu.matmul %140, %142, %cst_115 {dimension_numbers = #tpu.dot_dimension_numbers<[1], [0], [0], [1], [0, 0, 1, 1], [], []>} : vector<4x128xbf16>, vector<128x512xbf16>, vector<4x512xf32> -> vector<4x512xf32>
    %144 = arith.addf %137, %143 : vector<4x512xf32>
    %145 = vector.extract_strided_slice %129 {offsets = [0, 2, 0], sizes = [4, 1, 128], strides = [1, 1, 1]} : vector<4x16x128xf32> to vector<4x1x128xf32>
    %146 = vector.shape_cast %145 : vector<4x1x128xf32> to vector<4x128xf32>
    %147 = arith.truncf %146 : vector<4x128xf32> to vector<4x128xbf16>
    %c2_116 = arith.constant 2 : index
    %c0_117 = arith.constant 0 : index
    %c0_118 = arith.constant 0 : index
    %148 = vector.load %arg5[%c2_116, %c0_117, %c0_118] : memref<16x128x512xbf16, #tpu.memory_space<vmem>>, vector<1x128x512xbf16>
    %149 = vector.shape_cast %148 : vector<1x128x512xbf16> to vector<128x512xbf16>
    %cst_119 = arith.constant dense<0.000000e+00> : vector<4x512xf32>
    %150 = tpu.matmul %147, %149, %cst_119 {dimension_numbers = #tpu.dot_dimension_numbers<[1], [0], [0], [1], [0, 0, 1, 1], [], []>} : vector<4x128xbf16>, vector<128x512xbf16>, vector<4x512xf32> -> vector<4x512xf32>
    %151 = arith.addf %144, %150 : vector<4x512xf32>
    %152 = vector.extract_strided_slice %129 {offsets = [0, 3, 0], sizes = [4, 1, 128], strides = [1, 1, 1]} : vector<4x16x128xf32> to vector<4x1x128xf32>
    %153 = vector.shape_cast %152 : vector<4x1x128xf32> to vector<4x128xf32>
    %154 = arith.truncf %153 : vector<4x128xf32> to vector<4x128xbf16>
    %c3_120 = arith.constant 3 : index
    %c0_121 = arith.constant 0 : index
    %c0_122 = arith.constant 0 : index
    %155 = vector.load %arg5[%c3_120, %c0_121, %c0_122] : memref<16x128x512xbf16, #tpu.memory_space<vmem>>, vector<1x128x512xbf16>
    %156 = vector.shape_cast %155 : vector<1x128x512xbf16> to vector<128x512xbf16>
    %cst_123 = arith.constant dense<0.000000e+00> : vector<4x512xf32>
    %157 = tpu.matmul %154, %156, %cst_123 {dimension_numbers = #tpu.dot_dimension_numbers<[1], [0], [0], [1], [0, 0, 1, 1], [], []>} : vector<4x128xbf16>, vector<128x512xbf16>, vector<4x512xf32> -> vector<4x512xf32>
    %158 = arith.addf %151, %157 : vector<4x512xf32>
    %159 = vector.extract_strided_slice %129 {offsets = [0, 4, 0], sizes = [4, 1, 128], strides = [1, 1, 1]} : vector<4x16x128xf32> to vector<4x1x128xf32>
    %160 = vector.shape_cast %159 : vector<4x1x128xf32> to vector<4x128xf32>
    %161 = arith.truncf %160 : vector<4x128xf32> to vector<4x128xbf16>
    %c4_124 = arith.constant 4 : index
    %c0_125 = arith.constant 0 : index
    %c0_126 = arith.constant 0 : index
    %162 = vector.load %arg5[%c4_124, %c0_125, %c0_126] : memref<16x128x512xbf16, #tpu.memory_space<vmem>>, vector<1x128x512xbf16>
    %163 = vector.shape_cast %162 : vector<1x128x512xbf16> to vector<128x512xbf16>
    %cst_127 = arith.constant dense<0.000000e+00> : vector<4x512xf32>
    %164 = tpu.matmul %161, %163, %cst_127 {dimension_numbers = #tpu.dot_dimension_numbers<[1], [0], [0], [1], [0, 0, 1, 1], [], []>} : vector<4x128xbf16>, vector<128x512xbf16>, vector<4x512xf32> -> vector<4x512xf32>
    %165 = arith.addf %158, %164 : vector<4x512xf32>
    %166 = vector.extract_strided_slice %129 {offsets = [0, 5, 0], sizes = [4, 1, 128], strides = [1, 1, 1]} : vector<4x16x128xf32> to vector<4x1x128xf32>
    %167 = vector.shape_cast %166 : vector<4x1x128xf32> to vector<4x128xf32>
    %168 = arith.truncf %167 : vector<4x128xf32> to vector<4x128xbf16>
    %c5_128 = arith.constant 5 : index
    %c0_129 = arith.constant 0 : index
    %c0_130 = arith.constant 0 : index
    %169 = vector.load %arg5[%c5_128, %c0_129, %c0_130] : memref<16x128x512xbf16, #tpu.memory_space<vmem>>, vector<1x128x512xbf16>
    %170 = vector.shape_cast %169 : vector<1x128x512xbf16> to vector<128x512xbf16>
    %cst_131 = arith.constant dense<0.000000e+00> : vector<4x512xf32>
    %171 = tpu.matmul %168, %170, %cst_131 {dimension_numbers = #tpu.dot_dimension_numbers<[1], [0], [0], [1], [0, 0, 1, 1], [], []>} : vector<4x128xbf16>, vector<128x512xbf16>, vector<4x512xf32> -> vector<4x512xf32>
    %172 = arith.addf %165, %171 : vector<4x512xf32>
    %173 = vector.extract_strided_slice %129 {offsets = [0, 6, 0], sizes = [4, 1, 128], strides = [1, 1, 1]} : vector<4x16x128xf32> to vector<4x1x128xf32>
    %174 = vector.shape_cast %173 : vector<4x1x128xf32> to vector<4x128xf32>
    %175 = arith.truncf %174 : vector<4x128xf32> to vector<4x128xbf16>
    %c6_132 = arith.constant 6 : index
    %c0_133 = arith.constant 0 : index
    %c0_134 = arith.constant 0 : index
    %176 = vector.load %arg5[%c6_132, %c0_133, %c0_134] : memref<16x128x512xbf16, #tpu.memory_space<vmem>>, vector<1x128x512xbf16>
    %177 = vector.shape_cast %176 : vector<1x128x512xbf16> to vector<128x512xbf16>
    %cst_135 = arith.constant dense<0.000000e+00> : vector<4x512xf32>
    %178 = tpu.matmul %175, %177, %cst_135 {dimension_numbers = #tpu.dot_dimension_numbers<[1], [0], [0], [1], [0, 0, 1, 1], [], []>} : vector<4x128xbf16>, vector<128x512xbf16>, vector<4x512xf32> -> vector<4x512xf32>
    %179 = arith.addf %172, %178 : vector<4x512xf32>
    %180 = vector.extract_strided_slice %129 {offsets = [0, 7, 0], sizes = [4, 1, 128], strides = [1, 1, 1]} : vector<4x16x128xf32> to vector<4x1x128xf32>
    %181 = vector.shape_cast %180 : vector<4x1x128xf32> to vector<4x128xf32>
    %182 = arith.truncf %181 : vector<4x128xf32> to vector<4x128xbf16>
    %c7_136 = arith.constant 7 : index
    %c0_137 = arith.constant 0 : index
    %c0_138 = arith.constant 0 : index
    %183 = vector.load %arg5[%c7_136, %c0_137, %c0_138] : memref<16x128x512xbf16, #tpu.memory_space<vmem>>, vector<1x128x512xbf16>
    %184 = vector.shape_cast %183 : vector<1x128x512xbf16> to vector<128x512xbf16>
    %cst_139 = arith.constant dense<0.000000e+00> : vector<4x512xf32>
    %185 = tpu.matmul %182, %184, %cst_139 {dimension_numbers = #tpu.dot_dimension_numbers<[1], [0], [0], [1], [0, 0, 1, 1], [], []>} : vector<4x128xbf16>, vector<128x512xbf16>, vector<4x512xf32> -> vector<4x512xf32>
    %186 = arith.addf %179, %185 : vector<4x512xf32>
    %187 = vector.extract_strided_slice %129 {offsets = [0, 8, 0], sizes = [4, 1, 128], strides = [1, 1, 1]} : vector<4x16x128xf32> to vector<4x1x128xf32>
    %188 = vector.shape_cast %187 : vector<4x1x128xf32> to vector<4x128xf32>
    %189 = arith.truncf %188 : vector<4x128xf32> to vector<4x128xbf16>
    %c8_140 = arith.constant 8 : index
    %c0_141 = arith.constant 0 : index
    %c0_142 = arith.constant 0 : index
    %190 = vector.load %arg5[%c8_140, %c0_141, %c0_142] : memref<16x128x512xbf16, #tpu.memory_space<vmem>>, vector<1x128x512xbf16>
    %191 = vector.shape_cast %190 : vector<1x128x512xbf16> to vector<128x512xbf16>
    %cst_143 = arith.constant dense<0.000000e+00> : vector<4x512xf32>
    %192 = tpu.matmul %189, %191, %cst_143 {dimension_numbers = #tpu.dot_dimension_numbers<[1], [0], [0], [1], [0, 0, 1, 1], [], []>} : vector<4x128xbf16>, vector<128x512xbf16>, vector<4x512xf32> -> vector<4x512xf32>
    %193 = arith.addf %186, %192 : vector<4x512xf32>
    %194 = vector.extract_strided_slice %129 {offsets = [0, 9, 0], sizes = [4, 1, 128], strides = [1, 1, 1]} : vector<4x16x128xf32> to vector<4x1x128xf32>
    %195 = vector.shape_cast %194 : vector<4x1x128xf32> to vector<4x128xf32>
    %196 = arith.truncf %195 : vector<4x128xf32> to vector<4x128xbf16>
    %c9 = arith.constant 9 : index
    %c0_144 = arith.constant 0 : index
    %c0_145 = arith.constant 0 : index
    %197 = vector.load %arg5[%c9, %c0_144, %c0_145] : memref<16x128x512xbf16, #tpu.memory_space<vmem>>, vector<1x128x512xbf16>
    %198 = vector.shape_cast %197 : vector<1x128x512xbf16> to vector<128x512xbf16>
    %cst_146 = arith.constant dense<0.000000e+00> : vector<4x512xf32>
    %199 = tpu.matmul %196, %198, %cst_146 {dimension_numbers = #tpu.dot_dimension_numbers<[1], [0], [0], [1], [0, 0, 1, 1], [], []>} : vector<4x128xbf16>, vector<128x512xbf16>, vector<4x512xf32> -> vector<4x512xf32>
    %200 = arith.addf %193, %199 : vector<4x512xf32>
    %201 = vector.extract_strided_slice %129 {offsets = [0, 10, 0], sizes = [4, 1, 128], strides = [1, 1, 1]} : vector<4x16x128xf32> to vector<4x1x128xf32>
    %202 = vector.shape_cast %201 : vector<4x1x128xf32> to vector<4x128xf32>
    %203 = arith.truncf %202 : vector<4x128xf32> to vector<4x128xbf16>
    %c10 = arith.constant 10 : index
    %c0_147 = arith.constant 0 : index
    %c0_148 = arith.constant 0 : index
    %204 = vector.load %arg5[%c10, %c0_147, %c0_148] : memref<16x128x512xbf16, #tpu.memory_space<vmem>>, vector<1x128x512xbf16>
    %205 = vector.shape_cast %204 : vector<1x128x512xbf16> to vector<128x512xbf16>
    %cst_149 = arith.constant dense<0.000000e+00> : vector<4x512xf32>
    %206 = tpu.matmul %203, %205, %cst_149 {dimension_numbers = #tpu.dot_dimension_numbers<[1], [0], [0], [1], [0, 0, 1, 1], [], []>} : vector<4x128xbf16>, vector<128x512xbf16>, vector<4x512xf32> -> vector<4x512xf32>
    %207 = arith.addf %200, %206 : vector<4x512xf32>
    %208 = vector.extract_strided_slice %129 {offsets = [0, 11, 0], sizes = [4, 1, 128], strides = [1, 1, 1]} : vector<4x16x128xf32> to vector<4x1x128xf32>
    %209 = vector.shape_cast %208 : vector<4x1x128xf32> to vector<4x128xf32>
    %210 = arith.truncf %209 : vector<4x128xf32> to vector<4x128xbf16>
    %c11 = arith.constant 11 : index
    %c0_150 = arith.constant 0 : index
    %c0_151 = arith.constant 0 : index
    %211 = vector.load %arg5[%c11, %c0_150, %c0_151] : memref<16x128x512xbf16, #tpu.memory_space<vmem>>, vector<1x128x512xbf16>
    %212 = vector.shape_cast %211 : vector<1x128x512xbf16> to vector<128x512xbf16>
    %cst_152 = arith.constant dense<0.000000e+00> : vector<4x512xf32>
    %213 = tpu.matmul %210, %212, %cst_152 {dimension_numbers = #tpu.dot_dimension_numbers<[1], [0], [0], [1], [0, 0, 1, 1], [], []>} : vector<4x128xbf16>, vector<128x512xbf16>, vector<4x512xf32> -> vector<4x512xf32>
    %214 = arith.addf %207, %213 : vector<4x512xf32>
    %215 = vector.extract_strided_slice %129 {offsets = [0, 12, 0], sizes = [4, 1, 128], strides = [1, 1, 1]} : vector<4x16x128xf32> to vector<4x1x128xf32>
    %216 = vector.shape_cast %215 : vector<4x1x128xf32> to vector<4x128xf32>
    %217 = arith.truncf %216 : vector<4x128xf32> to vector<4x128xbf16>
    %c12 = arith.constant 12 : index
    %c0_153 = arith.constant 0 : index
    %c0_154 = arith.constant 0 : index
    %218 = vector.load %arg5[%c12, %c0_153, %c0_154] : memref<16x128x512xbf16, #tpu.memory_space<vmem>>, vector<1x128x512xbf16>
    %219 = vector.shape_cast %218 : vector<1x128x512xbf16> to vector<128x512xbf16>
    %cst_155 = arith.constant dense<0.000000e+00> : vector<4x512xf32>
    %220 = tpu.matmul %217, %219, %cst_155 {dimension_numbers = #tpu.dot_dimension_numbers<[1], [0], [0], [1], [0, 0, 1, 1], [], []>} : vector<4x128xbf16>, vector<128x512xbf16>, vector<4x512xf32> -> vector<4x512xf32>
    %221 = arith.addf %214, %220 : vector<4x512xf32>
    %222 = vector.extract_strided_slice %129 {offsets = [0, 13, 0], sizes = [4, 1, 128], strides = [1, 1, 1]} : vector<4x16x128xf32> to vector<4x1x128xf32>
    %223 = vector.shape_cast %222 : vector<4x1x128xf32> to vector<4x128xf32>
    %224 = arith.truncf %223 : vector<4x128xf32> to vector<4x128xbf16>
    %c13 = arith.constant 13 : index
    %c0_156 = arith.constant 0 : index
    %c0_157 = arith.constant 0 : index
    %225 = vector.load %arg5[%c13, %c0_156, %c0_157] : memref<16x128x512xbf16, #tpu.memory_space<vmem>>, vector<1x128x512xbf16>
    %226 = vector.shape_cast %225 : vector<1x128x512xbf16> to vector<128x512xbf16>
    %cst_158 = arith.constant dense<0.000000e+00> : vector<4x512xf32>
    %227 = tpu.matmul %224, %226, %cst_158 {dimension_numbers = #tpu.dot_dimension_numbers<[1], [0], [0], [1], [0, 0, 1, 1], [], []>} : vector<4x128xbf16>, vector<128x512xbf16>, vector<4x512xf32> -> vector<4x512xf32>
    %228 = arith.addf %221, %227 : vector<4x512xf32>
    %229 = vector.extract_strided_slice %129 {offsets = [0, 14, 0], sizes = [4, 1, 128], strides = [1, 1, 1]} : vector<4x16x128xf32> to vector<4x1x128xf32>
    %230 = vector.shape_cast %229 : vector<4x1x128xf32> to vector<4x128xf32>
    %231 = arith.truncf %230 : vector<4x128xf32> to vector<4x128xbf16>
    %c14 = arith.constant 14 : index
    %c0_159 = arith.constant 0 : index
    %c0_160 = arith.constant 0 : index
    %232 = vector.load %arg5[%c14, %c0_159, %c0_160] : memref<16x128x512xbf16, #tpu.memory_space<vmem>>, vector<1x128x512xbf16>
    %233 = vector.shape_cast %232 : vector<1x128x512xbf16> to vector<128x512xbf16>
    %cst_161 = arith.constant dense<0.000000e+00> : vector<4x512xf32>
    %234 = tpu.matmul %231, %233, %cst_161 {dimension_numbers = #tpu.dot_dimension_numbers<[1], [0], [0], [1], [0, 0, 1, 1], [], []>} : vector<4x128xbf16>, vector<128x512xbf16>, vector<4x512xf32> -> vector<4x512xf32>
    %235 = arith.addf %228, %234 : vector<4x512xf32>
    %236 = vector.extract_strided_slice %129 {offsets = [0, 15, 0], sizes = [4, 1, 128], strides = [1, 1, 1]} : vector<4x16x128xf32> to vector<4x1x128xf32>
    %237 = vector.shape_cast %236 : vector<4x1x128xf32> to vector<4x128xf32>
    %238 = arith.truncf %237 : vector<4x128xf32> to vector<4x128xbf16>
    %c15 = arith.constant 15 : index
    %c0_162 = arith.constant 0 : index
    %c0_163 = arith.constant 0 : index
    %239 = vector.load %arg5[%c15, %c0_162, %c0_163] : memref<16x128x512xbf16, #tpu.memory_space<vmem>>, vector<1x128x512xbf16>
    %240 = vector.shape_cast %239 : vector<1x128x512xbf16> to vector<128x512xbf16>
    %cst_164 = arith.constant dense<0.000000e+00> : vector<4x512xf32>
    %241 = tpu.matmul %238, %240, %cst_164 {dimension_numbers = #tpu.dot_dimension_numbers<[1], [0], [0], [1], [0, 0, 1, 1], [], []>} : vector<4x128xbf16>, vector<128x512xbf16>, vector<4x512xf32> -> vector<4x512xf32>
    %242 = arith.addf %235, %241 : vector<4x512xf32>
    %c0_165 = arith.constant 0 : index
    %c0_166 = arith.constant 0 : index
    %243 = vector.load %arg8[%c0_165, %c0_166] : memref<3x512xf32, #tpu.memory_space<vmem>>, vector<1x512xf32>
    %244 = vector.broadcast %243 : vector<1x512xf32> to vector<4x512xf32>
    %245 = arith.addf %242, %244 : vector<4x512xf32>
    %cst_167 = arith.constant 0.000000e+00 : f32
    %246 = vector.broadcast %cst_167 : f32 to vector<4x512xf32>
    %247 = arith.maximumf %245, %246 : vector<4x512xf32>
    %248 = arith.truncf %247 : vector<4x512xf32> to vector<4x512xbf16>
    %c0_168 = arith.constant 0 : index
    %c0_169 = arith.constant 0 : index
    %249 = vector.load %arg6[%c0_168, %c0_169] : memref<512x512xbf16, #tpu.memory_space<vmem>>, vector<512x512xbf16>
    %cst_170 = arith.constant dense<0.000000e+00> : vector<4x512xf32>
    %250 = tpu.matmul %248, %249, %cst_170 {dimension_numbers = #tpu.dot_dimension_numbers<[1], [0], [0], [1], [0, 0, 1, 1], [], []>} : vector<4x512xbf16>, vector<512x512xbf16>, vector<4x512xf32> -> vector<4x512xf32>
    %c1_171 = arith.constant 1 : index
    %c0_172 = arith.constant 0 : index
    %251 = vector.load %arg8[%c1_171, %c0_172] : memref<3x512xf32, #tpu.memory_space<vmem>>, vector<1x512xf32>
    %252 = vector.broadcast %251 : vector<1x512xf32> to vector<4x512xf32>
    %253 = arith.addf %250, %252 : vector<4x512xf32>
    %cst_173 = arith.constant 0.000000e+00 : f32
    %254 = vector.broadcast %cst_173 : f32 to vector<4x512xf32>
    %255 = arith.maximumf %253, %254 : vector<4x512xf32>
    %256 = arith.truncf %255 : vector<4x512xf32> to vector<4x512xbf16>
    %c0_174 = arith.constant 0 : index
    %c0_175 = arith.constant 0 : index
    %257 = vector.load %arg7[%c0_174, %c0_175] : memref<512x128xbf16, #tpu.memory_space<vmem>>, vector<512x128xbf16>
    %cst_176 = arith.constant dense<0.000000e+00> : vector<4x128xf32>
    %258 = tpu.matmul %256, %257, %cst_176 {dimension_numbers = #tpu.dot_dimension_numbers<[1], [0], [0], [1], [0, 0, 1, 1], [], []>} : vector<4x512xbf16>, vector<512x128xbf16>, vector<4x128xf32> -> vector<4x128xf32>
    %c2_177 = arith.constant 2 : index
    %c0_178 = arith.constant 0 : index
    %259 = vector.load %arg8[%c2_177, %c0_178] : memref<3x512xf32, #tpu.memory_space<vmem>>, vector<1x128xf32>
    %260 = vector.broadcast %259 : vector<1x128xf32> to vector<4x128xf32>
    %261 = arith.addf %258, %260 : vector<4x128xf32>
    %c0_179 = arith.constant 0 : index
    %c0_180 = arith.constant 0 : index
    %262 = vector.load %arg9[%c0_179, %c0_180] : memref<4x128xf32, #tpu.memory_space<vmem>>, vector<4x128xf32>
    tpu.vector_store %arg9[%c0_179, %c0_180], %261 {strides = array<i32>} : memref<4x128xf32, #tpu.memory_space<vmem>>, vector<4x128xf32>,
    return
  }
  func.func @transform_0(%arg0: i32) -> (i32, i32, i32, i32) {
    %c0_i32 = arith.constant 0 : i32
    %c0_i32_0 = arith.constant 0 : i32
    %c0_i32_1 = arith.constant 0 : i32
    %c0_i32_2 = arith.constant 0 : i32
    %c0_i32_3 = arith.constant 0 : i32
    return %c0_i32, %c0_i32_0, %c0_i32_1, %c0_i32_2 : i32, i32, i32, i32
  }
  func.func @transform_1(%arg0: i32) -> (i32, i32, i32, i32) {
    %c0_i32 = arith.constant 0 : i32
    %c0_i32_0 = arith.constant 0 : i32
    %c0_i32_1 = arith.constant 0 : i32
    %c0_i32_2 = arith.constant 0 : i32
    %c0_i32_3 = arith.constant 0 : i32
    return %c0_i32, %c0_i32_0, %c0_i32_1, %c0_i32_2 : i32, i32, i32, i32
  }
  func.func @transform_2(%arg0: i32) -> (i32, i32, i32) {
    %c0_i32 = arith.constant 0 : i32
    %c0_i32_0 = arith.constant 0 : i32
    %c0_i32_1 = arith.constant 0 : i32
    %c0_i32_2 = arith.constant 0 : i32
    return %c0_i32, %c0_i32_0, %c0_i32_1 : i32, i32, i32
  }
  func.func @transform_3(%arg0: i32) -> (i32, i32, i32) {
    %c0_i32 = arith.constant 0 : i32
    %c0_i32_0 = arith.constant 0 : i32
    %c0_i32_1 = arith.constant 0 : i32
    %c0_i32_2 = arith.constant 0 : i32
    return %c0_i32, %c0_i32_0, %c0_i32_1 : i32, i32, i32
  }
  func.func @transform_4(%arg0: i32) -> (i32, i32, i32) {
    %c0_i32 = arith.constant 0 : i32
    %c0_i32_0 = arith.constant 0 : i32
    %c0_i32_1 = arith.constant 0 : i32
    %c0_i32_2 = arith.constant 0 : i32
    return %c0_i32, %c0_i32_0, %c0_i32_1 : i32, i32, i32
  }
  func.func @transform_5(%arg0: i32) -> (i32, i32) {
    %c0_i32 = arith.constant 0 : i32
    %c0_i32_0 = arith.constant 0 : i32
    %c0_i32_1 = arith.constant 0 : i32
    return %c0_i32, %c0_i32_0 : i32, i32
  }
  func.func @transform_6(%arg0: i32) -> (i32, i32) {
    %c0_i32 = arith.constant 0 : i32
    %c0_i32_0 = arith.constant 0 : i32
    %c0_i32_1 = arith.constant 0 : i32
    return %c0_i32, %c0_i32_0 : i32, i32
  }
  func.func @transform_7(%arg0: i32) -> (i32, i32) {
    %c0_i32 = arith.constant 0 : i32
    %c0_i32_0 = arith.constant 0 : i32
    %c0_i32_1 = arith.constant 0 : i32
    return %c0_i32, %c0_i32_0 : i32, i32
  }
  func.func @transform_8(%arg0: i32) -> (i32, i32) {
    %c0_i32 = arith.constant 0 : i32
    %c0_i32_0 = arith.constant 0 : i32
    %c0_i32_1 = arith.constant 0 : i32
    return %c0_i32, %c0_i32_0 : i32, i32
  }
}

</mosaic_0001>

<bundles_post_ra>
// kernel: siamese_forward.1
= control target key start
LH: loop header
LB: loop body
LE: loop exit
PB: predicated region body
PF: predicated region fallthrough
CT: control target
= control target key end

     0   :  { %13 = vsyncpa [#allocation5], 0  ;;  %s10948_s0 = inlined_call_operand.hbm [shape: f32[2,1,16,16], index: 0, kind: input, shape index: {}]   ;;  %s10949_s1 = inlined_call_operand.hbm [shape: f32[2,1,16,16], index: 1, kind: input, shape index: {}]   ;;  %s10950_s2 = inlined_call_operand.hbm [shape: bf16[9,128,128], index: 2, kind: input, shape index: {}]   ;;  %s10951_s3 = inlined_call_operand.hbm [shape: f32[3,3,128], index: 3, kind: input, shape index: {}]   ;;  %s10952_s4 = inlined_call_operand.hbm [shape: bf16[16,128,512], index: 4, kind: input, shape index: {}]   ;;  %s10953_s5 = inlined_call_operand.hbm [shape: bf16[512,512], index: 5, kind: input, shape index: {}]   ;;  %s10954_s6 = inlined_call_operand.hbm [shape: bf16[512,128], index: 6, kind: input, shape index: {}]   ;;  %s10955_s7 = inlined_call_operand.hbm [shape: f32[3,512], index: 7, kind: input, shape index: {}]   ;;  %s10956_s8 = inlined_call_operand.vmem [shape: f32[4,128], index: 8, kind: output, shape index: {}]  }
   0x1   :  { %14 = vsyncpa [#allocation7], 0 }
   0x2   :  { %15 = vsyncpa [#allocation10], 0 }
   0x3   :  { %16 = vsyncpa [#allocation13], 0 }
   0x4   :  { %17 = vsyncpa [#allocation16], 0  ;;  %s10222_s27 = smov [#allocation6]   ;;  %s10036_s9 = scalar_lea.hbm %s10949_s1, 512 }
   0x5   :  { %s35_s28 = sshll.u32 %s10222_s27, 4  ;;  %p10037_p0 = scmp.ne.s32.totalorder %s10949_s1, %s10036_s9  ;;  %s36_s28 = int_to_ptr.vmem [resolvable:$true] %s35_s28 }
   0x6   :  { %p10040_p1 = scmp.lt.u32.totalorder %s10036_s9, %s10949_s1 }
   0x8   :  { %p10042_p2 = pnand %p10040_p1, %p10037_p0 }
   0xa   :  { %10045 = shalt.err (!%p10042_p2)
}
   0xb   :  { %s10046_s14 = scalar_lea.vmem %s36_s28, 512  ;;  %p10051_p4 = scmp.lt.s32.totalorder %s36_s28, %s36_s28 }
   0xc   :  { %p10047_p3 = scmp.ne.s32.totalorder %s36_s28, %s10046_s14  ;;  %p10052_p5 = scmp.lt.s32.totalorder %s10046_s14, %s10046_s14 }
   0xe   :  { %p10053_p6 = por %p10052_p5, %p10051_p4 }
  0x10   :  { %p10054_p7 = pnand %p10053_p6, %p10047_p3 }
  0x12   :  { %10057 = shalt.err (!%p10054_p7)
}
  0x13   :  { %s10223_s15 = smov 128   ;;  %s10224_s16 = smov 8  }
  0x14   :  { %41 = dma.hbm_to_vmem [thread:$0]  %s10949_s1, 512, %s36_s28, [#allocation7], %s10223_s15, %s10223_s15, %s10224_s16  }
  0x15   :  { %s10225_s19 = smov [#allocation9]   ;;  %s10058_s23 = scalar_lea.hbm %s10951_s3, 192 }
  0x16   :  { %s59_s20 = sshll.u32 %s10225_s19, 4  ;;  %p10059_p8 = scmp.ne.s32.totalorder %s10951_s3, %s10058_s23  ;;  %s60_s20 = int_to_ptr.vmem [resolvable:$true] %s59_s20 }
  0x17   :  { %p10062_p9 = scmp.lt.u32.totalorder %s10058_s23, %s10951_s3 }
  0x19   :  { %p10064_p10 = pnand %p10062_p9, %p10059_p8 }
  0x1b   :  { %10067 = shalt.err (!%p10064_p10)
}
  0x1c   :  { %s10068_s29 = scalar_lea.vmem %s60_s20, 192  ;;  %p10073_p12 = scmp.lt.s32.totalorder %s60_s20, %s60_s20 }
  0x1d   :  { %p10069_p11 = scmp.ne.s32.totalorder %s60_s20, %s10068_s29  ;;  %p10074_p13 = scmp.lt.s32.totalorder %s10068_s29, %s10068_s29 }
  0x1f   :  { %p10075_p0 = por %p10074_p13, %p10073_p12 }
  0x21   :  { %p10076_p1 = pnand %p10075_p0, %p10069_p11 }
  0x23   :  { %10079 = shalt.err (!%p10076_p1)
}
  0x24   :  { %s10226_s1 = smov 64   ;;  %s10227_s28 = smov 4  }
  0x25   :  { %65 = dma.hbm_to_vmem [thread:$0]  %s10951_s3, 192, %s60_s20, [#allocation10], %s10226_s1, %s10226_s1, %s10227_s28  }
  0x26   :  { %s10228_s10 = smov [#allocation12]   ;;  %s10229_s12 = smov [#allocation4]  }
  0x27   :  { %s83_s11 = sshll.u32 %s10228_s10, 4  ;;  %s23_s13 = sshll.u32 %s10229_s12, 4  ;;  %s84_s11 = int_to_ptr.vmem [resolvable:$true] %s83_s11  ;;  %s10313_s13 = int_to_ptr.vmem [resolvable:$true] %s23_s13 }
  0x28   :  { %s10080_s18 = scalar_lea.hbm %s10953_s5, 16384 }
  0x29   :  { %p10081_p2 = scmp.ne.s32.totalorder %s10953_s5, %s10080_s18  ;;  %p10084_p3 = scmp.lt.u32.totalorder %s10080_s18, %s10953_s5 }
  0x2b   :  { %p10086_p4 = pnand %p10084_p3, %p10081_p2 }
  0x2d   :  { %10089 = shalt.err (!%p10086_p4)
}
  0x2e   :  { %s10090_s3 = scalar_lea.vmem %s84_s11, 16384  ;;  %p10095_p6 = scmp.lt.s32.totalorder %s84_s11, %s84_s11 }
  0x2f   :  { %p10091_p5 = scmp.ne.s32.totalorder %s84_s11, %s10090_s3  ;;  %p10096_p7 = scmp.lt.s32.totalorder %s10090_s3, %s10090_s3 }
  0x31   :  { %p10097_p8 = por %p10096_p7, %p10095_p6 }
  0x33   :  { %p10098_p9 = pnand %p10097_p8, %p10091_p5 }
  0x35   :  { %10101 = shalt.err (!%p10098_p9)
}
  0x36   :  { %s10230_s20 = smov 256   ;;  %s10231_s24 = smov 16  }
  0x37   :  { %89 = dma.hbm_to_vmem [thread:$0]  %s10953_s5, 16384, %s84_s11, [#allocation13], %s10230_s20, %s10230_s20, %s10231_s24  }
  0x38   :  { %s10102_s30 = scalar_lea.hbm %s10948_s0, 512 }
  0x39   :  { %p10103_p10 = scmp.ne.s32.totalorder %s10948_s0, %s10102_s30  ;;  %p10106_p11 = scmp.lt.u32.totalorder %s10102_s30, %s10948_s0 }
  0x3b   :  { %p10108_p12 = pnand %p10106_p11, %p10103_p10 }
  0x3d   :  { %10111 = shalt.err (!%p10108_p12)
}
  0x3e   :  { %s10112_s17 = scalar_lea.vmem %s10313_s13, 512  ;;  %p10117_p0 = scmp.lt.s32.totalorder %s10313_s13, %s10313_s13 }
  0x3f   :  { %p10113_p13 = scmp.ne.s32.totalorder %s10313_s13, %s10112_s17  ;;  %p10118_p1 = scmp.lt.s32.totalorder %s10112_s17, %s10112_s17 }
  0x41   :  { %p10119_p2 = por %p10118_p1, %p10117_p0 }
  0x43   :  { %p10120_p3 = pnand %p10119_p2, %p10113_p13 }
  0x45   :  { %10123 = shalt.err (!%p10120_p3)
}
  0x46   :  { %29 = dma.hbm_to_vmem [thread:$0]  %s10948_s0, 512, %s10313_s13, [#allocation5], %s10223_s15, %s10223_s15, %s10224_s16  }
  0x47   :  { %s10232_s18 = smov [#allocation8]   ;;  %s10233_s21 = smov [#allocation11]  }
  0x48   :  { %s47_s19 = sshll.u32 %s10232_s18, 4  ;;  %s71_s22 = sshll.u32 %s10233_s21, 4  ;;  %s48_s19 = int_to_ptr.vmem [resolvable:$true] %s47_s19  ;;  %s10350_s22 = int_to_ptr.vmem [resolvable:$true] %s71_s22 }
  0x49   :  { %s10124_s25 = scalar_lea.hbm %s10950_s2, 9216 }
  0x4a   :  { %p10125_p4 = scmp.ne.s32.totalorder %s10950_s2, %s10124_s25  ;;  %p10128_p5 = scmp.lt.u32.totalorder %s10124_s25, %s10950_s2 }
  0x4c   :  { %p10130_p6 = pnand %p10128_p5, %p10125_p4 }
  0x4e   :  { %10133 = shalt.err (!%p10130_p6)
}
  0x4f   :  { %s10134_s0 = scalar_lea.vmem %s48_s19, 9216  ;;  %p10139_p8 = scmp.lt.s32.totalorder %s48_s19, %s48_s19 }
  0x50   :  { %p10135_p7 = scmp.ne.s32.totalorder %s48_s19, %s10134_s0  ;;  %p10140_p9 = scmp.lt.s32.totalorder %s10134_s0, %s10134_s0 }
  0x52   :  { %p10141_p10 = por %p10140_p9, %p10139_p8 }
  0x54   :  { %p10142_p11 = pnand %p10141_p10, %p10135_p7 }
  0x56   :  { %10145 = shalt.err (!%p10142_p11)
}
  0x57   :  { %53 = dma.hbm_to_vmem [thread:$0]  %s10950_s2, 9216, %s48_s19, [#allocation7], %s10226_s1, %s10226_s1, %s10227_s28  }
  0x58   :  { %s10146_s10 = scalar_lea.hbm %s10952_s4, 65536 }
  0x59   :  { %p10147_p12 = scmp.ne.s32.totalorder %s10952_s4, %s10146_s10  ;;  %p10150_p13 = scmp.lt.u32.totalorder %s10146_s10, %s10952_s4 }
  0x5b   :  { %p10152_p0 = pnand %p10150_p13, %p10147_p12 }
  0x5d   :  { %10155 = shalt.err (!%p10152_p0)
}
  0x5e   :  { %s10156_s11 = scalar_lea.vmem %s10350_s22, 65536  ;;  %p10161_p2 = scmp.lt.s32.totalorder %s10350_s22, %s10350_s22 }
  0x5f   :  { %p10157_p1 = scmp.ne.s32.totalorder %s10350_s22, %s10156_s11  ;;  %p10162_p3 = scmp.lt.s32.totalorder %s10156_s11, %s10156_s11 }
  0x61   :  { %p10163_p4 = por %p10162_p3, %p10161_p2 }
  0x63   :  { %p10164_p5 = pnand %p10163_p4, %p10157_p1 }
  0x65   :  { %10167 = shalt.err (!%p10164_p5)
}
  0x66   :  { %77 = dma.hbm_to_vmem [thread:$0]  %s10952_s4, 65536, %s10350_s22, [#allocation10], %s10230_s20, %s10230_s20, %s10231_s24  }
  0x67   :  { %s10234_s19 = smov [#allocation14]   ;;  %s10235_s23 = smov [#allocation15]  }
  0x68   :  { %s95_s21 = sshll.u32 %s10234_s19, 4  ;;  %s108_s3 = sshll.u32 %s10235_s23, 4  ;;  %s96_s21 = int_to_ptr.vmem [resolvable:$true] %s95_s21  ;;  %s109_s3 = int_to_ptr.vmem [resolvable:$true] %s108_s3 }
  0x69   :  { %s10168_s27 = scalar_lea.hbm %s10954_s6, 4096 }
  0x6a   :  { %p10169_p6 = scmp.ne.s32.totalorder %s10954_s6, %s10168_s27  ;;  %p10172_p7 = scmp.lt.u32.totalorder %s10168_s27, %s10954_s6 }
  0x6c   :  { %p10174_p8 = pnand %p10172_p7, %p10169_p6 }
  0x6e   :  { %10177 = shalt.err (!%p10174_p8)
}
  0x6f   :  { %s10178_s4 = scalar_lea.vmem %s96_s21, 4096  ;;  %p10183_p10 = scmp.lt.s32.totalorder %s96_s21, %s96_s21 }
  0x70   :  { %p10179_p9 = scmp.ne.s32.totalorder %s96_s21, %s10178_s4  ;;  %p10184_p11 = scmp.lt.s32.totalorder %s10178_s4, %s10178_s4 }
  0x72   :  { %p10185_p12 = por %p10184_p11, %p10183_p10 }
  0x74   :  { %p10186_p13 = pnand %p10185_p12, %p10179_p9 }
  0x76   :  { %10189 = shalt.err (!%p10186_p13)
}
  0x77   :  { %101 = dma.hbm_to_vmem [thread:$0]  %s10954_s6, 4096, %s96_s21, [#allocation13], %s10226_s1, %s10226_s1, %s10227_s28  }
  0x78   :  { %s10190_s13 = scalar_lea.hbm %s10955_s7, 256 }
  0x79   :  { %p10191_p0 = scmp.ne.s32.totalorder %s10955_s7, %s10190_s13  ;;  %p10194_p1 = scmp.lt.u32.totalorder %s10190_s13, %s10955_s7 }
  0x7b   :  { %p10196_p2 = pnand %p10194_p1, %p10191_p0 }
  0x7d   :  { %10199 = shalt.err (!%p10196_p2)
}
  0x7e   :  { %s10200_s17 = scalar_lea.vmem %s109_s3, 256  ;;  %p10205_p4 = scmp.lt.s32.totalorder %s109_s3, %s109_s3 }
  0x7f   :  { %p10201_p3 = scmp.ne.s32.totalorder %s109_s3, %s10200_s17  ;;  %p10206_p5 = scmp.lt.s32.totalorder %s10200_s17, %s10200_s17 }
  0x81   :  { %p10207_p6 = por %p10206_p5, %p10205_p4 }
  0x83   :  { %p10208_p7 = pnand %p10207_p6, %p10201_p3 }
  0x85   :  { %10211 = shalt.err (!%p10208_p7)
}
  0x86   :  { %111 = dma.hbm_to_vmem [thread:$0]  %s10955_s7, 256, %s109_s3, [#allocation16]  }
  0x87   :  { %10212 = dma.done.wait [#allocation5], 512  }
  0x88   :  { %10213 = vsyncadd [#allocation5], 4294966784 }
  0x89   :  { %10214 = dma.done.wait [#allocation7], 9728  }
  0x8a   :  { %10215 = vsyncadd [#allocation7], 4294957568 }
  0x8b   :  { %10216 = dma.done.wait [#allocation10], 65728  }
  0x8c   :  { %10217 = vsyncadd [#allocation10], 4294901568 }
  0x8d   :  { %10218 = dma.done.wait [#allocation13], 20480  }
  0x8e   :  { %10219 = vsyncadd [#allocation13], 4294946816 }
  0x8f   :  { %10220 = dma.done.wait [#allocation16], 256  }
  0x90   :  { %10221 = vsyncadd [#allocation16], 4294967040  ;;  %v10236_v0 = vmov 0.0   ;;  %v8972_v1 = vld [vmem:[#allocation8 + $0x40] sm:$0xff]   ;;  %v8973_v2 = vld [vmem:[#allocation8 + $0x48] sm:$0xff]   ;;  %vm161_vm0 = vcmask 1040384  }
  0x91   :  { %202 = vst [vmem:[#allocation2] sm:$0xff] %v10236_v0  ;;  %203 = vst [vmem:[#allocation2 + $0x8] sm:$0xff] %v10236_v0  ;;  %8680 = vmatprep.subr.bf16.mxu0 %v8972_v1  ;;  %v8974_v3 = vld [vmem:[#allocation8 + $0x50] sm:$0xff]   ;;  %v8975_v4 = vld [vmem:[#allocation8 + $0x58] sm:$0xff]   ;;  %vm214_vm1 = vcmask 130048   ;;  %vm217_vm2 = vcmask 123904  }
  0x92   :  { %204 = vst [vmem:[#allocation2 + $0x10] sm:$0x3] %v10236_v0  ;;  %205 = vst [vmem:[#allocation2 + $0x18] sm:$0xff] %v10236_v0  ;;  %8681 = vmatpush3.bf16.msra.mxu0 %v8972_v1  ;;  %v137_v5 = vld [vmem:[#allocation4] sm:$0xff]  ;;  %v138_v6 = vld [vmem:[#allocation4 + $0x8] sm:$0xff]  ;;  %vm1886_vm3 = vcmask 1041409  }
  0x93   :  { %206 = vst [vmem:[#allocation2 + $0x20] sm:$0xff] %v10236_v0  ;;  %207 = vst [vmem:[#allocation2 + $0x28] sm:$0x3] %v10236_v0  ;;  %8682 = vmatprep.subr.bf16.mxu0 %v8973_v2  ;;  %v149_v7 = vrot.slane %v137_v5, 1  ;;  %v162_v8 = vrot.slane %v137_v5, 7  ;;  %v163_v9 = vrot.slane %v138_v6, 7 }
  0x94   :  { %208 = vst [vmem:[#allocation2 + $0x30] sm:$0xff] %v10236_v0  ;;  %209 = vst [vmem:[#allocation2 + $0x38] sm:$0xff] %v10236_v0  ;;  %v186_v10 = vrot.slane %v138_v6, 5  ;;  %v139_v11 = vld [vmem:[#allocation4 + $0x10] sm:$0xff]  ;;  %v140_v12 = vld [vmem:[#allocation4 + $0x18] sm:$0xff]  ;;  %vm1889_vm4 = vcmask 1042434  }
  0x95   :  { %210 = vst [vmem:[#allocation2 + $0x40] sm:$0x3] %v10236_v0  ;;  %211 = vst [vmem:[#allocation2 + $0x48] sm:$0xff] %v10236_v0  ;;  %v164_v13 = vsel %vm161_vm0, %v162_v8, %v163_v9  ;;  %v194_v14 = vsel %vm161_vm0, %v149_v7, %v162_v8  ;;  %v150_v16 = vrot.slane %v139_v11, 1  ;;  %v8976_v17 = vld [vmem:[#allocation8 + $0x60] sm:$0xff]   ;;  %v165_v18 = vrot.slane %v139_v11, 7 }
  0x96   :  { %212 = vst [vmem:[#allocation2 + $0x50] sm:$0xff] %v10236_v0  ;;  %213 = vst [vmem:[#allocation2 + $0x58] sm:$0x3] %v10236_v0  ;;  %8683 = vmatpush3.bf16.msra.mxu0 %v8973_v2  ;;  %v198_v15 = vsel %vm161_vm0, %v163_v9, %v186_v10  ;;  %v166_v19 = vrot.slane %v140_v12, 7  ;;  %v187_v20 = vrot.slane %v140_v12, 5  ;;  %v8977_v24 = vld [vmem:[#allocation8 + $0x68] sm:$0xff]  }
  0x97   :  { %8684 = vmatprep.subr.bf16.mxu0 %v8974_v3  ;;  %215 = vst.msk [vmem:[#allocation2] sm:$0xff] %vm214_vm1, %v194_v14  ;;  %216 = vst.msk [vmem:[#allocation2 + $0x8] sm:$0xff] %vm214_vm1, %v164_v13  ;;  %v195_v22 = vsel %vm161_vm0, %v150_v16, %v165_v18  ;;  %v141_v25 = vld [vmem:[#allocation6] sm:$0xff]  ;;  %v142_v26 = vld [vmem:[#allocation6 + $0x8] sm:$0xff]  ;;  %vm1892_vm5 = vcmask 1043459  }
  0x98   :  { %218 = vst.msk [vmem:[#allocation2 + $0x10] sm:$0x3] %vm217_vm2, %v198_v15  ;;  %v167_v21 = vsel %vm161_vm0, %v165_v18, %v166_v19  ;;  %v199_v23 = vsel %vm161_vm0, %v166_v19, %v187_v20  ;;  %v151_v27 = vrot.slane %v141_v25, 1  ;;  %v168_v28 = vrot.slane %v141_v25, 7  ;;  %v143_v31 = vld [vmem:[#allocation6 + $0x10] sm:$0xff]  ;;  %v144_v37 = vld [vmem:[#allocation6 + $0x18] sm:$0xff] }
  0x99   :  { %219 = vst.msk [vmem:[#allocation2 + $0x18] sm:$0xff] %vm214_vm1, %v195_v22  ;;  %220 = vst.msk [vmem:[#allocation2 + $0x20] sm:$0xff] %vm214_vm1, %v167_v21  ;;  %v169_v29 = vrot.slane %v142_v26, 7  ;;  %v188_v30 = vrot.slane %v142_v26, 5  ;;  %v152_v38 = vrot.slane %v143_v31, 1  ;;  %v8978_v39 = vld [vmem:[#allocation8 + $0x70] sm:$0xff]  }
  0x9a   :  { %8685 = vmatpush3.bf16.msra.mxu0 %v8974_v3  ;;  %221 = vst.msk [vmem:[#allocation2 + $0x28] sm:$0x3] %vm217_vm2, %v199_v23  ;;  %v196_v35 = vsel %vm161_vm0, %v151_v27, %v168_v28  ;;  %v171_v41 = vrot.slane %v143_v31, 7  ;;  %v172_v42 = vrot.slane %v144_v37, 7  ;;  %v189_v43 = vrot.slane %v144_v37, 5  ;;  %v8979_v47 = vld [vmem:[#allocation8 + $0x78] sm:$0xff]  }
  0x9b   :  { %8686 = vmatprep.subr.bf16.mxu0 %v8975_v4  ;;  %v170_v34 = vsel %vm161_vm0, %v168_v28, %v169_v29  ;;  %v200_v36 = vsel %vm161_vm0, %v169_v29, %v188_v30  ;;  %222 = vst.msk [vmem:[#allocation2 + $0x30] sm:$0xff] %vm214_vm1, %v196_v35  ;;  %v8980_v48 = vld [vmem:[#allocation8] sm:$0xff]   ;;  %v8981_v55 = vld [vmem:[#allocation8 + $0x8] sm:$0xff]   ;;  %v8982_v56 = vld [vmem:[#allocation8 + $0x10] sm:$0xff]  }
  0x9c   :  { %223 = vst.msk [vmem:[#allocation2 + $0x38] sm:$0xff] %vm214_vm1, %v170_v34  ;;  %v173_v44 = vsel %vm161_vm0, %v171_v41, %v172_v42  ;;  %v197_v45 = vsel %vm161_vm0, %v152_v38, %v171_v41  ;;  %v201_v46 = vsel %vm161_vm0, %v172_v42, %v189_v43  ;;  %v8996_v61 = vld [vmem:[#allocation8 + $0x100] sm:$0xff]   ;;  %v8983_v62 = vld [vmem:[#allocation8 + $0x18] sm:$0xff]   ;;  %v8997_v0 = vld [vmem:[#allocation8 + $0x108] sm:$0xff]  }
  0x9d   :  { %224 = vst.msk [vmem:[#allocation2 + $0x40] sm:$0x3] %vm217_vm2, %v200_v36  ;;  %227 = vst.msk [vmem:[#allocation2 + $0x58] sm:$0x3] %vm217_vm2, %v201_v46  ;;  %8752 = vmatprep.subr.bf16.mxu1 %v8996_v61  ;;  %v8984_v2 = vld [vmem:[#allocation8 + $0x20] sm:$0xff]   ;;  %v8985_v3 = vld [vmem:[#allocation8 + $0x28] sm:$0xff]  }
  0x9e   :  { %8687 = vmatpush3.bf16.msra.mxu0 %v8975_v4  ;;  %v256_v32 = vld [vmem:[#allocation2 + $0x1] sm:$0xff]  ;;  %225 = vst.msk [vmem:[#allocation2 + $0x48] sm:$0xff] %vm214_vm1, %v197_v45  ;;  %226 = vst.msk [vmem:[#allocation2 + $0x50] sm:$0xff] %vm214_vm1, %v173_v44  ;;  %8753 = vmatpush3.bf16.msra.mxu1 %v8996_v61  ;;  %v8986_v4 = vld [vmem:[#allocation8 + $0x30] sm:$0xff]  }
  0x9f   :  { %8688 = vmatprep.subr.bf16.mxu0 %v8976_v17  ;;  %v257_v33 = vld [vmem:[#allocation2 + $0x9] sm:$0xff]  ;;  %v228_v59 = vld [vmem:[#allocation2] sm:$0xff]  ;;  %8754 = vmatprep.subr.bf16.mxu1 %v8997_v0  ;;  %v8987_v5 = vld [vmem:[#allocation8 + $0x38] sm:$0xff]  }
  0xa0   :  { %v264_v40 = vpack.c.bf16 %v257_v33, %v256_v32  ;;  %v258_v49 = vld [vmem:[#allocation2 + $0x19] sm:$0xff]  ;;  %v229_v60 = vld [vmem:[#allocation2 + $0x8] sm:$0xff]  ;;  %v8990_v16 = vld [vmem:[#allocation8 + $0x90] sm:$0xff]  }
  0xa1   :  { %v259_v50 = vld [vmem:[#allocation2 + $0x21] sm:$0xff]  ;;  %v236_v1 = vpack.c.bf16 %v229_v60, %v228_v59  ;;  %v230_v6 = vld [vmem:[#allocation2 + $0x18] sm:$0xff]  ;;  %v512_v18 = vld [vmem:[#allocation2 + $0xa] sm:$0xff] }
  0xa2   :  { %8689 = vmatpush3.bf16.msra.mxu0 %v8976_v17  ;;  %8696 = vmatprep.mubr.bf16.mxu0 %v264_v40  ;;  %v265_v53 = vpack.c.bf16 %v259_v50, %v258_v49  ;;  %v231_v7 = vld [vmem:[#allocation2 + $0x20] sm:$0xff]  ;;  %v232_v9 = vld [vmem:[#allocation2 + $0x30] sm:$0xff]  ;;  %v8989_v12 = vld [vmem:[#allocation8 + $0x88] sm:$0xff]  }
  0xa3   :  { %8690 = vmatprep.subr.bf16.mxu0 %v8977_v24  ;;  %v260_v51 = vld [vmem:[#allocation2 + $0x31] sm:$0xff]  ;;  %8755 = vmatpush3.bf16.msra.mxu1 %v8997_v0  ;;  %v8988_v8 = vld [vmem:[#allocation8 + $0x80] sm:$0xff]   ;;  %v237_v11 = vpack.c.bf16 %v231_v7, %v230_v6  ;;  %v8993_v23 = vld [vmem:[#allocation8 + $0xa8] sm:$0xff]  }
  0xa4   :  { %v261_v52 = vld [vmem:[#allocation2 + $0x39] sm:$0xff]  ;;  %v511_v17 = vld [vmem:[#allocation2 + $0x2] sm:$0xff]  ;;  %v8998_v35 = vld [vmem:[#allocation8 + $0x110] sm:$0xff]  }
  0xa5   :  { %v266_v54 = vpack.c.bf16 %v261_v52, %v260_v51  ;;  %v262_v57 = vld [vmem:[#allocation2 + $0x49] sm:$0xff]  ;;  %v263_v58 = vld [vmem:[#allocation2 + $0x51] sm:$0xff]  ;;  %v519_v21 = vpack.c.bf16 %v512_v18, %v511_v17  ;;  %v8992_v22 = vld [vmem:[#allocation8 + $0xa0] sm:$0xff]   ;;  %8756 = vmatprep.subr.bf16.mxu1 %v8998_v35 }
  0xa6   :  { %8691 = vmatpush3.bf16.msra.mxu0 %v8977_v24  ;;  %v267_v63 = vpack.c.bf16 %v263_v58, %v262_v57  ;;  %v233_v10 = vld [vmem:[#allocation2 + $0x38] sm:$0xff]  ;;  %v234_v14 = vld [vmem:[#allocation2 + $0x48] sm:$0xff]  ;;  %v235_v15 = vld [vmem:[#allocation2 + $0x50] sm:$0xff] }
  0xa7   :  { %8692 = vmatprep.subr.bf16.mxu0 %v8978_v39  ;;  %v238_v13 = vpack.c.bf16 %v233_v10, %v232_v9  ;;  %v8991_v19 = vld [vmem:[#allocation8 + $0x98] sm:$0xff]   ;;  %v239_v20 = vpack.c.bf16 %v235_v15, %v234_v14  ;;  %v8994_v24 = vld [vmem:[#allocation8 + $0xb0] sm:$0xff]   ;;  %v514_v27 = vld [vmem:[#allocation2 + $0x22] sm:$0xff]  ;;  %8757 = vmatpush3.bf16.msra.mxu1 %v8998_v35 }
  0xa8   :  { %v8995_v25 = vld [vmem:[#allocation8 + $0xb8] sm:$0xff]   ;;  %v517_v32 = vld [vmem:[#allocation2 + $0x4a] sm:$0xff]  ;;  %v9000_v37 = vld [vmem:[#allocation8 + $0x120] sm:$0xff]  }
  0xa9   :  { %v513_v26 = vld [vmem:[#allocation2 + $0x1a] sm:$0xff]  ;;  %v515_v28 = vld [vmem:[#allocation2 + $0x32] sm:$0xff]  ;;  %v9001_v38 = vld [vmem:[#allocation8 + $0x128] sm:$0xff]  }
  0xaa   :  { %8693 = vmatpush3.bf16.msra.mxu0 %v8978_v39  ;;  %v516_v29 = vld [vmem:[#allocation2 + $0x3a] sm:$0xff]  ;;  %v520_v30 = vpack.c.bf16 %v514_v27, %v513_v26  ;;  %v518_v33 = vld [vmem:[#allocation2 + $0x52] sm:$0xff]  ;;  %v9021_v43 = vld [vmem:[#allocation8 + $0x1c8] sm:$0xff]  }
  0xab   :  { %8694 = vmatprep.subr.bf16.mxu0 %v8979_v47  ;;  %v521_v31 = vpack.c.bf16 %v516_v29, %v515_v28  ;;  %v522_v34 = vpack.c.bf16 %v518_v33, %v517_v32  ;;  %v8999_v36 = vld [vmem:[#allocation8 + $0x118] sm:$0xff]   ;;  %v9002_v39 = vld [vmem:[#allocation8 + $0x130] sm:$0xff]   ;;  %v10438_v41 = vld [vmem:[#allocation8 + $0xc0] sm:$0xff]  }
  0xac   :  { %8758 = vmatprep.subr.bf16.mxu1 %v8999_v36  ;;  %v9003_v40 = vld [vmem:[#allocation8 + $0x138] sm:$0xff]   ;;  %v9020_v42 = vld [vmem:[#allocation8 + $0x1c0] sm:$0xff]  }
  0xad   :  { %8759 = vmatpush3.bf16.msra.mxu1 %v8999_v36  ;;  %v7798_v44 = vld [vmem:[#allocation9] ss:$0 sm:$0xff]  ;;  %v10441_v46 = vld [vmem:[#allocation9 + $0x1] ss:$0 sm:$0xff]  ;;  %v10443_v49 = vld [vmem:[#allocation9 + $0x2] ss:$0 sm:$0xff] }
  0xae   :  { %8695 = vmatpush3.bf16.msra.mxu0 %v8979_v47  ;;  %8760 = vmatprep.subr.bf16.mxu1 %v9000_v37 }
  0xaf   :  { %8704 = vmatprep.subr.bf16.mxu0 %v8980_v48 }
  0xb1   :  { %8697 = vmatmul.mubr.bf16.vlgmr.msra.gmra.mrb[0].mxu0 %v265_v53  ;;  %8761 = vmatpush3.bf16.msra.mxu1 %v9000_v37 }
  0xb2   :  { %8705 = vmatpush3.bf16.msra.mxu0 %v8980_v48  ;;  %8700 = vmatprep.mubr.bf16.mxu0 %v266_v54 }
  0xb3   :  { %8706 = vmatprep.subr.bf16.mxu0 %v8981_v55  ;;  %8762 = vmatprep.subr.bf16.mxu1 %v9001_v38 }
  0xb5   :  { %8763 = vmatpush3.bf16.msra.mxu1 %v9001_v38 }
  0xb6   :  { %8707 = vmatpush3.bf16.msra.mxu0 %v8981_v55  ;;  %8764 = vmatprep.subr.bf16.mxu1 %v9002_v39 }
  0xb7   :  { %8708 = vmatprep.subr.bf16.mxu0 %v8982_v56 }
  0xb9   :  { %8701 = vmatmul.mubr.bf16.gmra.mrb[4].mxu0 %v267_v63  ;;  %8765 = vmatpush3.bf16.msra.mxu1 %v9002_v39 }
  0xba   :  { %8709 = vmatpush3.bf16.msra.mxu0 %v8982_v56  ;;  %8720 = vmatprep.mubr.bf16.mxu0 %v236_v1 }
  0xbb   :  { %8710 = vmatprep.subr.bf16.mxu0 %v8983_v62  ;;  %8766 = vmatprep.subr.bf16.mxu1 %v9003_v40 }
  0xbd   :  { %8767 = vmatpush3.bf16.msra.mxu1 %v9003_v40 }
  0xbe   :  { %8711 = vmatpush3.bf16.msra.mxu0 %v8983_v62  ;;  %8776 = vmatprep.subr.bf16.mxu1 %v10438_v41 }
  0xbf   :  { %8712 = vmatprep.subr.bf16.mxu0 %v8984_v2 }
  0xc2   :  { %8713 = vmatpush3.bf16.msra.mxu0 %v8984_v2 }
  0xc3   :  { %8714 = vmatprep.subr.bf16.mxu0 %v8985_v3 }
  0xc6   :  { %8715 = vmatpush3.bf16.msra.mxu0 %v8985_v3 }
  0xc7   :  { %8716 = vmatprep.subr.bf16.mxu0 %v8986_v4 }
  0xca   :  { %8717 = vmatpush3.bf16.msra.mxu0 %v8986_v4 }
  0xcb   :  { %8718 = vmatprep.subr.bf16.mxu0 %v8987_v5 }
  0xce   :  { %8719 = vmatpush3.bf16.msra.mxu0 %v8987_v5 }
  0xcf   :  { %8728 = vmatprep.subr.bf16.mxu0 %v8988_v8 }
  0xd1   :  { %8721 = vmatmul.mubr.bf16.vlgmr.msra.gmra.mrb[0].mxu0 %v237_v11 }
  0xd2   :  { %8729 = vmatpush3.bf16.msra.mxu0 %v8988_v8  ;;  %8724 = vmatprep.mubr.bf16.mxu0 %v238_v13 }
  0xd3   :  { %8730 = vmatprep.subr.bf16.mxu0 %v8989_v12 }
  0xd6   :  { %8731 = vmatpush3.bf16.msra.mxu0 %v8989_v12 }
  0xd7   :  { %8732 = vmatprep.subr.bf16.mxu0 %v8990_v16 }
  0xd9   :  { %8725 = vmatmul.mubr.bf16.gmra.mrb[4].mxu0 %v239_v20 }
  0xda   :  { %8733 = vmatpush3.bf16.msra.mxu0 %v8990_v16  ;;  %8744 = vmatprep.mubr.bf16.mxu0 %v519_v21 }
  0xdb   :  { %8734 = vmatprep.subr.bf16.mxu0 %v8991_v19 }
  0xde   :  { %8735 = vmatpush3.bf16.msra.mxu0 %v8991_v19 }
  0xdf   :  { %8736 = vmatprep.subr.bf16.mxu0 %v8992_v22 }
  0xe2   :  { %8737 = vmatpush3.bf16.msra.mxu0 %v8992_v22 }
  0xe3   :  { %8738 = vmatprep.subr.bf16.mxu0 %v8993_v23 }
  0xe6   :  { %8739 = vmatpush3.bf16.msra.mxu0 %v8993_v23 }
  0xe7   :  { %8740 = vmatprep.subr.bf16.mxu0 %v8994_v24 }
  0xea   :  { %8741 = vmatpush3.bf16.msra.mxu0 %v8994_v24 }
  0xeb   :  { %8742 = vmatprep.subr.bf16.mxu0 %v8995_v25 }
  0xee   :  { %8743 = vmatpush3.bf16.msra.mxu0 %v8995_v25 }
  0xef   :  { %8824 = vmatprep.subr.bf16.mxu0 %v9020_v42 }
  0xf1   :  { %8745 = vmatmul.mubr.bf16.vlgmr.msra.gmra.mrb[0].mxu0 %v520_v30 }
  0xf2   :  { %8748 = vmatprep.mubr.bf16.mxu0 %v521_v31  ;;  %8825 = vmatpush3.bf16.msra.mxu0 %v9020_v42 }
  0xf3   :  { %8826 = vmatprep.subr.bf16.mxu0 %v9021_v43 }
  0xf6   :  { %8827 = vmatpush3.bf16.msra.mxu0 %v9021_v43 }
  0xf9   :  { %8749 = vmatmul.mubr.bf16.gmra.mrb[4].mxu0 %v522_v34 }
 0x1c4   :  { %v8746_v45 = vpop.f32.mrb[0].mxu0 }
 0x1c5   :  { %v668_v47 = vadd.f32 %v8746_v45, %v7798_v44  ;;  %v622_v48 = vpop.f32.mrb[1].mxu0 }
 0x1c6   :  { %v666_v50 = vadd.f32 %v7798_v44, %v622_v48  ;;  %v8747_v51 = vpop.f32.mrb[2].mxu0 }
 0x1c7   :  { %v676_v52 = vmax.f32 %v668_v47, 0.0  ;;  %v669_v53 = vadd.f32 %v8747_v51, %v7798_v44  ;;  %v625_v54 = vpop.f32.mrb[3].mxu0 }
 0x1c8   :  { %v674_v55 = vmax.f32 %v666_v50, 0.0  ;;  %v667_v56 = vadd.f32 %v7798_v44, %v625_v54 }
 0x1c9   :  { %v689_v57 = vmul.f32 %v10441_v46, %v676_v52  ;;  %v677_v58 = vmax.f32 %v669_v53, 0.0 }
 0x1ca   :  { %v687_v59 = vmul.f32 %v10441_v46, %v674_v55  ;;  %v675_v60 = vmax.f32 %v667_v56, 0.0 }
 0x1cb   :  { %v702_v61 = vadd.f32 %v10443_v49, %v689_v57  ;;  %v690_v62 = vmul.f32 %v10441_v46, %v677_v58 }
 0x1cc   :  { %v700_v63 = vadd.f32 %v10443_v49, %v687_v59  ;;  %v688_v0 = vmul.f32 %v10441_v46, %v675_v60  ;;  %v8750_v1 = vpop.f32.mrb[4].mxu0  ;;  %v9005_v60 = vld [vmem:[#allocation8 + $0xc8] sm:$0xff]  }
 0x1cd   :  { %v713_v2 = vrot.slane %v702_v61, 1  ;;  %v727_v3 = vrot.slane %v702_v61, 7  ;;  %v703_v4 = vadd.f32 %v10443_v49, %v690_v62  ;;  %v672_v5 = vadd.f32 %v8750_v1, %v7798_v44  ;;  %v638_v6 = vpop.f32.mrb[5].mxu0 }
 0x1ce   :  { %v712_v7 = vrot.slane %v700_v63, 1  ;;  %v724_v8 = vrot.slane %v700_v63, 7  ;;  %v701_v9 = vadd.f32 %v10443_v49, %v688_v0  ;;  %v670_v10 = vadd.f32 %v7798_v44, %v638_v6  ;;  %v8751_v11 = vpop.f32.mrb[6].mxu0  ;;  %v9006_v63 = vld [vmem:[#allocation8 + $0xd0] sm:$0xff]  }
 0x1cf   :  { %v10454_v12 = vsel %vm161_vm0, %v713_v2, %v727_v3  ;;  %v728_v13 = vrot.slane %v703_v4, 7  ;;  %v749_v14 = vrot.slane %v703_v4, 5  ;;  %v680_v15 = vmax.f32 %v672_v5, 0.0  ;;  %v641_v16 = vpop.f32.mrb[7].mxu0  ;;  %v9007_v4 = vld [vmem:[#allocation8 + $0xd8] sm:$0xff]  }
 0x1d0   :  { %767 = vst [vmem:[#allocation3 + $0x18] sm:$0xff] %v10454_v12  ;;  %v10458_v17 = vsel %vm161_vm0, %v712_v7, %v724_v8  ;;  %v725_v18 = vrot.slane %v701_v9, 7  ;;  %v748_v19 = vrot.slane %v701_v9, 5  ;;  %v678_v20 = vmax.f32 %v670_v10, 0.0  ;;  %v9008_v7 = vld [vmem:[#allocation8 + $0xe0] sm:$0xff]   ;;  %v9011_v9 = vld [vmem:[#allocation8 + $0xf8] sm:$0xff]  }
 0x1d1   :  { %764 = vst [vmem:[#allocation3] sm:$0xff] %v10458_v17  ;;  %v10462_v21 = vsel %vm161_vm0, %v727_v3, %v728_v13  ;;  %v761_v22 = vsel %vm161_vm0, %v728_v13, %v749_v14  ;;  %v693_v23 = vmul.f32 %v10441_v46, %v680_v15  ;;  %v673_v24 = vadd.f32 %v8751_v11, %v7798_v44  ;;  %v9012_v10 = vld [vmem:[#allocation8 + $0x140] sm:$0xff]   ;;  %v9013_v11 = vld [vmem:[#allocation8 + $0x148] sm:$0xff]   ;;  %v9014_v13 = vld [vmem:[#allocation8 + $0x150] sm:$0xff]  }
 0x1d2   :  { %768 = vst [vmem:[#allocation3 + $0x20] sm:$0xff] %v10462_v21  ;;  %769 = vst [vmem:[#allocation3 + $0x28] sm:$0x3] %v761_v22  ;;  %v10468_v25 = vsel %vm161_vm0, %v724_v8, %v725_v18  ;;  %v760_v26 = vsel %vm161_vm0, %v725_v18, %v748_v19  ;;  %v691_v27 = vmul.f32 %v10441_v46, %v678_v20  ;;  %v9010_v8 = vld [vmem:[#allocation8 + $0xf0] sm:$0xff]   ;;  %v9016_v18 = vld [vmem:[#allocation8 + $0x160] sm:$0xff]  }
 0x1d3   :  { %v671_v28 = vadd.f32 %v7798_v44, %v641_v16  ;;  %765 = vst [vmem:[#allocation3 + $0x8] sm:$0xff] %v10468_v25  ;;  %766 = vst [vmem:[#allocation3 + $0x10] sm:$0x3] %v760_v26  ;;  %v706_v29 = vadd.f32 %v10443_v49, %v693_v23  ;;  %v681_v30 = vmax.f32 %v673_v24, 0.0  ;;  %v784_v31 = vpack.c.bf16 %v10468_v25, %v10458_v17  ;;  %v9015_v16 = vld [vmem:[#allocation8 + $0x158] sm:$0xff]   ;;  %v9017_v19 = vld [vmem:[#allocation8 + $0x168] sm:$0xff]  }
 0x1d4   :  { %v785_v32 = vpack.c.bf16 %v10462_v21, %v10454_v12  ;;  %v704_v33 = vadd.f32 %v10443_v49, %v691_v27  ;;  %v9018_v12 = vld [vmem:[#allocation8 + $0x170] sm:$0xff]   ;;  %v9019_v20 = vld [vmem:[#allocation8 + $0x178] sm:$0xff]  }
 0x1d5   :  { %v679_v34 = vmax.f32 %v671_v28, 0.0  ;;  %v715_v35 = vrot.slane %v706_v29, 1  ;;  %v733_v36 = vrot.slane %v706_v29, 7  ;;  %v694_v37 = vmul.f32 %v10441_v46, %v681_v30  ;;  %v9022_v30 = vld [vmem:[#allocation8 + $0x1d0] sm:$0xff]  }
 0x1d6   :  { %v714_v38 = vrot.slane %v704_v33, 1  ;;  %v730_v39 = vrot.slane %v704_v33, 7  ;;  %8828 = vmatprep.subr.bf16.mxu0 %v9022_v30  ;;  %v9025_v33 = vld [vmem:[#allocation8 + $0x1e8] sm:$0xff]  }
 0x1d7   :  { %v692_v40 = vmul.f32 %v10441_v46, %v679_v34  ;;  %v10482_v42 = vsel %vm161_vm0, %v715_v35, %v733_v36  ;;  %v707_v43 = vadd.f32 %v10443_v49, %v694_v37  ;;  %8829 = vmatpush3.bf16.msra.mxu0 %v9022_v30  ;;  %v9026_v34 = vld [vmem:[#allocation8 + $0x1f0] sm:$0xff]   ;;  %v9027_v35 = vld [vmem:[#allocation8 + $0x1f8] sm:$0xff]  }
 0x1d8   :  { %773 = vst [vmem:[#allocation3 + $0x48] sm:$0xff] %v10482_v42  ;;  %v758_v44 = vsel %vm161_vm0, %v714_v38, %v730_v39  ;;  %v9044_v37 = vld [vmem:[#allocation11 + $0x100] ss:$16 sps:$4 sm:$0xff]   ;;  %v9046_v38 = vld [vmem:[#allocation11 + $0x104] ss:$16 sps:$4 sm:$0xff]  }
 0x1d9   :  { %v705_v45 = vadd.f32 %v10443_v49, %v692_v40  ;;  %770 = vst [vmem:[#allocation3 + $0x30] sm:$0xff] %v758_v44  ;;  %v734_v47 = vrot.slane %v707_v43, 7  ;;  %v751_v48 = vrot.slane %v707_v43, 5  ;;  %v807_v50 = vld [vmem:[#allocation3 + $0x19] sm:$0xff]  ;;  %v808_v51 = vld [vmem:[#allocation3 + $0x21] sm:$0xff] }
 0x1da   :  { %v805_v54 = vld [vmem:[#allocation3 + $0x1] sm:$0xff]  ;;  %v806_v46 = vld [vmem:[#allocation3 + $0x9] sm:$0xff]  ;;  %v814_v59 = vpack.c.bf16 %v808_v51, %v807_v50 }
 0x1db   :  { %v731_v52 = vrot.slane %v705_v45, 7  ;;  %v750_v53 = vrot.slane %v705_v45, 5  ;;  %v735_v55 = vsel %vm161_vm0, %v733_v36, %v734_v47  ;;  %v763_v56 = vsel %vm161_vm0, %v734_v47, %v751_v48  ;;  %v1060_v14 = vld [vmem:[#allocation3 + $0x2] sm:$0xff]  ;;  %v1061_v15 = vld [vmem:[#allocation3 + $0xa] sm:$0xff]  ;;  %v1062_v21 = vld [vmem:[#allocation3 + $0x1a] sm:$0xff] }
 0x1dc   :  { %v813_v57 = vpack.c.bf16 %v806_v46, %v805_v54  ;;  %774 = vst [vmem:[#allocation3 + $0x50] sm:$0xff] %v735_v55  ;;  %775 = vst [vmem:[#allocation3 + $0x58] sm:$0x3] %v763_v56  ;;  %v787_v61 = vpack.c.bf16 %v735_v55, %v10482_v42  ;;  %v1068_v17 = vpack.c.bf16 %v1061_v15, %v1060_v14  ;;  %v1063_v22 = vld [vmem:[#allocation3 + $0x22] sm:$0xff]  ;;  %v9050_v40 = vld [vmem:[#allocation11 + $0x120] ss:$16 sps:$4 sm:$0xff]  }
 0x1dd   :  { %v732_v58 = vsel %vm161_vm0, %v730_v39, %v731_v52  ;;  %v762_v49 = vsel %vm161_vm0, %v731_v52, %v750_v53  ;;  %v1069_v25 = vpack.c.bf16 %v1063_v22, %v1062_v21  ;;  %v10497_v36 = vld [vmem:[#allocation8 + $0x180] sm:$0xff]  }
 0x1de   :  { %771 = vst [vmem:[#allocation3 + $0x38] sm:$0xff] %v732_v58  ;;  %772 = vst [vmem:[#allocation3 + $0x40] sm:$0x3] %v762_v49  ;;  %8768 = vmatprep.mubr.bf16.mxu1 %v813_v57  ;;  %v786_v62 = vpack.c.bf16 %v732_v58, %v758_v44  ;;  %v9052_v39 = vld [vmem:[#allocation11 + $0x124] ss:$16 sps:$4 sm:$0xff]  }
 0x1df   :  { %8769 = vmatmul.mubr.bf16.vlgmr.msra.gmra.mrb[0].mxu1 %v814_v59  ;;  %v7825_v42 = vld [vmem:[#allocation9 + $0x4] ss:$0 sm:$0xff]  ;;  %v7826_v47 = vld [vmem:[#allocation9 + $0x5] ss:$0 sm:$0xff]  ;;  %v7827_v54 = vld [vmem:[#allocation9 + $0x6] ss:$0 sm:$0xff] }
 0x1e0   :  { %8777 = vmatpush3.bf16.msra.mxu1 %v10438_v41  ;;  %v9009_v41 = vld [vmem:[#allocation8 + $0xe8] sm:$0xff]  }
 0x1e1   :  { %8778 = vmatprep.subr.bf16.mxu1 %v9005_v60 }
 0x1e3   :  { %v811_v0 = vld [vmem:[#allocation3 + $0x49] sm:$0xff]  ;;  %v812_v1 = vld [vmem:[#allocation3 + $0x51] sm:$0xff] }
 0x1e4   :  { %8779 = vmatpush3.bf16.msra.mxu1 %v9005_v60  ;;  %v816_v6 = vpack.c.bf16 %v812_v1, %v811_v0  ;;  %v1066_v27 = vld [vmem:[#allocation3 + $0x4a] sm:$0xff]  ;;  %v1067_v28 = vld [vmem:[#allocation3 + $0x52] sm:$0xff] }
 0x1e5   :  { %v809_v2 = vld [vmem:[#allocation3 + $0x31] sm:$0xff]  ;;  %v810_v3 = vld [vmem:[#allocation3 + $0x39] sm:$0xff]  ;;  %8780 = vmatprep.subr.bf16.mxu1 %v9006_v63  ;;  %v1071_v29 = vpack.c.bf16 %v1067_v28, %v1066_v27 }
 0x1e6   :  { %v815_v5 = vpack.c.bf16 %v810_v3, %v809_v2  ;;  %v1064_v23 = vld [vmem:[#allocation3 + $0x32] sm:$0xff]  ;;  %v1065_v24 = vld [vmem:[#allocation3 + $0x3a] sm:$0xff] }
 0x1e7   :  { %v1070_v26 = vpack.c.bf16 %v1065_v24, %v1064_v23 }
 0x1e8   :  { %8772 = vmatprep.mubr.bf16.mxu1 %v815_v5  ;;  %8781 = vmatpush3.bf16.msra.mxu1 %v9006_v63 }
 0x1e9   :  { %8773 = vmatmul.mubr.bf16.gmra.mrb[4].mxu1 %v816_v6  ;;  %8782 = vmatprep.subr.bf16.mxu1 %v9007_v4 }
 0x1ea   :  { %8792 = vmatprep.mubr.bf16.mxu1 %v784_v31  ;;  %v9023_v31 = vld [vmem:[#allocation8 + $0x1d8] sm:$0xff]  }
 0x1eb   :  { %8830 = vmatprep.subr.bf16.mxu0 %v9023_v31 }
 0x1ec   :  { %8783 = vmatpush3.bf16.msra.mxu1 %v9007_v4  ;;  %8831 = vmatpush3.bf16.msra.mxu0 %v9023_v31 }
 0x1ed   :  { %8784 = vmatprep.subr.bf16.mxu1 %v9008_v7 }
 0x1f0   :  { %8785 = vmatpush3.bf16.msra.mxu1 %v9008_v7 }
 0x1f1   :  { %8786 = vmatprep.subr.bf16.mxu1 %v9009_v41 }
 0x1f4   :  { %8787 = vmatpush3.bf16.msra.mxu1 %v9009_v41 }
 0x1f5   :  { %8788 = vmatprep.subr.bf16.mxu1 %v9010_v8 }
 0x1f8   :  { %8789 = vmatpush3.bf16.msra.mxu1 %v9010_v8 }
 0x1f9   :  { %8790 = vmatprep.subr.bf16.mxu1 %v9011_v9 }
 0x1fc   :  { %8791 = vmatpush3.bf16.msra.mxu1 %v9011_v9 }
 0x1fd   :  { %8800 = vmatprep.subr.bf16.mxu1 %v9012_v10 }
 0x1ff   :  { %8793 = vmatmul.mubr.bf16.vlgmr.msra.gmra.mrb[0].mxu1 %v785_v32  ;;  %v9024_v32 = vld [vmem:[#allocation8 + $0x1e0] sm:$0xff]  }
 0x200   :  { %8796 = vmatprep.mubr.bf16.mxu1 %v786_v62  ;;  %8801 = vmatpush3.bf16.msra.mxu1 %v9012_v10 }
 0x201   :  { %8802 = vmatprep.subr.bf16.mxu1 %v9013_v11  ;;  %8832 = vmatprep.subr.bf16.mxu0 %v9024_v32 }
 0x202   :  { %8833 = vmatpush3.bf16.msra.mxu0 %v9024_v32 }
 0x203   :  { %8834 = vmatprep.subr.bf16.mxu0 %v9025_v33 }
 0x204   :  { %8803 = vmatpush3.bf16.msra.mxu1 %v9013_v11 }
 0x205   :  { %8804 = vmatprep.subr.bf16.mxu1 %v9014_v13 }
 0x206   :  { %8835 = vmatpush3.bf16.msra.mxu0 %v9025_v33 }
 0x207   :  { %8797 = vmatmul.mubr.bf16.gmra.mrb[4].mxu1 %v787_v61  ;;  %8836 = vmatprep.subr.bf16.mxu0 %v9026_v34 }
 0x208   :  { %8805 = vmatpush3.bf16.msra.mxu1 %v9014_v13  ;;  %8816 = vmatprep.mubr.bf16.mxu1 %v1068_v17 }
 0x209   :  { %8806 = vmatprep.subr.bf16.mxu1 %v9015_v16 }
 0x20a   :  { %8837 = vmatpush3.bf16.msra.mxu0 %v9026_v34 }
 0x20b   :  { %8838 = vmatprep.subr.bf16.mxu0 %v9027_v35 }
 0x20c   :  { %8807 = vmatpush3.bf16.msra.mxu1 %v9015_v16 }
 0x20d   :  { %8808 = vmatprep.subr.bf16.mxu1 %v9016_v18 }
 0x20e   :  { %8839 = vmatpush3.bf16.msra.mxu0 %v9027_v35 }
 0x20f   :  { %8848 = vmatprep.subr.bf16.mxu0 %v10497_v36 }
 0x210   :  { %8809 = vmatpush3.bf16.msra.mxu1 %v9016_v18 }
 0x211   :  { %8810 = vmatprep.subr.bf16.mxu1 %v9017_v19 }
 0x214   :  { %8811 = vmatpush3.bf16.msra.mxu1 %v9017_v19 }
 0x215   :  { %8812 = vmatprep.subr.bf16.mxu1 %v9018_v12 }
 0x218   :  { %8813 = vmatpush3.bf16.msra.mxu1 %v9018_v12 }
 0x219   :  { %8814 = vmatprep.subr.bf16.mxu1 %v9019_v20 }
 0x21c   :  { %8815 = vmatpush3.bf16.msra.mxu1 %v9019_v20 }
 0x21d   :  { %2056 = vmatprep.subr.bf16.mxu1 %v9046_v38 }
 0x21f   :  { %8817 = vmatmul.mubr.bf16.vlgmr.msra.gmra.mrb[0].mxu1 %v1069_v25 }
 0x220   :  { %8820 = vmatprep.mubr.bf16.mxu1 %v1070_v26  ;;  %2057 = vmatpush1.bf16.msra.mxu1 %v9044_v37 }
 0x221   :  { %2058 = vmatprep.subr.bf16.mxu1 %v9052_v39 }
 0x224   :  { %2059 = vmatpush1.bf16.msra.mxu1 %v9050_v40 }
 0x227   :  { %8821 = vmatmul.mubr.bf16.gmra.mrb[4].mxu1 %v1071_v29 }
 0x2f2   :  { %v8818_v43 = vpop.f32.mrb[0].mxu1 }
 0x2f3   :  { %v1218_v44 = vadd.f32 %v8818_v43, %v7825_v42  ;;  %v1171_v45 = vpop.f32.mrb[1].mxu1 }
 0x2f4   :  { %v1216_v48 = vadd.f32 %v7825_v42, %v1171_v45  ;;  %v8819_v50 = vpop.f32.mrb[2].mxu1 }
 0x2f5   :  { %v1226_v51 = vmax.f32 %v1218_v44, 0.0  ;;  %v1219_v52 = vadd.f32 %v8819_v50, %v7825_v42  ;;  %v1174_v53 = vpop.f32.mrb[3].mxu1 }
 0x2f6   :  { %v1224_v46 = vmax.f32 %v1216_v48, 0.0  ;;  %v1217_v55 = vadd.f32 %v7825_v42, %v1174_v53 }
 0x2f7   :  { %v1239_v56 = vmul.f32 %v7826_v47, %v1226_v51  ;;  %v1227_v57 = vmax.f32 %v1219_v52, 0.0 }
 0x2f8   :  { %v1237_v58 = vmul.f32 %v7826_v47, %v1224_v46  ;;  %v1225_v49 = vmax.f32 %v1217_v55, 0.0 }
 0x2f9   :  { %v1252_v59 = vadd.f32 %v7827_v54, %v1239_v56  ;;  %v1240_v60 = vmul.f32 %v7826_v47, %v1227_v57 }
 0x2fa   :  { %v1250_v61 = vadd.f32 %v7827_v54, %v1237_v58  ;;  %v1238_v62 = vmul.f32 %v7826_v47, %v1225_v49  ;;  %v8822_v63 = vpop.f32.mrb[4].mxu1  ;;  %v9029_v49 = vld [vmem:[#allocation8 + $0x188] sm:$0xff]  }
 0x2fb   :  { %v1263_v0 = vrot.slane %v1252_v59, 1  ;;  %v1277_v1 = vrot.slane %v1252_v59, 7  ;;  %v1253_v2 = vadd.f32 %v7827_v54, %v1240_v60  ;;  %v1222_v3 = vadd.f32 %v8822_v63, %v7825_v42  ;;  %v1187_v4 = vpop.f32.mrb[5].mxu1 }
 0x2fc   :  { %v1262_v5 = vrot.slane %v1250_v61, 1  ;;  %v1274_v6 = vrot.slane %v1250_v61, 7  ;;  %v1251_v7 = vadd.f32 %v7827_v54, %v1238_v62  ;;  %v1220_v41 = vadd.f32 %v7825_v42, %v1187_v4  ;;  %v8823_v8 = vpop.f32.mrb[6].mxu1  ;;  %v9030_v61 = vld [vmem:[#allocation8 + $0x190] sm:$0xff]  }
 0x2fd   :  { %v10501_v9 = vsel %vm161_vm0, %v1263_v0, %v1277_v1  ;;  %v1278_v10 = vrot.slane %v1253_v2, 7  ;;  %v1299_v11 = vrot.slane %v1253_v2, 5  ;;  %v1230_v13 = vmax.f32 %v1222_v3, 0.0  ;;  %v1190_v14 = vpop.f32.mrb[7].mxu1  ;;  %v9031_v2 = vld [vmem:[#allocation8 + $0x198] sm:$0xff]  }
 0x2fe   :  { %1317 = vst [vmem:[#allocation2 + $0x18] sm:$0xff] %v10501_v9  ;;  %v10505_v15 = vsel %vm161_vm0, %v1262_v5, %v1274_v6  ;;  %v1275_v16 = vrot.slane %v1251_v7, 7  ;;  %v1298_v17 = vrot.slane %v1251_v7, 5  ;;  %v1228_v18 = vmax.f32 %v1220_v41, 0.0  ;;  %v9032_v5 = vld [vmem:[#allocation8 + $0x1a0] sm:$0xff]   ;;  %v9035_v7 = vld [vmem:[#allocation8 + $0x1b8] sm:$0xff]  }
 0x2ff   :  { %1314 = vst [vmem:[#allocation2] sm:$0xff] %v10505_v15  ;;  %v10509_v19 = vsel %vm161_vm0, %v1277_v1, %v1278_v10  ;;  %v1311_v12 = vsel %vm161_vm0, %v1278_v10, %v1299_v11  ;;  %v1243_v20 = vmul.f32 %v7826_v47, %v1230_v13  ;;  %v1223_v21 = vadd.f32 %v8823_v8, %v7825_v42  ;;  %v9036_v41 = vld [vmem:[#allocation8 + $0x200] sm:$0xff]   ;;  %v9037_v8 = vld [vmem:[#allocation8 + $0x208] sm:$0xff]   ;;  %v9038_v10 = vld [vmem:[#allocation8 + $0x210] sm:$0xff]  }
 0x300   :  { %1318 = vst [vmem:[#allocation2 + $0x20] sm:$0xff] %v10509_v19  ;;  %1319 = vst [vmem:[#allocation2 + $0x28] sm:$0x3] %v1311_v12  ;;  %v10514_v22 = vsel %vm161_vm0, %v1274_v6, %v1275_v16  ;;  %v1310_v23 = vsel %vm161_vm0, %v1275_v16, %v1298_v17  ;;  %v1241_v24 = vmul.f32 %v7826_v47, %v1228_v18  ;;  %v9034_v6 = vld [vmem:[#allocation8 + $0x1b0] sm:$0xff]   ;;  %v9040_v16 = vld [vmem:[#allocation8 + $0x220] sm:$0xff]  }
 0x301   :  { %v1221_v25 = vadd.f32 %v7825_v42, %v1190_v14  ;;  %1315 = vst [vmem:[#allocation2 + $0x8] sm:$0xff] %v10514_v22  ;;  %1316 = vst [vmem:[#allocation2 + $0x10] sm:$0x3] %v1310_v23  ;;  %v1256_v26 = vadd.f32 %v7827_v54, %v1243_v20  ;;  %v1231_v27 = vmax.f32 %v1223_v21, 0.0  ;;  %v1334_v28 = vpack.c.bf16 %v10514_v22, %v10505_v15  ;;  %v9039_v14 = vld [vmem:[#allocation8 + $0x218] sm:$0xff]   ;;  %v9041_v17 = vld [vmem:[#allocation8 + $0x228] sm:$0xff]  }
 0x302   :  { %v1335_v29 = vpack.c.bf16 %v10509_v19, %v10501_v9  ;;  %v1254_v30 = vadd.f32 %v7827_v54, %v1241_v24  ;;  %v9042_v9 = vld [vmem:[#allocation8 + $0x230] sm:$0xff]   ;;  %v9043_v18 = vld [vmem:[#allocation8 + $0x238] sm:$0xff]  }
 0x303   :  { %v1229_v31 = vmax.f32 %v1221_v25, 0.0  ;;  %v1265_v32 = vrot.slane %v1256_v26, 1  ;;  %v1283_v33 = vrot.slane %v1256_v26, 7  ;;  %v1244_v34 = vmul.f32 %v7826_v47, %v1231_v27  ;;  %v9049_v19 = vld [vmem:[#allocation11 + $0xc] ss:$16 sps:$4 sm:$0xff]  }
 0x304   :  { %v1264_v35 = vrot.slane %v1254_v30, 1  ;;  %v1280_v37 = vrot.slane %v1254_v30, 7  ;;  %v9047_v23 = vld [vmem:[#allocation11 + $0x8] ss:$16 sps:$4 sm:$0xff]   ;;  %v9055_v25 = vld [vmem:[#allocation11 + $0x2c] ss:$16 sps:$4 sm:$0xff]  }
 0x305   :  { %v1242_v38 = vmul.f32 %v7826_v47, %v1229_v31  ;;  %v10523_v39 = vsel %vm161_vm0, %v1265_v32, %v1283_v33  ;;  %v1257_v40 = vadd.f32 %v7827_v54, %v1244_v34  ;;  %v9053_v27 = vld [vmem:[#allocation11 + $0x28] ss:$16 sps:$4 sm:$0xff]   ;;  %v9058_v31 = vld [vmem:[#allocation11 + $0x144] ss:$16 sps:$4 sm:$0xff]   ;;  %v9061_v32 = vld [vmem:[#allocation11 + $0x4c] ss:$16 sps:$4 sm:$0xff]  }
 0x306   :  { %1323 = vst [vmem:[#allocation2 + $0x48] sm:$0xff] %v10523_v39  ;;  %v1308_v42 = vsel %vm161_vm0, %v1264_v35, %v1280_v37  ;;  %v9059_v34 = vld [vmem:[#allocation11 + $0x48] ss:$16 sps:$4 sm:$0xff]   ;;  %2060 = vmatprep.subr.bf16.mxu1 %v9058_v31  ;;  %v9064_v35 = vld [vmem:[#allocation11 + $0x164] ss:$16 sps:$4 sm:$0xff]  }
 0x307   :  { %v1255_v43 = vadd.f32 %v7827_v54, %v1242_v38  ;;  %1320 = vst [vmem:[#allocation2 + $0x30] sm:$0xff] %v1308_v42  ;;  %v1284_v44 = vrot.slane %v1257_v40, 7  ;;  %v1301_v45 = vrot.slane %v1257_v40, 5  ;;  %v1357_v48 = vld [vmem:[#allocation2 + $0x19] sm:$0xff]  ;;  %v1358_v50 = vld [vmem:[#allocation2 + $0x21] sm:$0xff] }
 0x308   :  { %v1355_v53 = vld [vmem:[#allocation2 + $0x1] sm:$0xff]  ;;  %v1356_v46 = vld [vmem:[#allocation2 + $0x9] sm:$0xff]  ;;  %v1364_v58 = vpack.c.bf16 %v1358_v50, %v1357_v48 }
 0x309   :  { %v1281_v51 = vrot.slane %v1255_v43, 7  ;;  %v1300_v52 = vrot.slane %v1255_v43, 5  ;;  %v1285_v47 = vsel %vm161_vm0, %v1283_v33, %v1284_v44  ;;  %v1313_v55 = vsel %vm161_vm0, %v1284_v44, %v1301_v45  ;;  %v1610_v11 = vld [vmem:[#allocation2 + $0x2] sm:$0xff]  ;;  %v1611_v13 = vld [vmem:[#allocation2 + $0xa] sm:$0xff]  ;;  %v1612_v12 = vld [vmem:[#allocation2 + $0x1a] sm:$0xff] }
 0x30a   :  { %v1363_v56 = vpack.c.bf16 %v1356_v46, %v1355_v53  ;;  %1324 = vst [vmem:[#allocation2 + $0x50] sm:$0xff] %v1285_v47  ;;  %1325 = vst [vmem:[#allocation2 + $0x58] sm:$0x3] %v1313_v55  ;;  %v1337_v59 = vpack.c.bf16 %v1285_v47, %v10523_v39  ;;  %v1618_v15 = vpack.c.bf16 %v1611_v13, %v1610_v11  ;;  %v1613_v20 = vld [vmem:[#allocation2 + $0x22] sm:$0xff]  ;;  %v9056_v33 = vld [vmem:[#allocation11 + $0x140] ss:$16 sps:$4 sm:$0xff]  }
 0x30b   :  { %v1282_v57 = vsel %vm161_vm0, %v1280_v37, %v1281_v51  ;;  %v1312_v54 = vsel %vm161_vm0, %v1281_v51, %v1300_v52  ;;  %v1619_v24 = vpack.c.bf16 %v1613_v20, %v1612_v12  ;;  %2061 = vmatpush1.bf16.msra.mxu1 %v9056_v33  ;;  %v9067_v37 = vld [vmem:[#allocation11 + $0x6c] ss:$16 sps:$4 sm:$0xff]   ;;  %v9062_v38 = vld [vmem:[#allocation11 + $0x160] ss:$16 sps:$4 sm:$0xff]   ;;  %v9065_v39 = vld [vmem:[#allocation11 + $0x68] ss:$16 sps:$4 sm:$0xff]  }
 0x30c   :  { %1321 = vst [vmem:[#allocation2 + $0x38] sm:$0xff] %v1282_v57  ;;  %1322 = vst [vmem:[#allocation2 + $0x40] sm:$0x3] %v1312_v54  ;;  %8840 = vmatprep.mubr.bf16.mxu0 %v1363_v56  ;;  %v1336_v60 = vpack.c.bf16 %v1282_v57, %v1308_v42  ;;  %2062 = vmatprep.subr.bf16.mxu1 %v9064_v35  ;;  %v9070_v40 = vld [vmem:[#allocation11 + $0x184] ss:$16 sps:$4 sm:$0xff]  }
 0x30d   :  { %8841 = vmatmul.mubr.bf16.vlgmr.msra.gmra.mrb[8].mxu0 %v1364_v58  ;;  %v9073_v42 = vld [vmem:[#allocation11 + $0x8c] ss:$16 sps:$4 sm:$0xff]   ;;  %v9068_v43 = vld [vmem:[#allocation11 + $0x180] ss:$16 sps:$4 sm:$0xff]   ;;  %v9071_v44 = vld [vmem:[#allocation11 + $0x88] ss:$16 sps:$4 sm:$0xff]  }
 0x30e   :  { %8849 = vmatpush3.bf16.msra.mxu0 %v10497_v36  ;;  %v9033_v36 = vld [vmem:[#allocation8 + $0x1a8] sm:$0xff]   ;;  %v9076_v45 = vld [vmem:[#allocation11 + $0x1a4] ss:$16 sps:$4 sm:$0xff]   ;;  %v9077_v51 = vld [vmem:[#allocation11 + $0xa8] ss:$16 sps:$4 sm:$0xff]   ;;  %v10237_v58 = vmov 0  }
 0x30f   :  { %8850 = vmatprep.subr.bf16.mxu0 %v9029_v49  ;;  %2063 = vmatpush1.bf16.msra.mxu1 %v9062_v38  ;;  %v9079_v48 = vld [vmem:[#allocation11 + $0xac] ss:$16 sps:$4 sm:$0xff]   ;;  %v9074_v50 = vld [vmem:[#allocation11 + $0x1a0] ss:$16 sps:$4 sm:$0xff]   ;;  %v9082_v52 = vld [vmem:[#allocation11 + $0x1c4] ss:$16 sps:$4 sm:$0xff]  }
 0x310   :  { %2064 = vmatprep.subr.bf16.mxu1 %v9070_v40  ;;  %v9085_v53 = vld [vmem:[#allocation11 + $0xcc] ss:$16 sps:$4 sm:$0xff]   ;;  %v9080_v46 = vld [vmem:[#allocation11 + $0x1c0] ss:$16 sps:$4 sm:$0xff]   ;;  %v9083_v47 = vld [vmem:[#allocation11 + $0xc8] ss:$16 sps:$4 sm:$0xff]   ;;  %2088 = vmatprep.mubr.bf16.mxu1 %v10237_v58 }
 0x311   :  { %v1361_v62 = vld [vmem:[#allocation2 + $0x49] sm:$0xff]  ;;  %v1362_v63 = vld [vmem:[#allocation2 + $0x51] sm:$0xff] }
 0x312   :  { %8851 = vmatpush3.bf16.msra.mxu0 %v9029_v49  ;;  %v1366_v4 = vpack.c.bf16 %v1362_v63, %v1361_v62  ;;  %v9086_v55 = vld [vmem:[#allocation11 + $0x1e0] ss:$16 sps:$4 sm:$0xff]   ;;  %v9088_v56 = vld [vmem:[#allocation11 + $0x1e4] ss:$16 sps:$4 sm:$0xff]   ;;  %v9089_v57 = vld [vmem:[#allocation11 + $0xe8] ss:$16 sps:$4 sm:$0xff]  }
 0x313   :  { %v1359_v0 = vld [vmem:[#allocation2 + $0x31] sm:$0xff]  ;;  %v1360_v1 = vld [vmem:[#allocation2 + $0x39] sm:$0xff]  ;;  %8852 = vmatprep.subr.bf16.mxu0 %v9030_v61  ;;  %2065 = vmatpush1.bf16.msra.mxu1 %v9068_v43 }
 0x314   :  { %v1365_v3 = vpack.c.bf16 %v1360_v1, %v1359_v0  ;;  %v1614_v21 = vld [vmem:[#allocation2 + $0x32] sm:$0xff]  ;;  %v1615_v22 = vld [vmem:[#allocation2 + $0x3a] sm:$0xff]  ;;  %2066 = vmatprep.subr.bf16.mxu1 %v9076_v45  ;;  %v7853_v0 = vld [vmem:[#allocation9 + $0x9] ss:$0 sm:$0xff] }
 0x315   :  { %v1620_v26 = vpack.c.bf16 %v1615_v22, %v1614_v21  ;;  %v9091_v54 = vld [vmem:[#allocation11 + $0xec] ss:$16 sps:$4 sm:$0xff]  }
 0x316   :  { %8844 = vmatprep.mubr.bf16.mxu0 %v1365_v3  ;;  %8853 = vmatpush3.bf16.msra.mxu0 %v9030_v61  ;;  %v9094_v49 = vld [vmem:[#allocation11 + $0x10c] ss:$16 sps:$4 sm:$0xff]  }
 0x317   :  { %8845 = vmatmul.mubr.bf16.gmra.mrb[12].mxu0 %v1366_v4  ;;  %8854 = vmatprep.subr.bf16.mxu0 %v9031_v2 }
 0x318   :  { %8864 = vmatprep.mubr.bf16.mxu0 %v1334_v28  ;;  %v1616_v28 = vld [vmem:[#allocation2 + $0x4a] sm:$0xff]  ;;  %2067 = vmatpush1.bf16.msra.mxu1 %v9074_v50 }
 0x319   :  { %2068 = vmatprep.subr.bf16.mxu1 %v9082_v52 }
 0x31a   :  { %8855 = vmatpush3.bf16.msra.mxu0 %v9031_v2 }
 0x31b   :  { %8856 = vmatprep.subr.bf16.mxu0 %v9032_v5 }
 0x31c   :  { %2069 = vmatpush1.bf16.msra.mxu1 %v9080_v46 }
 0x31d   :  { %2070 = vmatprep.subr.bf16.mxu1 %v9088_v56 }
 0x31e   :  { %8857 = vmatpush3.bf16.msra.mxu0 %v9032_v5 }
 0x31f   :  { %8858 = vmatprep.subr.bf16.mxu0 %v9033_v36 }
 0x320   :  { %2071 = vmatpush1.bf16.msra.mxu1 %v9086_v55 }
 0x321   :  { %2097 = vmatprep.subr.bf16.mxu1 %v9094_v49 }
 0x322   :  { %8859 = vmatpush3.bf16.msra.mxu0 %v9033_v36  ;;  %v7854_v36 = vld [vmem:[#allocation9 + $0xa] ss:$0 sm:$0xff] }
 0x323   :  { %8860 = vmatprep.subr.bf16.mxu0 %v9034_v6 }
 0x326   :  { %8861 = vmatpush3.bf16.msra.mxu0 %v9034_v6 }
 0x327   :  { %8862 = vmatprep.subr.bf16.mxu0 %v9035_v7 }
 0x32a   :  { %8863 = vmatpush3.bf16.msra.mxu0 %v9035_v7 }
 0x32b   :  { %8872 = vmatprep.subr.bf16.mxu0 %v9036_v41 }
 0x32d   :  { %8865 = vmatmul.mubr.bf16.vlgmr.msra.gmra.mrb[8].mxu0 %v1335_v29  ;;  %v1617_v29 = vld [vmem:[#allocation2 + $0x52] sm:$0xff] }
 0x32e   :  { %8868 = vmatprep.mubr.bf16.mxu0 %v1336_v60  ;;  %8873 = vmatpush3.bf16.msra.mxu0 %v9036_v41  ;;  %v1621_v30 = vpack.c.bf16 %v1617_v29, %v1616_v28  ;;  %v7852_v60 = vld [vmem:[#allocation9 + $0x8] ss:$0 sm:$0xff] }
 0x32f   :  { %8874 = vmatprep.subr.bf16.mxu0 %v9037_v8 }
 0x332   :  { %8875 = vmatpush3.bf16.msra.mxu0 %v9037_v8 }
 0x333   :  { %8876 = vmatprep.subr.bf16.mxu0 %v9038_v10 }
 0x335   :  { %8869 = vmatmul.mubr.bf16.gmra.mrb[12].mxu0 %v1337_v59  ;;  %v9097_v59 = vld [vmem:[#allocation11 + $0x20c] ss:$16 sps:$4 sm:$0xff]  }
 0x336   :  { %8877 = vmatpush3.bf16.msra.mxu0 %v9038_v10  ;;  %8888 = vmatprep.mubr.bf16.mxu0 %v1618_v15 }
 0x337   :  { %8878 = vmatprep.subr.bf16.mxu0 %v9039_v14 }
 0x33a   :  { %8879 = vmatpush3.bf16.msra.mxu0 %v9039_v14 }
 0x33b   :  { %8880 = vmatprep.subr.bf16.mxu0 %v9040_v16 }
 0x33e   :  { %8881 = vmatpush3.bf16.msra.mxu0 %v9040_v16 }
 0x33f   :  { %8882 = vmatprep.subr.bf16.mxu0 %v9041_v17 }
 0x342   :  { %8883 = vmatpush3.bf16.msra.mxu0 %v9041_v17 }
 0x343   :  { %8884 = vmatprep.subr.bf16.mxu0 %v9042_v9 }
 0x346   :  { %8885 = vmatpush3.bf16.msra.mxu0 %v9042_v9 }
 0x347   :  { %8886 = vmatprep.subr.bf16.mxu0 %v9043_v18 }
 0x34a   :  { %8887 = vmatpush3.bf16.msra.mxu0 %v9043_v18 }
 0x34b   :  { %2347 = vmatprep.subr.bf16.mxu0 %v9049_v19 }
 0x34d   :  { %8889 = vmatmul.mubr.bf16.vlgmr.msra.gmra.mrb[8].mxu0 %v1619_v24 }
 0x34e   :  { %8892 = vmatprep.mubr.bf16.mxu0 %v1620_v26  ;;  %2348 = vmatpush1.bf16.msra.mxu0 %v9047_v23 }
 0x34f   :  { %2349 = vmatprep.subr.bf16.mxu0 %v9055_v25 }
 0x352   :  { %2350 = vmatpush1.bf16.msra.mxu0 %v9053_v27 }
 0x353   :  { %2351 = vmatprep.subr.bf16.mxu0 %v9061_v32 }
 0x355   :  { %8893 = vmatmul.mubr.bf16.gmra.mrb[12].mxu0 %v1621_v30 }
 0x356   :  { %2352 = vmatpush1.bf16.msra.mxu0 %v9059_v34  ;;  %2379 = vmatprep.mubr.bf16.mxu0 %v10237_v58 }
 0x357   :  { %2353 = vmatprep.subr.bf16.mxu0 %v9067_v37 }
 0x35a   :  { %2354 = vmatpush1.bf16.msra.mxu0 %v9065_v39 }
 0x35b   :  { %2355 = vmatprep.subr.bf16.mxu0 %v9073_v42 }
 0x35e   :  { %2356 = vmatpush1.bf16.msra.mxu0 %v9071_v44 }
 0x35f   :  { %2357 = vmatprep.subr.bf16.mxu0 %v9079_v48 }
 0x362   :  { %2358 = vmatpush1.bf16.msra.mxu0 %v9077_v51 }
 0x363   :  { %2359 = vmatprep.subr.bf16.mxu0 %v9085_v53 }
 0x366   :  { %2360 = vmatpush1.bf16.msra.mxu0 %v9083_v47 }
 0x367   :  { %2361 = vmatprep.subr.bf16.mxu0 %v9091_v54 }
 0x36a   :  { %2362 = vmatpush1.bf16.msra.mxu0 %v9089_v57 }
 0x36b   :  { %2630 = vmatprep.subr.bf16.mxu0 %v9097_v59 }
 0x420   :  { %v8890_v61 = vpop.f32.mrb[8].mxu0 }
 0x421   :  { %v1768_v62 = vadd.f32 %v8890_v61, %v7852_v60  ;;  %v1721_v63 = vpop.f32.mrb[9].mxu0 }
 0x422   :  { %v1766_v1 = vadd.f32 %v7852_v60, %v1721_v63  ;;  %v8891_v2 = vpop.f32.mrb[10].mxu0 }
 0x423   :  { %v1776_v3 = vmax.f32 %v1768_v62, 0.0  ;;  %v1769_v4 = vadd.f32 %v8891_v2, %v7852_v60  ;;  %v1724_v5 = vpop.f32.mrb[11].mxu0 }
 0x424   :  { %v1774_v6 = vmax.f32 %v1766_v1, 0.0  ;;  %v1767_v7 = vadd.f32 %v7852_v60, %v1724_v5 }
 0x425   :  { %v1789_v41 = vmul.f32 %v7853_v0, %v1776_v3  ;;  %v1777_v8 = vmax.f32 %v1769_v4, 0.0 }
 0x426   :  { %v1787_v10 = vmul.f32 %v7853_v0, %v1774_v6  ;;  %v1775_v11 = vmax.f32 %v1767_v7, 0.0 }
 0x427   :  { %v1802_v13 = vadd.f32 %v7854_v36, %v1789_v41  ;;  %v1790_v14 = vmul.f32 %v7853_v0, %v1777_v8 }
 0x428   :  { %v1800_v15 = vadd.f32 %v7854_v36, %v1787_v10  ;;  %v1788_v16 = vmul.f32 %v7853_v0, %v1775_v11  ;;  %v8894_v17 = vpop.f32.mrb[12].mxu0 }
 0x429   :  { %v1809_v9 = vpack.c.bf16 %v1802_v13, %v1802_v13  ;;  %v10538_v18 = vadd.f32 %v7854_v36, %v1790_v14  ;;  %v1772_v19 = vadd.f32 %v8894_v17, %v7852_v60  ;;  %v1737_v12 = vpop.f32.mrb[13].mxu0 }
 0x42a   :  { %v1808_v20 = vpack.c.bf16 %v1800_v15, %v1800_v15  ;;  %v10540_v21 = vadd.f32 %v7854_v36, %v1788_v16  ;;  %v1770_v22 = vadd.f32 %v7852_v60, %v1737_v12  ;;  %v8895_v23 = vpop.f32.mrb[14].mxu0  ;;  %v9092_v15 = vld [vmem:[#allocation11 + $0x108] ss:$16 sps:$4 sm:$0xff]  }
 0x42b   :  { %v10542_v24 = vunpack.c.l.b16 %v1809_v9  ;;  %v1780_v25 = vmax.f32 %v1772_v19, 0.0  ;;  %v1773_v26 = vadd.f32 %v8895_v23, %v7852_v60  ;;  %v1740_v27 = vpop.f32.mrb[15].mxu0  ;;  %v4115_v59 = vpack.c.bf16 %v10538_v18, %v10538_v18  ;;  %v9095_v16 = vld [vmem:[#allocation11 + $0x208] ss:$16 sps:$4 sm:$0xff]  }
 0x42c   :  { %v10544_v28 = vunpack.c.l.b16 %v1808_v20  ;;  %v1778_v29 = vmax.f32 %v1770_v22, 0.0  ;;  %v1771_v30 = vadd.f32 %v7852_v60, %v1740_v27  ;;  %v4114_v60 = vpack.c.bf16 %v10540_v21, %v10540_v21  ;;  %v9100_v21 = vld [vmem:[#allocation11 + $0x12c] ss:$16 sps:$4 sm:$0xff]  }
 0x42d   :  { %v1793_v31 = vmul.f32 %v7853_v0, %v1780_v25  ;;  %v1781_v32 = vmax.f32 %v1773_v26, 0.0  ;;  %v2138_v33 = vrot.slane %v10542_v24, 7  ;;  %v2422_v48 = vrot.slane %v10542_v24, 1  ;;  %v9103_v22 = vld [vmem:[#allocation11 + $0x22c] ss:$16 sps:$4 sm:$0xff]  }
 0x42e   :  { %v1791_v34 = vmul.f32 %v7853_v0, %v1778_v29  ;;  %v1779_v35 = vmax.f32 %v1771_v30, 0.0  ;;  %v1885_v37 = vrot.slane %v10544_v28, 1  ;;  %v2421_v42 = vrot.slane %v10544_v28, 2 }
 0x42f   :  { %v1806_v38 = vadd.f32 %v7854_v36, %v1793_v31  ;;  %v1794_v39 = vmul.f32 %v7853_v0, %v1781_v32  ;;  %v2139_v40 = vsel %vm1886_vm3, %v2138_v33, %v10544_v28  ;;  %v2708_v52 = vrot.slane %v10544_v28, 3  ;;  %v9098_v32 = vld [vmem:[#allocation11 + $0x128] ss:$16 sps:$4 sm:$0xff]  }
 0x430   :  { %v1804_v43 = vadd.f32 %v7854_v36, %v1791_v34  ;;  %v1792_v44 = vmul.f32 %v7853_v0, %v1779_v35  ;;  %v1887_v45 = vsel %vm1886_vm3, %v10542_v24, %v1885_v37  ;;  %v2709_v53 = vrot.slane %v10542_v24, 2  ;;  %v9101_v33 = vld [vmem:[#allocation11 + $0x228] ss:$16 sps:$4 sm:$0xff]  }
 0x431   :  { %v1811_v50 = vpack.c.bf16 %v1806_v38, %v1806_v38  ;;  %v1807_v51 = vadd.f32 %v7854_v36, %v1794_v39  ;;  %v2423_v55 = vsel %vm1886_vm3, %v2422_v48, %v2421_v42  ;;  %v2995_v54 = vrot.slane %v10544_v28, 4  ;;  %v9106_v39 = vld [vmem:[#allocation11 + $0x14c] ss:$16 sps:$4 sm:$0xff]  }
 0x432   :  { %v1810_v46 = vpack.c.bf16 %v1804_v43, %v1804_v43  ;;  %v1805_v47 = vadd.f32 %v7854_v36, %v1792_v44  ;;  %v2710_v57 = vsel %vm1886_vm3, %v2709_v53, %v2708_v52  ;;  %v2996_v49 = vrot.slane %v10542_v24, 3  ;;  %v9107_v53 = vld [vmem:[#allocation11 + $0x248] ss:$16 sps:$4 sm:$0xff]  }
 0x433   :  { %v10557_v56 = vunpack.c.l.b16 %v1811_v50  ;;  %v4117_v62 = vpack.c.bf16 %v1807_v51, %v1807_v51  ;;  %v3283_v1 = vrot.slane %v10544_v28, 5  ;;  %v3284_v2 = vrot.slane %v10542_v24, 4 }
 0x434   :  { %v10566_v61 = vunpack.c.l.b16 %v1810_v46  ;;  %v2997_v41 = vsel %vm1886_vm3, %v2996_v49, %v2995_v54  ;;  %v4116_v10 = vpack.c.bf16 %v1805_v47, %v1805_v47  ;;  %v10606_v30 = vunpack.c.l.b16 %v4115_v59  ;;  %v9112_v54 = vld [vmem:[#allocation11 + $0x16c] ss:$16 sps:$4 sm:$0xff]  }
 0x435   :  { %v1891_v63 = vrot.slane %v10557_v56, 6  ;;  %v2425_v0 = vrot.slane %v10557_v56, 7  ;;  %v2142_v5 = vrot.slane %v10557_v56, 5  ;;  %v3000_v14 = vrot.slane %v10557_v56, 1  ;;  %v9115_v49 = vld [vmem:[#allocation11 + $0x26c] ss:$16 sps:$4 sm:$0xff]  }
 0x436   :  { %v1888_v3 = vrot.slane %v10566_v61, 7  ;;  %v2140_v4 = vrot.slane %v10566_v61, 6  ;;  %v2424_v36 = vsel %vm1889_vm4, %v10566_v61, %v2423_v55  ;;  %v2711_v7 = vrot.slane %v10566_v61, 1 }
 0x437   :  { %v10578_v6 = vsel %vm1892_vm5, %v2425_v0, %v2424_v36  ;;  %v2998_v8 = vrot.slane %v10566_v61, 2  ;;  %v3285_v26 = vsel %vm1886_vm3, %v3284_v2, %v3283_v1  ;;  %v3286_v27 = vrot.slane %v10566_v61, 3 }
 0x438   :  { %v1890_v11 = vsel %vm1889_vm4, %v1888_v3, %v1887_v45  ;;  %v2141_v13 = vsel %vm1889_vm4, %v2140_v4, %v2139_v40  ;;  %v2712_v18 = vsel %vm1889_vm4, %v2711_v7, %v2710_v57  ;;  %v3288_v29 = vrot.slane %v10557_v56, 2  ;;  %v9109_v40 = vld [vmem:[#allocation11 + $0x24c] ss:$16 sps:$4 sm:$0xff]   ;;  %v9104_v45 = vld [vmem:[#allocation11 + $0x148] ss:$16 sps:$4 sm:$0xff]  }
 0x439   :  { %v1893_v17 = vsel %vm1892_vm5, %v1891_v63, %v1890_v11  ;;  %v2143_v9 = vsel %vm1892_vm5, %v2142_v5, %v2141_v13  ;;  %v2999_v19 = vsel %vm1889_vm4, %v2998_v8, %v2997_v41  ;;  %v10596_v23 = vsel %vm1892_vm5, %v10557_v56, %v2712_v18  ;;  %v9110_v3 = vld [vmem:[#allocation11 + $0x168] ss:$16 sps:$4 sm:$0xff]   ;;  %v9118_v41 = vld [vmem:[#allocation11 + $0x18c] ss:$16 sps:$4 sm:$0xff]  }
 0x43a   :  { %v10590_v12 = vpack.c.b16 %v1893_v17, %v1893_v17  ;;  %v10592_v20 = vpack.c.b16 %v2143_v9, %v2143_v9  ;;  %v10599_v25 = vsel %vm1892_vm5, %v3000_v14, %v2999_v19  ;;  %v10608_v31 = vunpack.c.l.b16 %v4116_v10  ;;  %v9113_v4 = vld [vmem:[#allocation11 + $0x268] ss:$16 sps:$4 sm:$0xff]   ;;  %v9121_v8 = vld [vmem:[#allocation11 + $0x28c] ss:$16 sps:$4 sm:$0xff]  }
 0x43b   :  { %v3287_v34 = vsel %vm1889_vm4, %v3286_v27, %v3285_v26  ;;  %v3571_v35 = vrot.slane %v10544_v28, 6  ;;  %v10612_v37 = vunpack.c.l.b16 %v4114_v60  ;;  %v10614_v38 = vunpack.c.l.b16 %v4117_v62  ;;  %v9116_v19 = vld [vmem:[#allocation11 + $0x188] ss:$16 sps:$4 sm:$0xff]  }
 0x43c   :  { %2089 = vmatmul.mubr.bf16.vlgmr.msra.gmra.mrb[8].mxu1 %v10590_v12  ;;  %2380 = vmatmul.mubr.bf16.vlgmr.msra.gmra.mrb[16].mxu0 %v10592_v20  ;;  %v10617_v42 = vsel %vm1892_vm5, %v3288_v29, %v3287_v34  ;;  %v3572_v43 = vrot.slane %v10542_v24, 5  ;;  %v3574_v44 = vrot.slane %v10566_v61, 4  ;;  %v3576_v48 = vrot.slane %v10557_v56, 3 }
 0x43d   :  { %2098 = vmatpush1.bf16.msra.mxu1 %v9092_v15  ;;  %2631 = vmatpush1.bf16.msra.mxu0 %v9095_v16  ;;  %v3859_v50 = vrot.slane %v10544_v28, 7  ;;  %v3860_v51 = vrot.slane %v10542_v24, 6  ;;  %v3862_v52 = vrot.slane %v10566_v61, 5  ;;  %v3864_v47 = vrot.slane %v10557_v56, 4 }
 0x43e   :  { %2099 = vmatprep.subr.bf16.mxu1 %v9100_v21  ;;  %2632 = vmatprep.subr.bf16.mxu0 %v9103_v22  ;;  %v3573_v46 = vsel %vm1886_vm3, %v3572_v43, %v3571_v35  ;;  %v4159_v55 = vrot.slane %v10606_v30, 7  ;;  %v4161_v57 = vrot.slane %v10608_v31, 6  ;;  %v4163_v59 = vrot.slane %v10614_v38, 5  ;;  %v9119_v21 = vld [vmem:[#allocation11 + $0x288] ss:$16 sps:$4 sm:$0xff]  }
 0x43f   :  { %2129 = vmatprep.mubr.bf16.mxu1 %v10237_v58  ;;  %2662 = vmatprep.mubr.bf16.mxu0 %v10237_v58  ;;  %v3575_v28 = vsel %vm1889_vm4, %v3574_v44, %v3573_v46  ;;  %v3861_v24 = vsel %vm1886_vm3, %v3860_v51, %v3859_v50  ;;  %v4446_v60 = vrot.slane %v10612_v37, 1  ;;  %v4448_v63 = vrot.slane %v10608_v31, 7 }
 0x440   :  { %v10636_v61 = vsel %vm1892_vm5, %v3576_v48, %v3575_v28  ;;  %v3863_v56 = vsel %vm1889_vm4, %v3862_v52, %v3861_v24  ;;  %v4160_v62 = vsel %vm1886_vm3, %v4159_v55, %v10612_v37  ;;  %v4450_v7 = vrot.slane %v10614_v38, 6  ;;  %v9122_v52 = vld [vmem:[#allocation11 + $0x1a8] ss:$16 sps:$4 sm:$0xff]  }
 0x441   :  { %2100 = vmatpush1.bf16.msra.mxu1 %v9098_v32  ;;  %2633 = vmatpush1.bf16.msra.mxu0 %v9101_v33  ;;  %v10643_v0 = vsel %vm1892_vm5, %v3864_v47, %v3863_v56  ;;  %v4162_v1 = vsel %vm1889_vm4, %v4161_v57, %v4160_v62  ;;  %v4447_v2 = vsel %vm1886_vm3, %v10606_v30, %v4446_v60  ;;  %v4733_v10 = vrot.slane %v10612_v37, 2  ;;  %v9124_v32 = vld [vmem:[#allocation11 + $0x1ac] ss:$16 sps:$4 sm:$0xff]  }
 0x442   :  { %2101 = vmatprep.subr.bf16.mxu1 %v9106_v39  ;;  %2634 = vmatprep.subr.bf16.mxu0 %v9109_v40  ;;  %v10649_v5 = vsel %vm1892_vm5, %v4163_v59, %v4162_v1  ;;  %v4449_v36 = vsel %vm1889_vm4, %v4448_v63, %v4447_v2  ;;  %v4734_v11 = vrot.slane %v10606_v30, 1  ;;  %v4737_v14 = vrot.slane %v10614_v38, 7  ;;  %v9127_v33 = vld [vmem:[#allocation11 + $0x2ac] ss:$16 sps:$4 sm:$0xff]  }
 0x443   :  { %v10656_v13 = vsel %vm1892_vm5, %v4450_v7, %v4449_v36  ;;  %v5020_v15 = vrot.slane %v10612_v37, 3  ;;  %v5021_v16 = vrot.slane %v10606_v30, 2  ;;  %v5023_v9 = vrot.slane %v10608_v31, 1 }
 0x444   :  { %v4735_v17 = vsel %vm1886_vm3, %v4734_v11, %v4733_v10  ;;  %v5307_v18 = vrot.slane %v10612_v37, 4  ;;  %v5308_v27 = vrot.slane %v10606_v30, 3  ;;  %v5310_v29 = vrot.slane %v10608_v31, 2  ;;  %v9137_v11 = vld [vmem:[#allocation11 + $0x2e8] ss:$16 sps:$4 sm:$0xff]  }
 0x445   :  { %2102 = vmatpush1.bf16.msra.mxu1 %v9104_v45  ;;  %2635 = vmatpush1.bf16.msra.mxu0 %v9107_v53  ;;  %v4736_v22 = vsel %vm1889_vm4, %v10608_v31, %v4735_v17  ;;  %v5022_v26 = vsel %vm1886_vm3, %v5021_v16, %v5020_v15  ;;  %v5595_v39 = vrot.slane %v10612_v37, 5  ;;  %v5312_v44 = vrot.slane %v10614_v38, 1  ;;  %v9125_v53 = vld [vmem:[#allocation11 + $0x2a8] ss:$16 sps:$4 sm:$0xff]   ;;  %v9145_v15 = vld [vmem:[#allocation11 + $0x30c] ss:$16 sps:$4 sm:$0xff]  }
 0x446   :  { %2103 = vmatprep.subr.bf16.mxu1 %v9112_v54  ;;  %2636 = vmatprep.subr.bf16.mxu0 %v9115_v49  ;;  %v10670_v34 = vsel %vm1892_vm5, %v4737_v14, %v4736_v22  ;;  %v5024_v35 = vsel %vm1889_vm4, %v5023_v9, %v5022_v26  ;;  %v5309_v43 = vsel %vm1886_vm3, %v5308_v27, %v5307_v18  ;;  %v5596_v45 = vrot.slane %v10606_v30, 4  ;;  %v9130_v54 = vld [vmem:[#allocation11 + $0x1cc] ss:$16 sps:$4 sm:$0xff]   ;;  %v9142_v14 = vld [vmem:[#allocation11 + $0x4] ss:$16 sps:$4 sm:$0xff]  }
 0x447   :  { %v10676_v40 = vsel %vm1892_vm5, %v10614_v38, %v5024_v35  ;;  %v5311_v48 = vsel %vm1889_vm4, %v5310_v29, %v5309_v43  ;;  %v5598_v50 = vrot.slane %v10608_v31, 3  ;;  %v5600_v51 = vrot.slane %v10614_v38, 2  ;;  %v9133_v49 = vld [vmem:[#allocation11 + $0x2cc] ss:$16 sps:$4 sm:$0xff]   ;;  %v9143_v16 = vld [vmem:[#allocation11 + $0x308] ss:$16 sps:$4 sm:$0xff]  }
 0x448   :  { %v10685_v46 = vsel %vm1892_vm5, %v5312_v44, %v5311_v48  ;;  %v5597_v47 = vsel %vm1886_vm3, %v5596_v45, %v5595_v39  ;;  %v5883_v55 = vrot.slane %v10612_v37, 6  ;;  %v5884_v57 = vrot.slane %v10606_v30, 5  ;;  %v9148_v9 = vld [vmem:[#allocation11 + $0x24] ss:$16 sps:$4 sm:$0xff]   ;;  %v9151_v18 = vld [vmem:[#allocation11 + $0x32c] ss:$16 sps:$4 sm:$0xff]  }
 0x449   :  { %2104 = vmatpush1.bf16.msra.mxu1 %v9110_v3  ;;  %2637 = vmatpush1.bf16.msra.mxu0 %v9113_v4  ;;  %v5599_v28 = vsel %vm1889_vm4, %v5598_v50, %v5597_v47  ;;  %v5886_v24 = vrot.slane %v10608_v31, 4  ;;  %v5888_v59 = vrot.slane %v10614_v38, 3  ;;  %v6171_v62 = vrot.slane %v10612_v37, 7  ;;  %v9128_v3 = vld [vmem:[#allocation11 + $0x1c8] ss:$16 sps:$4 sm:$0xff]  }
 0x44a   :  { %2105 = vmatprep.subr.bf16.mxu1 %v9118_v41  ;;  %2638 = vmatprep.subr.bf16.mxu0 %v9121_v8  ;;  %v10694_v60 = vsel %vm1892_vm5, %v5600_v51, %v5599_v28  ;;  %v5885_v56 = vsel %vm1886_vm3, %v5884_v57, %v5883_v55  ;;  %v6172_v63 = vrot.slane %v10606_v30, 6  ;;  %v6174_v2 = vrot.slane %v10608_v31, 5  ;;  %v9131_v4 = vld [vmem:[#allocation11 + $0x2c8] ss:$16 sps:$4 sm:$0xff]   ;;  %v9136_v37 = vld [vmem:[#allocation11 + $0x1ec] ss:$16 sps:$4 sm:$0xff]  }
 0x44b   :  { %v5887_v1 = vsel %vm1889_vm4, %v5886_v24, %v5885_v56  ;;  %v6176_v41 = vrot.slane %v10614_v38, 4  ;;  %v9139_v8 = vld [vmem:[#allocation11 + $0x2ec] ss:$16 sps:$4 sm:$0xff]   ;;  %v9134_v31 = vld [vmem:[#allocation11 + $0x1e8] ss:$16 sps:$4 sm:$0xff]   ;;  %v10712_v17 = vpack.c.b16 %v10578_v6, %v10578_v6 }
 0x44c   :  { %v10702_v36 = vsel %vm1892_vm5, %v5888_v59, %v5887_v1  ;;  %v6173_v7 = vsel %vm1886_vm3, %v6172_v63, %v6171_v62  ;;  %v9140_v38 = vld [vmem:[#allocation11] ss:$16 sps:$4 sm:$0xff]   ;;  %v9154_v22 = vld [vmem:[#allocation11 + $0x44] ss:$16 sps:$4 sm:$0xff]   ;;  %v9157_v26 = vld [vmem:[#allocation11 + $0x34c] ss:$16 sps:$4 sm:$0xff]   ;;  %v10720_v63 = vpack.c.b16 %v10596_v23, %v10596_v23 }
 0x44d   :  { %2106 = vmatpush1.bf16.msra.mxu1 %v9116_v19  ;;  %2639 = vmatpush1.bf16.msra.mxu0 %v9119_v21  ;;  %v6175_v30 = vsel %vm1889_vm4, %v6174_v2, %v6173_v7  ;;  %v9146_v19 = vld [vmem:[#allocation11 + $0x20] ss:$16 sps:$4 sm:$0xff]   ;;  %v9149_v21 = vld [vmem:[#allocation11 + $0x328] ss:$16 sps:$4 sm:$0xff]   ;;  %v9163_v29 = vld [vmem:[#allocation11 + $0x36c] ss:$16 sps:$4 sm:$0xff]  }
 0x44e   :  { %2107 = vmatprep.subr.bf16.mxu1 %v9124_v32  ;;  %2640 = vmatprep.subr.bf16.mxu0 %v9127_v33  ;;  %v10708_v10 = vsel %vm1892_vm5, %v6176_v41, %v6175_v30  ;;  %v9152_v6 = vld [vmem:[#allocation11 + $0x40] ss:$16 sps:$4 sm:$0xff]   ;;  %v9155_v27 = vld [vmem:[#allocation11 + $0x348] ss:$16 sps:$4 sm:$0xff]   ;;  %v9166_v35 = vld [vmem:[#allocation11 + $0x84] ss:$16 sps:$4 sm:$0xff]  }
 0x44f   :  { %v9158_v32 = vld [vmem:[#allocation11 + $0x60] ss:$16 sps:$4 sm:$0xff]   ;;  %v9161_v33 = vld [vmem:[#allocation11 + $0x368] ss:$16 sps:$4 sm:$0xff]   ;;  %v9169_v39 = vld [vmem:[#allocation11 + $0x38c] ss:$16 sps:$4 sm:$0xff]  }
 0x450   :  { %v9164_v43 = vld [vmem:[#allocation11 + $0x80] ss:$16 sps:$4 sm:$0xff]   ;;  %v9167_v44 = vld [vmem:[#allocation11 + $0x388] ss:$16 sps:$4 sm:$0xff]   ;;  %v9172_v45 = vld [vmem:[#allocation11 + $0xa4] ss:$16 sps:$4 sm:$0xff]  }
 0x451   :  { %2108 = vmatpush1.bf16.msra.mxu1 %v9122_v52  ;;  %2641 = vmatpush1.bf16.msra.mxu0 %v9125_v53  ;;  %v9175_v48 = vld [vmem:[#allocation11 + $0x3ac] ss:$16 sps:$4 sm:$0xff]   ;;  %v9170_v50 = vld [vmem:[#allocation11 + $0xa0] ss:$16 sps:$4 sm:$0xff]   ;;  %v9173_v51 = vld [vmem:[#allocation11 + $0x3a8] ss:$16 sps:$4 sm:$0xff]  }
 0x452   :  { %2109 = vmatprep.subr.bf16.mxu1 %v9130_v54  ;;  %2642 = vmatprep.subr.bf16.mxu0 %v9133_v49  ;;  %v9178_v52 = vld [vmem:[#allocation11 + $0xc4] ss:$16 sps:$4 sm:$0xff]   ;;  %v9181_v53 = vld [vmem:[#allocation11 + $0x3cc] ss:$16 sps:$4 sm:$0xff]   ;;  %v9176_v47 = vld [vmem:[#allocation11 + $0xc0] ss:$16 sps:$4 sm:$0xff]  }
 0x453   :  { %v9179_v55 = vld [vmem:[#allocation11 + $0x3c8] ss:$16 sps:$4 sm:$0xff]   ;;  %v9184_v57 = vld [vmem:[#allocation11 + $0xe4] ss:$16 sps:$4 sm:$0xff]   ;;  %v9187_v54 = vld [vmem:[#allocation11 + $0x3ec] ss:$16 sps:$4 sm:$0xff]  }
 0x454   :  { %v9182_v49 = vld [vmem:[#allocation11 + $0xe0] ss:$16 sps:$4 sm:$0xff]   ;;  %v9185_v28 = vld [vmem:[#allocation11 + $0x3e8] ss:$16 sps:$4 sm:$0xff]   ;;  %v9190_v24 = vld [vmem:[#allocation11 + $0x204] ss:$16 sps:$4 sm:$0xff]  }
 0x455   :  { %2110 = vmatpush1.bf16.msra.mxu1 %v9128_v3  ;;  %2643 = vmatpush1.bf16.msra.mxu0 %v9131_v4  ;;  %v9193_v59 = vld [vmem:[#allocation11 + $0x40c] ss:$16 sps:$4 sm:$0xff]   ;;  %v9188_v56 = vld [vmem:[#allocation11 + $0x200] ss:$16 sps:$4 sm:$0xff]   ;;  %v9191_v62 = vld [vmem:[#allocation11 + $0x408] ss:$16 sps:$4 sm:$0xff]  }
 0x456   :  { %2111 = vmatprep.subr.bf16.mxu1 %v9136_v37  ;;  %2644 = vmatprep.subr.bf16.mxu0 %v9139_v8  ;;  %v9196_v1 = vld [vmem:[#allocation11 + $0x224] ss:$16 sps:$4 sm:$0xff]   ;;  %v9199_v2 = vld [vmem:[#allocation11 + $0x42c] ss:$16 sps:$4 sm:$0xff]   ;;  %v9194_v3 = vld [vmem:[#allocation11 + $0x220] ss:$16 sps:$4 sm:$0xff]  }
 0x457   :  { %v9197_v4 = vld [vmem:[#allocation11 + $0x428] ss:$16 sps:$4 sm:$0xff]   ;;  %v9202_v7 = vld [vmem:[#allocation11 + $0x244] ss:$16 sps:$4 sm:$0xff]   ;;  %v9205_v41 = vld [vmem:[#allocation11 + $0x44c] ss:$16 sps:$4 sm:$0xff]  }
 0x458   :  { %v9200_v23 = vld [vmem:[#allocation11 + $0x240] ss:$16 sps:$4 sm:$0xff]   ;;  %v9203_v37 = vld [vmem:[#allocation11 + $0x448] ss:$16 sps:$4 sm:$0xff]   ;;  %v9211_v8 = vld [vmem:[#allocation11 + $0x46c] ss:$16 sps:$4 sm:$0xff]  }
 0x459   :  { %2112 = vmatpush1.bf16.msra.mxu1 %v9134_v31  ;;  %2645 = vmatpush1.bf16.msra.mxu0 %v9137_v11  ;;  %v9206_v30 = vld [vmem:[#allocation11 + $0x260] ss:$16 sps:$4 sm:$0xff]   ;;  %v9209_v31 = vld [vmem:[#allocation11 + $0x468] ss:$16 sps:$4 sm:$0xff]   ;;  %v9214_v11 = vld [vmem:[#allocation11 + $0x284] ss:$16 sps:$4 sm:$0xff]  }
 0x45a   :  { %2306 = vmatprep.subr.bf16.mxu1 %v9142_v14  ;;  %2917 = vmatprep.subr.bf16.mxu0 %v9145_v15  ;;  %v9217_v14 = vld [vmem:[#allocation11 + $0x48c] ss:$16 sps:$4 sm:$0xff]   ;;  %v9212_v15 = vld [vmem:[#allocation11 + $0x280] ss:$16 sps:$4 sm:$0xff]  }
 0x45c   :  { %2130 = vmatmul.mubr.bf16.vlgmr.msra.gmra.mrb[12].mxu1 %v10590_v12  ;;  %2663 = vmatmul.mubr.bf16.vlgmr.msra.gmra.mrb[20].mxu0 %v10712_v17  ;;  %v9160_v12 = vld [vmem:[#allocation11 + $0x64] ss:$16 sps:$4 sm:$0xff]  }
 0x45d   :  { %2307 = vmatpush1.bf16.msra.mxu1 %v9140_v38  ;;  %2918 = vmatpush1.bf16.msra.mxu0 %v9143_v16  ;;  %v9215_v38 = vld [vmem:[#allocation11 + $0x488] ss:$16 sps:$4 sm:$0xff]   ;;  %v9220_v16 = vld [vmem:[#allocation11 + $0x2a4] ss:$16 sps:$4 sm:$0xff]  }
 0x45e   :  { %2308 = vmatprep.subr.bf16.mxu1 %v9148_v9  ;;  %2919 = vmatprep.subr.bf16.mxu0 %v9151_v18  ;;  %v9223_v9 = vld [vmem:[#allocation11 + $0x4ac] ss:$16 sps:$4 sm:$0xff]   ;;  %v9218_v18 = vld [vmem:[#allocation11 + $0x2a0] ss:$16 sps:$4 sm:$0xff]  }
 0x45f   :  { %2338 = vmatprep.mubr.bf16.mxu1 %v10237_v58  ;;  %2949 = vmatprep.mubr.bf16.mxu0 %v10237_v58 }
 0x461   :  { %2309 = vmatpush1.bf16.msra.mxu1 %v9146_v19  ;;  %2920 = vmatpush1.bf16.msra.mxu0 %v9149_v21  ;;  %v9221_v19 = vld [vmem:[#allocation11 + $0x4a8] ss:$16 sps:$4 sm:$0xff]   ;;  %v9226_v21 = vld [vmem:[#allocation11 + $0x2c4] ss:$16 sps:$4 sm:$0xff]  }
 0x462   :  { %2310 = vmatprep.subr.bf16.mxu1 %v9154_v22  ;;  %2921 = vmatprep.subr.bf16.mxu0 %v9157_v26  ;;  %v9229_v22 = vld [vmem:[#allocation11 + $0x4cc] ss:$16 sps:$4 sm:$0xff]   ;;  %v9224_v26 = vld [vmem:[#allocation11 + $0x2c0] ss:$16 sps:$4 sm:$0xff]  }
 0x465   :  { %2311 = vmatpush1.bf16.msra.mxu1 %v9152_v6  ;;  %2922 = vmatpush1.bf16.msra.mxu0 %v9155_v27  ;;  %v9227_v6 = vld [vmem:[#allocation11 + $0x4c8] ss:$16 sps:$4 sm:$0xff]   ;;  %v9232_v27 = vld [vmem:[#allocation11 + $0x2e4] ss:$16 sps:$4 sm:$0xff]  }
 0x466   :  { %2312 = vmatprep.subr.bf16.mxu1 %v9160_v12  ;;  %2923 = vmatprep.subr.bf16.mxu0 %v9163_v29  ;;  %v9235_v12 = vld [vmem:[#allocation11 + $0x4ec] ss:$16 sps:$4 sm:$0xff]   ;;  %v9230_v29 = vld [vmem:[#allocation11 + $0x2e0] ss:$16 sps:$4 sm:$0xff]  }
 0x469   :  { %2313 = vmatpush1.bf16.msra.mxu1 %v9158_v32  ;;  %2924 = vmatpush1.bf16.msra.mxu0 %v9161_v33  ;;  %v9233_v32 = vld [vmem:[#allocation11 + $0x4e8] ss:$16 sps:$4 sm:$0xff]   ;;  %v9238_v33 = vld [vmem:[#allocation11 + $0x304] ss:$16 sps:$4 sm:$0xff]  }
 0x46a   :  { %2314 = vmatprep.subr.bf16.mxu1 %v9166_v35  ;;  %2925 = vmatprep.subr.bf16.mxu0 %v9169_v39  ;;  %v9241_v35 = vld [vmem:[#allocation11 + $0x50c] ss:$16 sps:$4 sm:$0xff]   ;;  %v9236_v39 = vld [vmem:[#allocation11 + $0x300] ss:$16 sps:$4 sm:$0xff]  }
 0x46d   :  { %2315 = vmatpush1.bf16.msra.mxu1 %v9164_v43  ;;  %2926 = vmatpush1.bf16.msra.mxu0 %v9167_v44  ;;  %v9239_v43 = vld [vmem:[#allocation11 + $0x508] ss:$16 sps:$4 sm:$0xff]   ;;  %v10728_v44 = vpack.c.b16 %v10599_v25, %v10599_v25  ;;  %v9248_v25 = vld [vmem:[#allocation11 + $0x340] ss:$16 sps:$4 sm:$0xff]  }
 0x46e   :  { %2316 = vmatprep.subr.bf16.mxu1 %v9172_v45  ;;  %2927 = vmatprep.subr.bf16.mxu0 %v9175_v48  ;;  %v9244_v45 = vld [vmem:[#allocation11 + $0x324] ss:$16 sps:$4 sm:$0xff]   ;;  %v9247_v48 = vld [vmem:[#allocation11 + $0x52c] ss:$16 sps:$4 sm:$0xff]  }
 0x471   :  { %2317 = vmatpush1.bf16.msra.mxu1 %v9170_v50  ;;  %2928 = vmatpush1.bf16.msra.mxu0 %v9173_v51  ;;  %v9242_v50 = vld [vmem:[#allocation11 + $0x320] ss:$16 sps:$4 sm:$0xff]   ;;  %v9245_v51 = vld [vmem:[#allocation11 + $0x528] ss:$16 sps:$4 sm:$0xff]  }
 0x472   :  { %2318 = vmatprep.subr.bf16.mxu1 %v9178_v52  ;;  %2929 = vmatprep.subr.bf16.mxu0 %v9181_v53  ;;  %v9250_v52 = vld [vmem:[#allocation11 + $0x344] ss:$16 sps:$4 sm:$0xff]   ;;  %v9253_v53 = vld [vmem:[#allocation11 + $0x54c] ss:$16 sps:$4 sm:$0xff]  }
 0x475   :  { %2319 = vmatpush1.bf16.msra.mxu1 %v9176_v47  ;;  %2930 = vmatpush1.bf16.msra.mxu0 %v9179_v55  ;;  %v9251_v47 = vld [vmem:[#allocation11 + $0x548] ss:$16 sps:$4 sm:$0xff]   ;;  %v9259_v55 = vld [vmem:[#allocation11 + $0x56c] ss:$16 sps:$4 sm:$0xff]  }
 0x476   :  { %2320 = vmatprep.subr.bf16.mxu1 %v9184_v57  ;;  %2931 = vmatprep.subr.bf16.mxu0 %v9187_v54  ;;  %v9254_v57 = vld [vmem:[#allocation11 + $0x360] ss:$16 sps:$4 sm:$0xff]   ;;  %v9257_v54 = vld [vmem:[#allocation11 + $0x568] ss:$16 sps:$4 sm:$0xff]  }
 0x479   :  { %2321 = vmatpush1.bf16.msra.mxu1 %v9182_v49  ;;  %2932 = vmatpush1.bf16.msra.mxu0 %v9185_v28  ;;  %v9262_v49 = vld [vmem:[#allocation11 + $0x384] ss:$16 sps:$4 sm:$0xff]   ;;  %v9265_v28 = vld [vmem:[#allocation11 + $0x58c] ss:$16 sps:$4 sm:$0xff]  }
 0x47a   :  { %2589 = vmatprep.subr.bf16.mxu1 %v9190_v24  ;;  %3205 = vmatprep.subr.bf16.mxu0 %v9193_v59  ;;  %v9260_v24 = vld [vmem:[#allocation11 + $0x380] ss:$16 sps:$4 sm:$0xff]   ;;  %v9263_v59 = vld [vmem:[#allocation11 + $0x588] ss:$16 sps:$4 sm:$0xff]  }
 0x47c   :  { %2339 = vmatmul.mubr.bf16.vlgmr.msra.gmra.mrb[16].mxu1 %v10592_v20  ;;  %2950 = vmatmul.mubr.bf16.vlgmr.msra.gmra.mrb[24].mxu0 %v10720_v63  ;;  %v9208_v20 = vld [vmem:[#allocation11 + $0x264] ss:$16 sps:$4 sm:$0xff]  }
 0x47d   :  { %2590 = vmatpush1.bf16.msra.mxu1 %v9188_v56  ;;  %3206 = vmatpush1.bf16.msra.mxu0 %v9191_v62  ;;  %v9268_v56 = vld [vmem:[#allocation11 + $0x3a4] ss:$16 sps:$4 sm:$0xff]   ;;  %v9271_v62 = vld [vmem:[#allocation11 + $0x5ac] ss:$16 sps:$4 sm:$0xff]  }
 0x47e   :  { %2591 = vmatprep.subr.bf16.mxu1 %v9196_v1  ;;  %3207 = vmatprep.subr.bf16.mxu0 %v9199_v2  ;;  %v9266_v1 = vld [vmem:[#allocation11 + $0x3a0] ss:$16 sps:$4 sm:$0xff]   ;;  %v9269_v2 = vld [vmem:[#allocation11 + $0x5a8] ss:$16 sps:$4 sm:$0xff]  }
 0x47f   :  { %2621 = vmatprep.mubr.bf16.mxu1 %v10237_v58  ;;  %3237 = vmatprep.mubr.bf16.mxu0 %v10237_v58 }
 0x481   :  { %2592 = vmatpush1.bf16.msra.mxu1 %v9194_v3  ;;  %3208 = vmatpush1.bf16.msra.mxu0 %v9197_v4  ;;  %v9274_v3 = vld [vmem:[#allocation11 + $0x3c4] ss:$16 sps:$4 sm:$0xff]   ;;  %v9277_v4 = vld [vmem:[#allocation11 + $0x5cc] ss:$16 sps:$4 sm:$0xff]  }
 0x482   :  { %2593 = vmatprep.subr.bf16.mxu1 %v9202_v7  ;;  %3209 = vmatprep.subr.bf16.mxu0 %v9205_v41  ;;  %v9272_v7 = vld [vmem:[#allocation11 + $0x3c0] ss:$16 sps:$4 sm:$0xff]   ;;  %v9275_v41 = vld [vmem:[#allocation11 + $0x5c8] ss:$16 sps:$4 sm:$0xff]  }
 0x485   :  { %2594 = vmatpush1.bf16.msra.mxu1 %v9200_v23  ;;  %3210 = vmatpush1.bf16.msra.mxu0 %v9203_v37  ;;  %v9280_v23 = vld [vmem:[#allocation11 + $0x3e4] ss:$16 sps:$4 sm:$0xff]   ;;  %v9283_v37 = vld [vmem:[#allocation11 + $0x5ec] ss:$16 sps:$4 sm:$0xff]  }
 0x486   :  { %2595 = vmatprep.subr.bf16.mxu1 %v9208_v20  ;;  %3211 = vmatprep.subr.bf16.mxu0 %v9211_v8  ;;  %v9278_v20 = vld [vmem:[#allocation11 + $0x3e0] ss:$16 sps:$4 sm:$0xff]   ;;  %v9281_v8 = vld [vmem:[#allocation11 + $0x5e8] ss:$16 sps:$4 sm:$0xff]  }
 0x489   :  { %2596 = vmatpush1.bf16.msra.mxu1 %v9206_v30  ;;  %3212 = vmatpush1.bf16.msra.mxu0 %v9209_v31  ;;  %v9286_v30 = vld [vmem:[#allocation11 + $0x404] ss:$16 sps:$4 sm:$0xff]   ;;  %v9289_v31 = vld [vmem:[#allocation11 + $0x60c] ss:$16 sps:$4 sm:$0xff]  }
 0x48a   :  { %2597 = vmatprep.subr.bf16.mxu1 %v9214_v11  ;;  %3213 = vmatprep.subr.bf16.mxu0 %v9217_v14  ;;  %v9284_v11 = vld [vmem:[#allocation11 + $0x400] ss:$16 sps:$4 sm:$0xff]   ;;  %v9287_v14 = vld [vmem:[#allocation11 + $0x608] ss:$16 sps:$4 sm:$0xff]  }
 0x48d   :  { %2598 = vmatpush1.bf16.msra.mxu1 %v9212_v15  ;;  %3214 = vmatpush1.bf16.msra.mxu0 %v9215_v38  ;;  %v10736_v15 = vpack.c.b16 %v10617_v42, %v10617_v42  ;;  %v9292_v38 = vld [vmem:[#allocation11 + $0x424] ss:$16 sps:$4 sm:$0xff]   ;;  %v9296_v42 = vld [vmem:[#allocation11 + $0x440] ss:$16 sps:$4 sm:$0xff]  }
 0x48e   :  { %2599 = vmatprep.subr.bf16.mxu1 %v9220_v16  ;;  %3215 = vmatprep.subr.bf16.mxu0 %v9223_v9  ;;  %v9295_v16 = vld [vmem:[#allocation11 + $0x62c] ss:$16 sps:$4 sm:$0xff]   ;;  %v9290_v9 = vld [vmem:[#allocation11 + $0x420] ss:$16 sps:$4 sm:$0xff]  }
 0x491   :  { %2600 = vmatpush1.bf16.msra.mxu1 %v9218_v18  ;;  %3216 = vmatpush1.bf16.msra.mxu0 %v9221_v19  ;;  %v9293_v18 = vld [vmem:[#allocation11 + $0x628] ss:$16 sps:$4 sm:$0xff]   ;;  %v9298_v19 = vld [vmem:[#allocation11 + $0x444] ss:$16 sps:$4 sm:$0xff]  }
 0x492   :  { %2601 = vmatprep.subr.bf16.mxu1 %v9226_v21  ;;  %3217 = vmatprep.subr.bf16.mxu0 %v9229_v22  ;;  %v9301_v21 = vld [vmem:[#allocation11 + $0x64c] ss:$16 sps:$4 sm:$0xff]   ;;  %v9299_v22 = vld [vmem:[#allocation11 + $0x648] ss:$16 sps:$4 sm:$0xff]  }
 0x495   :  { %2602 = vmatpush1.bf16.msra.mxu1 %v9224_v26  ;;  %3218 = vmatpush1.bf16.msra.mxu0 %v9227_v6  ;;  %v9307_v26 = vld [vmem:[#allocation11 + $0x66c] ss:$16 sps:$4 sm:$0xff]   ;;  %v9302_v6 = vld [vmem:[#allocation11 + $0x460] ss:$16 sps:$4 sm:$0xff]  }
 0x496   :  { %2603 = vmatprep.subr.bf16.mxu1 %v9232_v27  ;;  %3219 = vmatprep.subr.bf16.mxu0 %v9235_v12  ;;  %v9305_v27 = vld [vmem:[#allocation11 + $0x668] ss:$16 sps:$4 sm:$0xff]   ;;  %v9310_v12 = vld [vmem:[#allocation11 + $0x484] ss:$16 sps:$4 sm:$0xff]  }
 0x499   :  { %2604 = vmatpush1.bf16.msra.mxu1 %v9230_v29  ;;  %3220 = vmatpush1.bf16.msra.mxu0 %v9233_v32  ;;  %v9313_v29 = vld [vmem:[#allocation11 + $0x68c] ss:$16 sps:$4 sm:$0xff]   ;;  %v9308_v32 = vld [vmem:[#allocation11 + $0x480] ss:$16 sps:$4 sm:$0xff]  }
 0x49a   :  { %2876 = vmatprep.subr.bf16.mxu1 %v9238_v33  ;;  %3493 = vmatprep.subr.bf16.mxu0 %v9241_v35  ;;  %v9311_v33 = vld [vmem:[#allocation11 + $0x688] ss:$16 sps:$4 sm:$0xff]   ;;  %v9316_v35 = vld [vmem:[#allocation11 + $0x4a4] ss:$16 sps:$4 sm:$0xff]  }
 0x49c   :  { %2622 = vmatmul.mubr.bf16.vlgmr.msra.gmra.mrb[20].mxu1 %v10712_v17  ;;  %3238 = vmatmul.mubr.bf16.vlgmr.msra.gmra.mrb[28].mxu0 %v10728_v44  ;;  %v9256_v17 = vld [vmem:[#allocation11 + $0x364] ss:$16 sps:$4 sm:$0xff]  }
 0x49d   :  { %2877 = vmatpush1.bf16.msra.mxu1 %v9236_v39  ;;  %3494 = vmatpush1.bf16.msra.mxu0 %v9239_v43  ;;  %v9319_v39 = vld [vmem:[#allocation11 + $0x6ac] ss:$16 sps:$4 sm:$0xff]   ;;  %v9314_v43 = vld [vmem:[#allocation11 + $0x4a0] ss:$16 sps:$4 sm:$0xff]  }
 0x49e   :  { %2878 = vmatprep.subr.bf16.mxu1 %v9244_v45  ;;  %3495 = vmatprep.subr.bf16.mxu0 %v9247_v48  ;;  %v9317_v45 = vld [vmem:[#allocation11 + $0x6a8] ss:$16 sps:$4 sm:$0xff]   ;;  %v9322_v48 = vld [vmem:[#allocation11 + $0x4c4] ss:$16 sps:$4 sm:$0xff]  }
 0x49f   :  { %2908 = vmatprep.mubr.bf16.mxu1 %v10237_v58  ;;  %3525 = vmatprep.mubr.bf16.mxu0 %v10237_v58 }
 0x4a1   :  { %2879 = vmatpush1.bf16.msra.mxu1 %v9242_v50  ;;  %3496 = vmatpush1.bf16.msra.mxu0 %v9245_v51  ;;  %v9325_v50 = vld [vmem:[#allocation11 + $0x6cc] ss:$16 sps:$4 sm:$0xff]   ;;  %v9320_v51 = vld [vmem:[#allocation11 + $0x4c0] ss:$16 sps:$4 sm:$0xff]  }
 0x4a2   :  { %2880 = vmatprep.subr.bf16.mxu1 %v9250_v52  ;;  %3497 = vmatprep.subr.bf16.mxu0 %v9253_v53  ;;  %v9323_v52 = vld [vmem:[#allocation11 + $0x6c8] ss:$16 sps:$4 sm:$0xff]   ;;  %v9328_v53 = vld [vmem:[#allocation11 + $0x4e4] ss:$16 sps:$4 sm:$0xff]  }
 0x4a5   :  { %2881 = vmatpush1.bf16.msra.mxu1 %v9248_v25  ;;  %3498 = vmatpush1.bf16.msra.mxu0 %v9251_v47  ;;  %v9331_v25 = vld [vmem:[#allocation11 + $0x6ec] ss:$16 sps:$4 sm:$0xff]   ;;  %v9326_v47 = vld [vmem:[#allocation11 + $0x4e0] ss:$16 sps:$4 sm:$0xff]  }
 0x4a6   :  { %2882 = vmatprep.subr.bf16.mxu1 %v9256_v17  ;;  %3499 = vmatprep.subr.bf16.mxu0 %v9259_v55  ;;  %v9329_v17 = vld [vmem:[#allocation11 + $0x6e8] ss:$16 sps:$4 sm:$0xff]   ;;  %v9334_v55 = vld [vmem:[#allocation11 + $0x504] ss:$16 sps:$4 sm:$0xff]  }
 0x4a9   :  { %2883 = vmatpush1.bf16.msra.mxu1 %v9254_v57  ;;  %3500 = vmatpush1.bf16.msra.mxu0 %v9257_v54  ;;  %v9337_v57 = vld [vmem:[#allocation11 + $0x70c] ss:$16 sps:$4 sm:$0xff]   ;;  %v9332_v54 = vld [vmem:[#allocation11 + $0x500] ss:$16 sps:$4 sm:$0xff]  }
 0x4aa   :  { %2884 = vmatprep.subr.bf16.mxu1 %v9262_v49  ;;  %3501 = vmatprep.subr.bf16.mxu0 %v9265_v28  ;;  %v9335_v49 = vld [vmem:[#allocation11 + $0x708] ss:$16 sps:$4 sm:$0xff]   ;;  %v10744_v28 = vpack.c.b16 %v10636_v61, %v10636_v61  ;;  %v9344_v61 = vld [vmem:[#allocation11 + $0x540] ss:$16 sps:$4 sm:$0xff]  }
 0x4ad   :  { %2885 = vmatpush1.bf16.msra.mxu1 %v9260_v24  ;;  %3502 = vmatpush1.bf16.msra.mxu0 %v9263_v59  ;;  %v9340_v24 = vld [vmem:[#allocation11 + $0x524] ss:$16 sps:$4 sm:$0xff]   ;;  %v9343_v59 = vld [vmem:[#allocation11 + $0x72c] ss:$16 sps:$4 sm:$0xff]  }
 0x4ae   :  { %2886 = vmatprep.subr.bf16.mxu1 %v9268_v56  ;;  %3503 = vmatprep.subr.bf16.mxu0 %v9271_v62  ;;  %v9338_v56 = vld [vmem:[#allocation11 + $0x520] ss:$16 sps:$4 sm:$0xff]   ;;  %v9341_v62 = vld [vmem:[#allocation11 + $0x728] ss:$16 sps:$4 sm:$0xff]  }
 0x4b1   :  { %2887 = vmatpush1.bf16.msra.mxu1 %v9266_v1  ;;  %3504 = vmatpush1.bf16.msra.mxu0 %v9269_v2  ;;  %v9346_v1 = vld [vmem:[#allocation11 + $0x544] ss:$16 sps:$4 sm:$0xff]   ;;  %v9349_v2 = vld [vmem:[#allocation11 + $0x74c] ss:$16 sps:$4 sm:$0xff]  }
 0x4b2   :  { %2888 = vmatprep.subr.bf16.mxu1 %v9274_v3  ;;  %3505 = vmatprep.subr.bf16.mxu0 %v9277_v4  ;;  %v9347_v3 = vld [vmem:[#allocation11 + $0x748] ss:$16 sps:$4 sm:$0xff]   ;;  %v9355_v4 = vld [vmem:[#allocation11 + $0x76c] ss:$16 sps:$4 sm:$0xff]  }
 0x4b5   :  { %2889 = vmatpush1.bf16.msra.mxu1 %v9272_v7  ;;  %3506 = vmatpush1.bf16.msra.mxu0 %v9275_v41  ;;  %v9350_v7 = vld [vmem:[#allocation11 + $0x560] ss:$16 sps:$4 sm:$0xff]   ;;  %v9353_v41 = vld [vmem:[#allocation11 + $0x768] ss:$16 sps:$4 sm:$0xff]  }
 0x4b6   :  { %2890 = vmatprep.subr.bf16.mxu1 %v9280_v23  ;;  %3507 = vmatprep.subr.bf16.mxu0 %v9283_v37  ;;  %v9358_v23 = vld [vmem:[#allocation11 + $0x584] ss:$16 sps:$4 sm:$0xff]   ;;  %v9361_v37 = vld [vmem:[#allocation11 + $0x78c] ss:$16 sps:$4 sm:$0xff]  }
 0x4b9   :  { %2891 = vmatpush1.bf16.msra.mxu1 %v9278_v20  ;;  %3508 = vmatpush1.bf16.msra.mxu0 %v9281_v8  ;;  %v9356_v20 = vld [vmem:[#allocation11 + $0x580] ss:$16 sps:$4 sm:$0xff]   ;;  %v9359_v8 = vld [vmem:[#allocation11 + $0x788] ss:$16 sps:$4 sm:$0xff]  }
 0x4ba   :  { %3164 = vmatprep.subr.bf16.mxu1 %v9286_v30  ;;  %3781 = vmatprep.subr.bf16.mxu0 %v9289_v31  ;;  %v9364_v30 = vld [vmem:[#allocation11 + $0x5a4] ss:$16 sps:$4 sm:$0xff]   ;;  %v9367_v31 = vld [vmem:[#allocation11 + $0x7ac] ss:$16 sps:$4 sm:$0xff]  }
 0x4bc   :  { %2909 = vmatmul.mubr.bf16.vlgmr.msra.gmra.mrb[24].mxu1 %v10720_v63  ;;  %3526 = vmatmul.mubr.bf16.vlgmr.msra.gmra.mrb[32].mxu0 %v10736_v15  ;;  %v9304_v63 = vld [vmem:[#allocation11 + $0x464] ss:$16 sps:$4 sm:$0xff]  }
 0x4bd   :  { %3165 = vmatpush1.bf16.msra.mxu1 %v9284_v11  ;;  %3782 = vmatpush1.bf16.msra.mxu0 %v9287_v14  ;;  %v9362_v11 = vld [vmem:[#allocation11 + $0x5a0] ss:$16 sps:$4 sm:$0xff]   ;;  %v9365_v14 = vld [vmem:[#allocation11 + $0x7a8] ss:$16 sps:$4 sm:$0xff]  }
 0x4be   :  { %3166 = vmatprep.subr.bf16.mxu1 %v9292_v38  ;;  %3783 = vmatprep.subr.bf16.mxu0 %v9295_v16  ;;  %v9370_v38 = vld [vmem:[#allocation11 + $0x5c4] ss:$16 sps:$4 sm:$0xff]   ;;  %v9373_v16 = vld [vmem:[#allocation11 + $0x7cc] ss:$16 sps:$4 sm:$0xff]  }
 0x4bf   :  { %3196 = vmatprep.mubr.bf16.mxu1 %v10237_v58  ;;  %3813 = vmatprep.mubr.bf16.mxu0 %v10237_v58 }
 0x4c1   :  { %3167 = vmatpush1.bf16.msra.mxu1 %v9290_v9  ;;  %3784 = vmatpush1.bf16.msra.mxu0 %v9293_v18  ;;  %v9368_v9 = vld [vmem:[#allocation11 + $0x5c0] ss:$16 sps:$4 sm:$0xff]   ;;  %v9371_v18 = vld [vmem:[#allocation11 + $0x7c8] ss:$16 sps:$4 sm:$0xff]  }
 0x4c2   :  { %3168 = vmatprep.subr.bf16.mxu1 %v9298_v19  ;;  %3785 = vmatprep.subr.bf16.mxu0 %v9301_v21  ;;  %v9376_v19 = vld [vmem:[#allocation11 + $0x5e4] ss:$16 sps:$4 sm:$0xff]   ;;  %v9379_v21 = vld [vmem:[#allocation11 + $0x7ec] ss:$16 sps:$4 sm:$0xff]  }
 0x4c5   :  { %3169 = vmatpush1.bf16.msra.mxu1 %v9296_v42  ;;  %3786 = vmatpush1.bf16.msra.mxu0 %v9299_v22  ;;  %v9374_v42 = vld [vmem:[#allocation11 + $0x5e0] ss:$16 sps:$4 sm:$0xff]   ;;  %v9377_v22 = vld [vmem:[#allocation11 + $0x7e8] ss:$16 sps:$4 sm:$0xff]  }
 0x4c6   :  { %3170 = vmatprep.subr.bf16.mxu1 %v9304_v63  ;;  %3787 = vmatprep.subr.bf16.mxu0 %v9307_v26  ;;  %v9382_v63 = vld [vmem:[#allocation11 + $0x604] ss:$16 sps:$4 sm:$0xff]   ;;  %v9385_v26 = vld [vmem:[#allocation11 + $0x80c] ss:$16 sps:$4 sm:$0xff]  }
 0x4c9   :  { %3171 = vmatpush1.bf16.msra.mxu1 %v9302_v6  ;;  %3788 = vmatpush1.bf16.msra.mxu0 %v9305_v27  ;;  %v9380_v6 = vld [vmem:[#allocation11 + $0x600] ss:$16 sps:$4 sm:$0xff]   ;;  %v9383_v27 = vld [vmem:[#allocation11 + $0x808] ss:$16 sps:$4 sm:$0xff]  }
 0x4ca   :  { %3172 = vmatprep.subr.bf16.mxu1 %v9310_v12  ;;  %3789 = vmatprep.subr.bf16.mxu0 %v9313_v29  ;;  %v10752_v12 = vpack.c.b16 %v10643_v0, %v10643_v0  ;;  %v9388_v29 = vld [vmem:[#allocation11 + $0x624] ss:$16 sps:$4 sm:$0xff]   ;;  %v9392_v0 = vld [vmem:[#allocation11 + $0x640] ss:$16 sps:$4 sm:$0xff]  }
 0x4cd   :  { %3173 = vmatpush1.bf16.msra.mxu1 %v9308_v32  ;;  %3790 = vmatpush1.bf16.msra.mxu0 %v9311_v33  ;;  %v9391_v32 = vld [vmem:[#allocation11 + $0x82c] ss:$16 sps:$4 sm:$0xff]   ;;  %v9386_v33 = vld [vmem:[#allocation11 + $0x620] ss:$16 sps:$4 sm:$0xff]  }
 0x4ce   :  { %3174 = vmatprep.subr.bf16.mxu1 %v9316_v35  ;;  %3791 = vmatprep.subr.bf16.mxu0 %v9319_v39  ;;  %v9389_v35 = vld [vmem:[#allocation11 + $0x828] ss:$16 sps:$4 sm:$0xff]   ;;  %v9394_v39 = vld [vmem:[#allocation11 + $0x644] ss:$16 sps:$4 sm:$0xff]  }
 0x4d1   :  { %3175 = vmatpush1.bf16.msra.mxu1 %v9314_v43  ;;  %3792 = vmatpush1.bf16.msra.mxu0 %v9317_v45  ;;  %v9397_v43 = vld [vmem:[#allocation11 + $0x84c] ss:$16 sps:$4 sm:$0xff]   ;;  %v9395_v45 = vld [vmem:[#allocation11 + $0x848] ss:$16 sps:$4 sm:$0xff]  }
 0x4d2   :  { %3176 = vmatprep.subr.bf16.mxu1 %v9322_v48  ;;  %3793 = vmatprep.subr.bf16.mxu0 %v9325_v50  ;;  %v9403_v48 = vld [vmem:[#allocation11 + $0x86c] ss:$16 sps:$4 sm:$0xff]   ;;  %v9398_v50 = vld [vmem:[#allocation11 + $0x660] ss:$16 sps:$4 sm:$0xff]  }
 0x4d5   :  { %3177 = vmatpush1.bf16.msra.mxu1 %v9320_v51  ;;  %3794 = vmatpush1.bf16.msra.mxu0 %v9323_v52  ;;  %v9401_v51 = vld [vmem:[#allocation11 + $0x868] ss:$16 sps:$4 sm:$0xff]   ;;  %v9406_v52 = vld [vmem:[#allocation11 + $0x684] ss:$16 sps:$4 sm:$0xff]  }
 0x4d6   :  { %3178 = vmatprep.subr.bf16.mxu1 %v9328_v53  ;;  %3795 = vmatprep.subr.bf16.mxu0 %v9331_v25  ;;  %v9409_v53 = vld [vmem:[#allocation11 + $0x88c] ss:$16 sps:$4 sm:$0xff]   ;;  %v9404_v25 = vld [vmem:[#allocation11 + $0x680] ss:$16 sps:$4 sm:$0xff]  }
 0x4d9   :  { %3179 = vmatpush1.bf16.msra.mxu1 %v9326_v47  ;;  %3796 = vmatpush1.bf16.msra.mxu0 %v9329_v17  ;;  %v9407_v47 = vld [vmem:[#allocation11 + $0x888] ss:$16 sps:$4 sm:$0xff]   ;;  %v9412_v17 = vld [vmem:[#allocation11 + $0x6a4] ss:$16 sps:$4 sm:$0xff]  }
 0x4da   :  { %3452 = vmatprep.subr.bf16.mxu1 %v9334_v55  ;;  %4069 = vmatprep.subr.bf16.mxu0 %v9337_v57  ;;  %v9415_v55 = vld [vmem:[#allocation11 + $0x8ac] ss:$16 sps:$4 sm:$0xff]   ;;  %v9410_v57 = vld [vmem:[#allocation11 + $0x6a0] ss:$16 sps:$4 sm:$0xff]  }
 0x4dc   :  { %3197 = vmatmul.mubr.bf16.vlgmr.msra.gmra.mrb[28].mxu1 %v10728_v44  ;;  %3814 = vmatmul.mubr.bf16.vlgmr.msra.gmra.mrb[36].mxu0 %v10744_v28  ;;  %v9352_v44 = vld [vmem:[#allocation11 + $0x564] ss:$16 sps:$4 sm:$0xff]  }
 0x4dd   :  { %3453 = vmatpush1.bf16.msra.mxu1 %v9332_v54  ;;  %4070 = vmatpush1.bf16.msra.mxu0 %v9335_v49  ;;  %v9413_v54 = vld [vmem:[#allocation11 + $0x8a8] ss:$16 sps:$4 sm:$0xff]   ;;  %v9418_v49 = vld [vmem:[#allocation11 + $0x6c4] ss:$16 sps:$4 sm:$0xff]  }
 0x4de   :  { %3454 = vmatprep.subr.bf16.mxu1 %v9340_v24  ;;  %4071 = vmatprep.subr.bf16.mxu0 %v9343_v59  ;;  %v9421_v24 = vld [vmem:[#allocation11 + $0x8cc] ss:$16 sps:$4 sm:$0xff]  }
 0x4df   :  { %3484 = vmatprep.mubr.bf16.mxu1 %v10237_v58  ;;  %4101 = vmatprep.mubr.bf16.mxu0 %v10237_v58 }
 0x4e1   :  { %3455 = vmatpush1.bf16.msra.mxu1 %v9338_v56  ;;  %4072 = vmatpush1.bf16.msra.mxu0 %v9341_v62 }
 0x4e2   :  { %3456 = vmatprep.subr.bf16.mxu1 %v9346_v1  ;;  %4073 = vmatprep.subr.bf16.mxu0 %v9349_v2 }
 0x4e5   :  { %3457 = vmatpush1.bf16.msra.mxu1 %v9344_v61  ;;  %4074 = vmatpush1.bf16.msra.mxu0 %v9347_v3  ;;  %v9416_v3 = vld [vmem:[#allocation11 + $0x6c0] ss:$16 sps:$4 sm:$0xff]  }
 0x4e6   :  { %3458 = vmatprep.subr.bf16.mxu1 %v9352_v44  ;;  %4075 = vmatprep.subr.bf16.mxu0 %v9355_v4  ;;  %v9419_v44 = vld [vmem:[#allocation11 + $0x8c8] ss:$16 sps:$4 sm:$0xff]  }
 0x4e9   :  { %3459 = vmatpush1.bf16.msra.mxu1 %v9350_v7  ;;  %4076 = vmatpush1.bf16.msra.mxu0 %v9353_v41  ;;  %v9424_v41 = vld [vmem:[#allocation11 + $0x6e4] ss:$16 sps:$4 sm:$0xff]  }
 0x4ea   :  { %3460 = vmatprep.subr.bf16.mxu1 %v9358_v23  ;;  %4077 = vmatprep.subr.bf16.mxu0 %v9361_v37  ;;  %v9427_v23 = vld [vmem:[#allocation11 + $0x8ec] ss:$16 sps:$4 sm:$0xff]   ;;  %v9422_v37 = vld [vmem:[#allocation11 + $0x6e0] ss:$16 sps:$4 sm:$0xff]  }
 0x4ed   :  { %3461 = vmatpush1.bf16.msra.mxu1 %v9356_v20  ;;  %4078 = vmatpush1.bf16.msra.mxu0 %v9359_v8  ;;  %v9425_v20 = vld [vmem:[#allocation11 + $0x8e8] ss:$16 sps:$4 sm:$0xff]   ;;  %v9430_v8 = vld [vmem:[#allocation11 + $0x704] ss:$16 sps:$4 sm:$0xff]  }
 0x4ee   :  { %3462 = vmatprep.subr.bf16.mxu1 %v9364_v30  ;;  %4079 = vmatprep.subr.bf16.mxu0 %v9367_v31  ;;  %v9433_v30 = vld [vmem:[#allocation11 + $0x90c] ss:$16 sps:$4 sm:$0xff]   ;;  %v9428_v31 = vld [vmem:[#allocation11 + $0x700] ss:$16 sps:$4 sm:$0xff]  }
 0x4f1   :  { %3463 = vmatpush1.bf16.msra.mxu1 %v9362_v11  ;;  %4080 = vmatpush1.bf16.msra.mxu0 %v9365_v14  ;;  %v9431_v11 = vld [vmem:[#allocation11 + $0x908] ss:$16 sps:$4 sm:$0xff]   ;;  %v10768_v14 = vpack.c.b16 %v10649_v5, %v10649_v5  ;;  %v9440_v5 = vld [vmem:[#allocation11 + $0x740] ss:$16 sps:$4 sm:$0xff]  }
 0x4f2   :  { %3464 = vmatprep.subr.bf16.mxu1 %v9370_v38  ;;  %4081 = vmatprep.subr.bf16.mxu0 %v9373_v16  ;;  %v9436_v38 = vld [vmem:[#allocation11 + $0x724] ss:$16 sps:$4 sm:$0xff]   ;;  %v9439_v16 = vld [vmem:[#allocation11 + $0x92c] ss:$16 sps:$4 sm:$0xff]  }
 0x4f5   :  { %3465 = vmatpush1.bf16.msra.mxu1 %v9368_v9  ;;  %4082 = vmatpush1.bf16.msra.mxu0 %v9371_v18  ;;  %v9434_v9 = vld [vmem:[#allocation11 + $0x720] ss:$16 sps:$4 sm:$0xff]   ;;  %v9437_v18 = vld [vmem:[#allocation11 + $0x928] ss:$16 sps:$4 sm:$0xff]  }
 0x4f6   :  { %3466 = vmatprep.subr.bf16.mxu1 %v9376_v19  ;;  %4083 = vmatprep.subr.bf16.mxu0 %v9379_v21  ;;  %v9442_v19 = vld [vmem:[#allocation11 + $0x744] ss:$16 sps:$4 sm:$0xff]   ;;  %v9445_v21 = vld [vmem:[#allocation11 + $0x94c] ss:$16 sps:$4 sm:$0xff]  }
 0x4f9   :  { %3467 = vmatpush1.bf16.msra.mxu1 %v9374_v42  ;;  %4084 = vmatpush1.bf16.msra.mxu0 %v9377_v22  ;;  %v9443_v42 = vld [vmem:[#allocation11 + $0x948] ss:$16 sps:$4 sm:$0xff]   ;;  %v9451_v22 = vld [vmem:[#allocation11 + $0x96c] ss:$16 sps:$4 sm:$0xff]  }
 0x4fa   :  { %3740 = vmatprep.subr.bf16.mxu1 %v9382_v63  ;;  %4368 = vmatprep.subr.bf16.mxu0 %v9385_v26  ;;  %v9446_v63 = vld [vmem:[#allocation11 + $0x760] ss:$16 sps:$4 sm:$0xff]   ;;  %v9449_v26 = vld [vmem:[#allocation11 + $0x968] ss:$16 sps:$4 sm:$0xff]  }
 0x4fc   :  { %3485 = vmatmul.mubr.bf16.vlgmr.msra.gmra.mrb[32].mxu1 %v10736_v15  ;;  %4102 = vmatmul.mubr.bf16.vlgmr.msra.gmra.mrb[40].mxu0 %v10752_v12  ;;  %v9400_v15 = vld [vmem:[#allocation11 + $0x664] ss:$16 sps:$4 sm:$0xff]  }
 0x4fd   :  { %3741 = vmatpush1.bf16.msra.mxu1 %v9380_v6  ;;  %4369 = vmatpush1.bf16.msra.mxu0 %v9383_v27  ;;  %v9454_v6 = vld [vmem:[#allocation11 + $0x784] ss:$16 sps:$4 sm:$0xff]   ;;  %v9457_v27 = vld [vmem:[#allocation11 + $0x98c] ss:$16 sps:$4 sm:$0xff]  }
 0x4fe   :  { %3742 = vmatprep.subr.bf16.mxu1 %v9388_v29  ;;  %4370 = vmatprep.subr.bf16.mxu0 %v9391_v32  ;;  %v9452_v29 = vld [vmem:[#allocation11 + $0x780] ss:$16 sps:$4 sm:$0xff]   ;;  %v9455_v32 = vld [vmem:[#allocation11 + $0x988] ss:$16 sps:$4 sm:$0xff]  }
 0x4ff   :  { %3772 = vmatprep.mubr.bf16.mxu1 %v10237_v58  ;;  %4400 = vmatprep.mubr.bf16.mxu0 %v10237_v58 }
 0x501   :  { %3743 = vmatpush1.bf16.msra.mxu1 %v9386_v33  ;;  %4371 = vmatpush1.bf16.msra.mxu0 %v9389_v35  ;;  %v9460_v33 = vld [vmem:[#allocation11 + $0x7a4] ss:$16 sps:$4 sm:$0xff]   ;;  %v9463_v35 = vld [vmem:[#allocation11 + $0x9ac] ss:$16 sps:$4 sm:$0xff]  }
 0x502   :  { %3744 = vmatprep.subr.bf16.mxu1 %v9394_v39  ;;  %4372 = vmatprep.subr.bf16.mxu0 %v9397_v43  ;;  %v9458_v39 = vld [vmem:[#allocation11 + $0x7a0] ss:$16 sps:$4 sm:$0xff]   ;;  %v9461_v43 = vld [vmem:[#allocation11 + $0x9a8] ss:$16 sps:$4 sm:$0xff]  }
 0x505   :  { %3745 = vmatpush1.bf16.msra.mxu1 %v9392_v0  ;;  %4373 = vmatpush1.bf16.msra.mxu0 %v9395_v45  ;;  %v9466_v0 = vld [vmem:[#allocation11 + $0x7c4] ss:$16 sps:$4 sm:$0xff]   ;;  %v9469_v45 = vld [vmem:[#allocation11 + $0x9cc] ss:$16 sps:$4 sm:$0xff]  }
 0x506   :  { %3746 = vmatprep.subr.bf16.mxu1 %v9400_v15  ;;  %4374 = vmatprep.subr.bf16.mxu0 %v9403_v48 }
 0x509   :  { %3747 = vmatpush1.bf16.msra.mxu1 %v9398_v50  ;;  %4375 = vmatpush1.bf16.msra.mxu0 %v9401_v51 }
 0x50a   :  { %3748 = vmatprep.subr.bf16.mxu1 %v9406_v52  ;;  %4376 = vmatprep.subr.bf16.mxu0 %v9409_v53 }
 0x50d   :  { %3749 = vmatpush1.bf16.msra.mxu1 %v9404_v25  ;;  %4377 = vmatpush1.bf16.msra.mxu0 %v9407_v47 }
 0x50e   :  { %3750 = vmatprep.subr.bf16.mxu1 %v9412_v17  ;;  %4378 = vmatprep.subr.bf16.mxu0 %v9415_v55  ;;  %v9464_v17 = vld [vmem:[#allocation11 + $0x7c0] ss:$16 sps:$4 sm:$0xff]   ;;  %v9467_v55 = vld [vmem:[#allocation11 + $0x9c8] ss:$16 sps:$4 sm:$0xff]  }
 0x50f   :  { %v10758_v59 = vpop.f32.mrb[8].mxu1  ;;  %v10760_v56 = vpop.f32.mrb[16].mxu0 }
 0x510   :  { %v10762_v62 = vpop.f32.mrb[9].mxu1  ;;  %v10764_v1 = vpop.f32.mrb[17].mxu0 }
 0x511   :  { %3751 = vmatpush1.bf16.msra.mxu1 %v9410_v57  ;;  %4379 = vmatpush1.bf16.msra.mxu0 %v9413_v54  ;;  %v2094_v2 = vpop.f32.mrb[10].mxu1  ;;  %v2385_v61 = vpop.f32.mrb[18].mxu0 }
 0x512   :  { %v2095_v4 = vpop.f32.mrb[11].mxu1  ;;  %v2386_v7 = vpop.f32.mrb[19].mxu0  ;;  %3752 = vmatprep.subr.bf16.mxu1 %v9418_v49  ;;  %4380 = vmatprep.subr.bf16.mxu0 %v9421_v24  ;;  %v9472_v24 = vld [vmem:[#allocation11 + $0x7e4] ss:$16 sps:$4 sm:$0xff]   ;;  %v9475_v2 = vld [vmem:[#allocation11 + $0x9ec] ss:$16 sps:$4 sm:$0xff]  }
 0x513   :  { %v9476_v4 = vld [vmem:[#allocation11 + $0x800] ss:$16 sps:$4 sm:$0xff]   ;;  %v9479_v7 = vld [vmem:[#allocation11 + $0xa08] ss:$16 sps:$4 sm:$0xff]  }
 0x515   :  { %3753 = vmatpush1.bf16.msra.mxu1 %v9416_v3  ;;  %4381 = vmatpush1.bf16.msra.mxu0 %v9419_v44  ;;  %v9478_v3 = vld [vmem:[#allocation11 + $0x804] ss:$16 sps:$4 sm:$0xff]   ;;  %v9481_v44 = vld [vmem:[#allocation11 + $0xa0c] ss:$16 sps:$4 sm:$0xff]  }
 0x516   :  { %3754 = vmatprep.subr.bf16.mxu1 %v9424_v41  ;;  %4382 = vmatprep.subr.bf16.mxu0 %v9427_v23  ;;  %v10782_v41 = vpack.c.b16 %v10656_v13, %v10656_v13  ;;  %v9484_v23 = vld [vmem:[#allocation11 + $0x824] ss:$16 sps:$4 sm:$0xff]   ;;  %v9488_v13 = vld [vmem:[#allocation11 + $0x840] ss:$16 sps:$4 sm:$0xff]  }
 0x519   :  { %3755 = vmatpush1.bf16.msra.mxu1 %v9422_v37  ;;  %4383 = vmatpush1.bf16.msra.mxu0 %v9425_v20  ;;  %v9487_v37 = vld [vmem:[#allocation11 + $0xa2c] ss:$16 sps:$4 sm:$0xff]   ;;  %v9482_v20 = vld [vmem:[#allocation11 + $0x820] ss:$16 sps:$4 sm:$0xff]  }
 0x51a   :  { %4028 = vmatprep.subr.bf16.mxu1 %v9430_v8  ;;  %4655 = vmatprep.subr.bf16.mxu0 %v9433_v30  ;;  %v9485_v8 = vld [vmem:[#allocation11 + $0xa28] ss:$16 sps:$4 sm:$0xff]   ;;  %v9490_v30 = vld [vmem:[#allocation11 + $0x844] ss:$16 sps:$4 sm:$0xff]  }
 0x51c   :  { %3773 = vmatmul.mubr.bf16.vlgmr.msra.gmra.mrb[36].mxu1 %v10744_v28  ;;  %4401 = vmatmul.mubr.bf16.vlgmr.msra.gmra.mrb[44].mxu0 %v10768_v14  ;;  %v9448_v28 = vld [vmem:[#allocation11 + $0x764] ss:$16 sps:$4 sm:$0xff]  }
 0x51d   :  { %4029 = vmatpush1.bf16.msra.mxu1 %v9428_v31  ;;  %4656 = vmatpush1.bf16.msra.mxu0 %v9431_v11  ;;  %v9493_v31 = vld [vmem:[#allocation11 + $0xa4c] ss:$16 sps:$4 sm:$0xff]   ;;  %v9491_v11 = vld [vmem:[#allocation11 + $0xa48] ss:$16 sps:$4 sm:$0xff]  }
 0x51e   :  { %4030 = vmatprep.subr.bf16.mxu1 %v9436_v38  ;;  %4657 = vmatprep.subr.bf16.mxu0 %v9439_v16  ;;  %v9499_v38 = vld [vmem:[#allocation11 + $0xa6c] ss:$16 sps:$4 sm:$0xff]   ;;  %v9494_v16 = vld [vmem:[#allocation11 + $0x860] ss:$16 sps:$4 sm:$0xff]  }
 0x51f   :  { %4060 = vmatprep.mubr.bf16.mxu1 %v10237_v58  ;;  %4687 = vmatprep.mubr.bf16.mxu0 %v10237_v58 }
 0x521   :  { %4031 = vmatpush1.bf16.msra.mxu1 %v9434_v9  ;;  %4658 = vmatpush1.bf16.msra.mxu0 %v9437_v18  ;;  %v9497_v9 = vld [vmem:[#allocation11 + $0xa68] ss:$16 sps:$4 sm:$0xff]   ;;  %v9502_v18 = vld [vmem:[#allocation11 + $0x884] ss:$16 sps:$4 sm:$0xff]  }
 0x522   :  { %4032 = vmatprep.subr.bf16.mxu1 %v9442_v19  ;;  %4659 = vmatprep.subr.bf16.mxu0 %v9445_v21  ;;  %v9505_v19 = vld [vmem:[#allocation11 + $0xa8c] ss:$16 sps:$4 sm:$0xff]   ;;  %v9500_v21 = vld [vmem:[#allocation11 + $0x880] ss:$16 sps:$4 sm:$0xff]  }
 0x525   :  { %4033 = vmatpush1.bf16.msra.mxu1 %v9440_v5  ;;  %4660 = vmatpush1.bf16.msra.mxu0 %v9443_v42  ;;  %v9503_v5 = vld [vmem:[#allocation11 + $0xa88] ss:$16 sps:$4 sm:$0xff]   ;;  %v9508_v42 = vld [vmem:[#allocation11 + $0x8a4] ss:$16 sps:$4 sm:$0xff]  }
 0x526   :  { %4034 = vmatprep.subr.bf16.mxu1 %v9448_v28  ;;  %4661 = vmatprep.subr.bf16.mxu0 %v9451_v22  ;;  %v9511_v28 = vld [vmem:[#allocation11 + $0xaac] ss:$16 sps:$4 sm:$0xff]   ;;  %v9506_v22 = vld [vmem:[#allocation11 + $0x8a0] ss:$16 sps:$4 sm:$0xff]  }
 0x529   :  { %4035 = vmatpush1.bf16.msra.mxu1 %v9446_v63  ;;  %4662 = vmatpush1.bf16.msra.mxu0 %v9449_v26  ;;  %v9509_v63 = vld [vmem:[#allocation11 + $0xaa8] ss:$16 sps:$4 sm:$0xff]   ;;  %v9514_v26 = vld [vmem:[#allocation11 + $0x8c4] ss:$16 sps:$4 sm:$0xff]  }
 0x52a   :  { %4036 = vmatprep.subr.bf16.mxu1 %v9454_v6  ;;  %4663 = vmatprep.subr.bf16.mxu0 %v9457_v27  ;;  %v9517_v6 = vld [vmem:[#allocation11 + $0xacc] ss:$16 sps:$4 sm:$0xff]  }
 0x52d   :  { %4037 = vmatpush1.bf16.msra.mxu1 %v9452_v29  ;;  %4664 = vmatpush1.bf16.msra.mxu0 %v9455_v32 }
 0x52e   :  { %4038 = vmatprep.subr.bf16.mxu1 %v9460_v33  ;;  %4665 = vmatprep.subr.bf16.mxu0 %v9463_v35 }
 0x52f   :  { %v2131_v15 = vpop.f32.mrb[12].mxu1  ;;  %v2664_v48 = vpop.f32.mrb[20].mxu0 }
 0x530   :  { %v2382_v50 = vadd.f32 %v10760_v56, %v2131_v15  ;;  %v2133_v51 = vpop.f32.mrb[13].mxu1  ;;  %v2666_v52 = vpop.f32.mrb[21].mxu0  ;;  %v9470_v56 = vld [vmem:[#allocation11 + $0x7e0] ss:$16 sps:$4 sm:$0xff]  }
 0x531   :  { %v2384_v53 = vadd.f32 %v10764_v1, %v2133_v51  ;;  %v2135_v25 = vpop.f32.mrb[14].mxu1  ;;  %v2668_v47 = vpop.f32.mrb[22].mxu0  ;;  %4039 = vmatpush1.bf16.msra.mxu1 %v9458_v39  ;;  %4666 = vmatpush1.bf16.msra.mxu0 %v9461_v43  ;;  %v9473_v1 = vld [vmem:[#allocation11 + $0x9e8] ss:$16 sps:$4 sm:$0xff]  }
 0x532   :  { %v10776_v57 = vadd.f32 %v2664_v48, %v2382_v50  ;;  %v2136_v54 = vpop.f32.mrb[15].mxu1  ;;  %v2669_v49 = vpop.f32.mrb[23].mxu0  ;;  %4040 = vmatprep.subr.bf16.mxu1 %v9466_v0  ;;  %4667 = vmatprep.subr.bf16.mxu0 %v9469_v45  ;;  %v9512_v48 = vld [vmem:[#allocation11 + $0x8c0] ss:$16 sps:$4 sm:$0xff]   ;;  %v9515_v50 = vld [vmem:[#allocation11 + $0xac8] ss:$16 sps:$4 sm:$0xff]  }
 0x533   :  { %v10778_v61 = vadd.f32 %v2666_v52, %v2384_v53  ;;  %v9520_v52 = vld [vmem:[#allocation11 + $0x8e4] ss:$16 sps:$4 sm:$0xff]   ;;  %v9523_v53 = vld [vmem:[#allocation11 + $0xaec] ss:$16 sps:$4 sm:$0xff]   ;;  %v9518_v25 = vld [vmem:[#allocation11 + $0x8e0] ss:$16 sps:$4 sm:$0xff]   ;;  %v10802_v54 = vpack.c.b16 %v10670_v34, %v10670_v34 }
 0x534   :  { %v9526_v47 = vld [vmem:[#allocation11 + $0x904] ss:$16 sps:$4 sm:$0xff]   ;;  %v9536_v34 = vld [vmem:[#allocation11 + $0x940] ss:$16 sps:$4 sm:$0xff]  }
 0x535   :  { %4041 = vmatpush1.bf16.msra.mxu1 %v9464_v17  ;;  %4668 = vmatpush1.bf16.msra.mxu0 %v9467_v55  ;;  %v9529_v17 = vld [vmem:[#allocation11 + $0xb0c] ss:$16 sps:$4 sm:$0xff]   ;;  %v9524_v55 = vld [vmem:[#allocation11 + $0x900] ss:$16 sps:$4 sm:$0xff]   ;;  %v9532_v49 = vld [vmem:[#allocation11 + $0x924] ss:$16 sps:$4 sm:$0xff]  }
 0x536   :  { %4042 = vmatprep.subr.bf16.mxu1 %v9472_v24  ;;  %4669 = vmatprep.subr.bf16.mxu0 %v9475_v2  ;;  %v9535_v24 = vld [vmem:[#allocation11 + $0xb2c] ss:$16 sps:$4 sm:$0xff]   ;;  %v9530_v2 = vld [vmem:[#allocation11 + $0x920] ss:$16 sps:$4 sm:$0xff]  }
 0x539   :  { %4043 = vmatpush1.bf16.msra.mxu1 %v9470_v56  ;;  %4670 = vmatpush1.bf16.msra.mxu0 %v9473_v1  ;;  %v9538_v56 = vld [vmem:[#allocation11 + $0x944] ss:$16 sps:$4 sm:$0xff]   ;;  %v9541_v1 = vld [vmem:[#allocation11 + $0xb4c] ss:$16 sps:$4 sm:$0xff]  }
 0x53a   :  { %4327 = vmatprep.subr.bf16.mxu1 %v9478_v3  ;;  %4942 = vmatprep.subr.bf16.mxu0 %v9481_v44  ;;  %v9539_v3 = vld [vmem:[#allocation11 + $0xb48] ss:$16 sps:$4 sm:$0xff]   ;;  %v9547_v44 = vld [vmem:[#allocation11 + $0xb6c] ss:$16 sps:$4 sm:$0xff]  }
 0x53c   :  { %4061 = vmatmul.mubr.bf16.vlgmr.msra.gmra.mrb[40].mxu1 %v10752_v12  ;;  %4688 = vmatmul.mubr.bf16.vlgmr.msra.gmra.mrb[48].mxu0 %v10782_v41  ;;  %v9496_v12 = vld [vmem:[#allocation11 + $0x864] ss:$16 sps:$4 sm:$0xff]  }
 0x53d   :  { %4328 = vmatpush1.bf16.msra.mxu1 %v9476_v4  ;;  %4943 = vmatpush1.bf16.msra.mxu0 %v9479_v7  ;;  %v9542_v4 = vld [vmem:[#allocation11 + $0x960] ss:$16 sps:$4 sm:$0xff]   ;;  %v9545_v7 = vld [vmem:[#allocation11 + $0xb68] ss:$16 sps:$4 sm:$0xff]  }
 0x53e   :  { %4329 = vmatprep.subr.bf16.mxu1 %v9484_v23  ;;  %4944 = vmatprep.subr.bf16.mxu0 %v9487_v37  ;;  %v9550_v23 = vld [vmem:[#allocation11 + $0x984] ss:$16 sps:$4 sm:$0xff]   ;;  %v9553_v37 = vld [vmem:[#allocation11 + $0xb8c] ss:$16 sps:$4 sm:$0xff]  }
 0x53f   :  { %4359 = vmatprep.mubr.bf16.mxu1 %v10237_v58  ;;  %4974 = vmatprep.mubr.bf16.mxu0 %v10237_v58 }
 0x541   :  { %4330 = vmatpush1.bf16.msra.mxu1 %v9482_v20  ;;  %4945 = vmatpush1.bf16.msra.mxu0 %v9485_v8  ;;  %v9548_v20 = vld [vmem:[#allocation11 + $0x980] ss:$16 sps:$4 sm:$0xff]   ;;  %v9551_v8 = vld [vmem:[#allocation11 + $0xb88] ss:$16 sps:$4 sm:$0xff]  }
 0x542   :  { %4331 = vmatprep.subr.bf16.mxu1 %v9490_v30  ;;  %4946 = vmatprep.subr.bf16.mxu0 %v9493_v31  ;;  %v9556_v30 = vld [vmem:[#allocation11 + $0x9a4] ss:$16 sps:$4 sm:$0xff]   ;;  %v9559_v31 = vld [vmem:[#allocation11 + $0xbac] ss:$16 sps:$4 sm:$0xff]  }
 0x545   :  { %4332 = vmatpush1.bf16.msra.mxu1 %v9488_v13  ;;  %4947 = vmatpush1.bf16.msra.mxu0 %v9491_v11  ;;  %v9554_v13 = vld [vmem:[#allocation11 + $0x9a0] ss:$16 sps:$4 sm:$0xff]   ;;  %v9557_v11 = vld [vmem:[#allocation11 + $0xba8] ss:$16 sps:$4 sm:$0xff]  }
 0x546   :  { %4333 = vmatprep.subr.bf16.mxu1 %v9496_v12  ;;  %4948 = vmatprep.subr.bf16.mxu0 %v9499_v38  ;;  %v9562_v12 = vld [vmem:[#allocation11 + $0x9c4] ss:$16 sps:$4 sm:$0xff]   ;;  %v9565_v38 = vld [vmem:[#allocation11 + $0xbcc] ss:$16 sps:$4 sm:$0xff]  }
 0x549   :  { %4334 = vmatpush1.bf16.msra.mxu1 %v9494_v16  ;;  %4949 = vmatpush1.bf16.msra.mxu0 %v9497_v9 }
 0x54a   :  { %4335 = vmatprep.subr.bf16.mxu1 %v9502_v18  ;;  %4950 = vmatprep.subr.bf16.mxu0 %v9505_v19 }
 0x54d   :  { %4336 = vmatpush1.bf16.msra.mxu1 %v9500_v21  ;;  %4951 = vmatpush1.bf16.msra.mxu0 %v9503_v5 }
 0x54e   :  { %4337 = vmatprep.subr.bf16.mxu1 %v9508_v42  ;;  %4952 = vmatprep.subr.bf16.mxu0 %v9511_v28 }
 0x54f   :  { %v2340_v27 = vpop.f32.mrb[16].mxu1  ;;  %v2951_v29 = vpop.f32.mrb[24].mxu0 }
 0x550   :  { %v10789_v32 = vadd.f32 %v2340_v27, %v10758_v59  ;;  %v10792_v33 = vadd.f32 %v2951_v29, %v10776_v57  ;;  %v2342_v35 = vpop.f32.mrb[17].mxu1  ;;  %v2953_v39 = vpop.f32.mrb[25].mxu0  ;;  %v9527_v57 = vld [vmem:[#allocation11 + $0xb08] ss:$16 sps:$4 sm:$0xff]  }
 0x551   :  { %v10795_v43 = vadd.f32 %v2342_v35, %v10762_v62  ;;  %v10798_v0 = vadd.f32 %v2953_v39, %v10778_v61  ;;  %v2344_v45 = vpop.f32.mrb[18].mxu1  ;;  %v2955_v15 = vpop.f32.mrb[26].mxu0  ;;  %4338 = vmatpush1.bf16.msra.mxu1 %v9506_v22  ;;  %4953 = vmatpush1.bf16.msra.mxu0 %v9509_v63  ;;  %v9521_v62 = vld [vmem:[#allocation11 + $0xae8] ss:$16 sps:$4 sm:$0xff]   ;;  %v9566_v35 = vld [vmem:[#allocation11 + $0x9e0] ss:$16 sps:$4 sm:$0xff]  }
 0x552   :  { %v2345_v51 = vpop.f32.mrb[19].mxu1  ;;  %v2956_v59 = vpop.f32.mrb[27].mxu0  ;;  %4339 = vmatprep.subr.bf16.mxu1 %v9514_v26  ;;  %4954 = vmatprep.subr.bf16.mxu0 %v9517_v6  ;;  %v9533_v61 = vld [vmem:[#allocation11 + $0xb28] ss:$16 sps:$4 sm:$0xff]   ;;  %v9560_v26 = vld [vmem:[#allocation11 + $0x9c0] ss:$16 sps:$4 sm:$0xff]  }
 0x553   :  { %v9563_v6 = vld [vmem:[#allocation11 + $0xbc8] ss:$16 sps:$4 sm:$0xff]   ;;  %v9572_v45 = vld [vmem:[#allocation11 + $0xa00] ss:$16 sps:$4 sm:$0xff]   ;;  %v9583_v51 = vld [vmem:[#allocation11 + $0xc2c] ss:$16 sps:$4 sm:$0xff]  }
 0x554   :  { %v9569_v39 = vld [vmem:[#allocation11 + $0xbe8] ss:$16 sps:$4 sm:$0xff]   ;;  %v9578_v59 = vld [vmem:[#allocation11 + $0xa20] ss:$16 sps:$4 sm:$0xff]  }
 0x555   :  { %4340 = vmatpush1.bf16.msra.mxu1 %v9512_v48  ;;  %4955 = vmatpush1.bf16.msra.mxu0 %v9515_v50  ;;  %v9575_v15 = vld [vmem:[#allocation11 + $0xc08] ss:$16 sps:$4 sm:$0xff]   ;;  %v10822_v48 = vpack.c.b16 %v10676_v40, %v10676_v40  ;;  %v9580_v50 = vld [vmem:[#allocation11 + $0xa24] ss:$16 sps:$4 sm:$0xff]   ;;  %v9584_v40 = vld [vmem:[#allocation11 + $0xa40] ss:$16 sps:$4 sm:$0xff]  }
 0x556   :  { %4341 = vmatprep.subr.bf16.mxu1 %v9520_v52  ;;  %4956 = vmatprep.subr.bf16.mxu0 %v9523_v53  ;;  %v9581_v52 = vld [vmem:[#allocation11 + $0xc28] ss:$16 sps:$4 sm:$0xff]   ;;  %v9586_v53 = vld [vmem:[#allocation11 + $0xa44] ss:$16 sps:$4 sm:$0xff]  }
 0x559   :  { %4342 = vmatpush1.bf16.msra.mxu1 %v9518_v25  ;;  %4957 = vmatpush1.bf16.msra.mxu0 %v9521_v62  ;;  %v9589_v25 = vld [vmem:[#allocation11 + $0xc4c] ss:$16 sps:$4 sm:$0xff]   ;;  %v9587_v62 = vld [vmem:[#allocation11 + $0xc48] ss:$16 sps:$4 sm:$0xff]  }
 0x55a   :  { %4614 = vmatprep.subr.bf16.mxu1 %v9526_v47  ;;  %5229 = vmatprep.subr.bf16.mxu0 %v9529_v17  ;;  %v9595_v47 = vld [vmem:[#allocation11 + $0xc6c] ss:$16 sps:$4 sm:$0xff]   ;;  %v9590_v17 = vld [vmem:[#allocation11 + $0xa60] ss:$16 sps:$4 sm:$0xff]  }
 0x55c   :  { %4360 = vmatmul.mubr.bf16.vlgmr.msra.gmra.mrb[44].mxu1 %v10768_v14  ;;  %4975 = vmatmul.mubr.bf16.vlgmr.msra.gmra.mrb[52].mxu0 %v10802_v54  ;;  %v9544_v14 = vld [vmem:[#allocation11 + $0x964] ss:$16 sps:$4 sm:$0xff]  }
 0x55d   :  { %4615 = vmatpush1.bf16.msra.mxu1 %v9524_v55  ;;  %5230 = vmatpush1.bf16.msra.mxu0 %v9527_v57  ;;  %v9593_v55 = vld [vmem:[#allocation11 + $0xc68] ss:$16 sps:$4 sm:$0xff]   ;;  %v9598_v57 = vld [vmem:[#allocation11 + $0xa84] ss:$16 sps:$4 sm:$0xff]  }
 0x55e   :  { %4616 = vmatprep.subr.bf16.mxu1 %v9532_v49  ;;  %5231 = vmatprep.subr.bf16.mxu0 %v9535_v24  ;;  %v9601_v49 = vld [vmem:[#allocation11 + $0xc8c] ss:$16 sps:$4 sm:$0xff]   ;;  %v9596_v24 = vld [vmem:[#allocation11 + $0xa80] ss:$16 sps:$4 sm:$0xff]  }
 0x55f   :  { %4646 = vmatprep.mubr.bf16.mxu1 %v10237_v58  ;;  %5261 = vmatprep.mubr.bf16.mxu0 %v10237_v58 }
 0x561   :  { %4617 = vmatpush1.bf16.msra.mxu1 %v9530_v2  ;;  %5232 = vmatpush1.bf16.msra.mxu0 %v9533_v61  ;;  %v9599_v2 = vld [vmem:[#allocation11 + $0xc88] ss:$16 sps:$4 sm:$0xff]   ;;  %v9604_v61 = vld [vmem:[#allocation11 + $0xaa4] ss:$16 sps:$4 sm:$0xff]  }
 0x562   :  { %4618 = vmatprep.subr.bf16.mxu1 %v9538_v56  ;;  %5233 = vmatprep.subr.bf16.mxu0 %v9541_v1  ;;  %v9607_v56 = vld [vmem:[#allocation11 + $0xcac] ss:$16 sps:$4 sm:$0xff]   ;;  %v9602_v1 = vld [vmem:[#allocation11 + $0xaa0] ss:$16 sps:$4 sm:$0xff]  }
 0x565   :  { %4619 = vmatpush1.bf16.msra.mxu1 %v9536_v34  ;;  %5234 = vmatpush1.bf16.msra.mxu0 %v9539_v3  ;;  %v9605_v34 = vld [vmem:[#allocation11 + $0xca8] ss:$16 sps:$4 sm:$0xff]   ;;  %v9610_v3 = vld [vmem:[#allocation11 + $0xac4] ss:$16 sps:$4 sm:$0xff]  }
 0x566   :  { %4620 = vmatprep.subr.bf16.mxu1 %v9544_v14  ;;  %5235 = vmatprep.subr.bf16.mxu0 %v9547_v44  ;;  %v9613_v14 = vld [vmem:[#allocation11 + $0xccc] ss:$16 sps:$4 sm:$0xff]  }
 0x569   :  { %4621 = vmatpush1.bf16.msra.mxu1 %v9542_v4  ;;  %5236 = vmatpush1.bf16.msra.mxu0 %v9545_v7 }
 0x56a   :  { %4622 = vmatprep.subr.bf16.mxu1 %v9550_v23  ;;  %5237 = vmatprep.subr.bf16.mxu0 %v9553_v37 }
 0x56d   :  { %4623 = vmatpush1.bf16.msra.mxu1 %v9548_v20  ;;  %5238 = vmatpush1.bf16.msra.mxu0 %v9551_v8 }
 0x56e   :  { %4624 = vmatprep.subr.bf16.mxu1 %v9556_v30  ;;  %5239 = vmatprep.subr.bf16.mxu0 %v9559_v31 }
 0x56f   :  { %v2623_v16 = vpop.f32.mrb[20].mxu1  ;;  %v3239_v9 = vpop.f32.mrb[28].mxu0 }
 0x570   :  { %v10809_v18 = vadd.f32 %v2623_v16, %v10789_v32  ;;  %v10812_v19 = vadd.f32 %v3239_v9, %v10792_v33  ;;  %v2625_v21 = vpop.f32.mrb[21].mxu1  ;;  %v3241_v5 = vpop.f32.mrb[29].mxu0  ;;  %v9568_v32 = vld [vmem:[#allocation11 + $0x9e4] ss:$16 sps:$4 sm:$0xff]   ;;  %v9571_v33 = vld [vmem:[#allocation11 + $0xbec] ss:$16 sps:$4 sm:$0xff]  }
 0x571   :  { %v10815_v42 = vadd.f32 %v2625_v21, %v10795_v43  ;;  %v10818_v28 = vadd.f32 %v3241_v5, %v10798_v0  ;;  %v2627_v22 = vpop.f32.mrb[22].mxu1  ;;  %v3243_v63 = vpop.f32.mrb[30].mxu0  ;;  %4625 = vmatpush1.bf16.msra.mxu1 %v9554_v13  ;;  %5240 = vmatpush1.bf16.msra.mxu0 %v9557_v11  ;;  %v9574_v43 = vld [vmem:[#allocation11 + $0xa04] ss:$16 sps:$4 sm:$0xff]   ;;  %v9577_v0 = vld [vmem:[#allocation11 + $0xc0c] ss:$16 sps:$4 sm:$0xff]  }
 0x572   :  { %v2628_v27 = vpop.f32.mrb[23].mxu1  ;;  %v3244_v29 = vpop.f32.mrb[31].mxu0  ;;  %4626 = vmatprep.subr.bf16.mxu1 %v9562_v12  ;;  %5241 = vmatprep.subr.bf16.mxu0 %v9565_v38  ;;  %v9608_v11 = vld [vmem:[#allocation11 + $0xac0] ss:$16 sps:$4 sm:$0xff]   ;;  %v9611_v12 = vld [vmem:[#allocation11 + $0xcc8] ss:$16 sps:$4 sm:$0xff]   ;;  %v10842_v63 = vpack.c.b16 %v10685_v46, %v10685_v46 }
 0x573   :  { %v9616_v9 = vld [vmem:[#allocation11 + $0xae4] ss:$16 sps:$4 sm:$0xff]   ;;  %v9617_v21 = vld [vmem:[#allocation11 + $0xce8] ss:$16 sps:$4 sm:$0xff]   ;;  %v9626_v27 = vld [vmem:[#allocation11 + $0xb20] ss:$16 sps:$4 sm:$0xff]  }
 0x574   :  { %v9622_v5 = vld [vmem:[#allocation11 + $0xb04] ss:$16 sps:$4 sm:$0xff]   ;;  %v9623_v22 = vld [vmem:[#allocation11 + $0xd08] ss:$16 sps:$4 sm:$0xff]   ;;  %v9632_v46 = vld [vmem:[#allocation11 + $0xb40] ss:$16 sps:$4 sm:$0xff]  }
 0x575   :  { %4627 = vmatpush1.bf16.msra.mxu1 %v9560_v26  ;;  %5242 = vmatpush1.bf16.msra.mxu0 %v9563_v6  ;;  %v9628_v26 = vld [vmem:[#allocation11 + $0xb24] ss:$16 sps:$4 sm:$0xff]   ;;  %v9631_v6 = vld [vmem:[#allocation11 + $0xd2c] ss:$16 sps:$4 sm:$0xff]   ;;  %v9629_v29 = vld [vmem:[#allocation11 + $0xd28] ss:$16 sps:$4 sm:$0xff]  }
 0x576   :  { %4628 = vmatprep.subr.bf16.mxu1 %v9568_v32  ;;  %5243 = vmatprep.subr.bf16.mxu0 %v9571_v33  ;;  %v9634_v32 = vld [vmem:[#allocation11 + $0xb44] ss:$16 sps:$4 sm:$0xff]   ;;  %v9637_v33 = vld [vmem:[#allocation11 + $0xd4c] ss:$16 sps:$4 sm:$0xff]  }
 0x579   :  { %4629 = vmatpush1.bf16.msra.mxu1 %v9566_v35  ;;  %5244 = vmatpush1.bf16.msra.mxu0 %v9569_v39  ;;  %v9635_v35 = vld [vmem:[#allocation11 + $0xd48] ss:$16 sps:$4 sm:$0xff]   ;;  %v9643_v39 = vld [vmem:[#allocation11 + $0xd6c] ss:$16 sps:$4 sm:$0xff]  }
 0x57a   :  { %4901 = vmatprep.subr.bf16.mxu1 %v9574_v43  ;;  %5517 = vmatprep.subr.bf16.mxu0 %v9577_v0  ;;  %v9638_v43 = vld [vmem:[#allocation11 + $0xb60] ss:$16 sps:$4 sm:$0xff]   ;;  %v9641_v0 = vld [vmem:[#allocation11 + $0xd68] ss:$16 sps:$4 sm:$0xff]  }
 0x57c   :  { %4647 = vmatmul.mubr.bf16.vlgmr.msra.gmra.mrb[48].mxu1 %v10782_v41  ;;  %5262 = vmatmul.mubr.bf16.vlgmr.msra.gmra.mrb[56].mxu0 %v10822_v48  ;;  %v9592_v41 = vld [vmem:[#allocation11 + $0xa64] ss:$16 sps:$4 sm:$0xff]  }
 0x57d   :  { %4902 = vmatpush1.bf16.msra.mxu1 %v9572_v45  ;;  %5518 = vmatpush1.bf16.msra.mxu0 %v9575_v15  ;;  %v9646_v45 = vld [vmem:[#allocation11 + $0xb84] ss:$16 sps:$4 sm:$0xff]   ;;  %v9649_v15 = vld [vmem:[#allocation11 + $0xd8c] ss:$16 sps:$4 sm:$0xff]  }
 0x57e   :  { %4903 = vmatprep.subr.bf16.mxu1 %v9580_v50  ;;  %5519 = vmatprep.subr.bf16.mxu0 %v9583_v51  ;;  %v9644_v50 = vld [vmem:[#allocation11 + $0xb80] ss:$16 sps:$4 sm:$0xff]   ;;  %v9647_v51 = vld [vmem:[#allocation11 + $0xd88] ss:$16 sps:$4 sm:$0xff]  }
 0x57f   :  { %4933 = vmatprep.mubr.bf16.mxu1 %v10237_v58  ;;  %5549 = vmatprep.mubr.bf16.mxu0 %v10237_v58 }
 0x581   :  { %4904 = vmatpush1.bf16.msra.mxu1 %v9578_v59  ;;  %5520 = vmatpush1.bf16.msra.mxu0 %v9581_v52  ;;  %v9652_v59 = vld [vmem:[#allocation11 + $0xba4] ss:$16 sps:$4 sm:$0xff]   ;;  %v9655_v52 = vld [vmem:[#allocation11 + $0xdac] ss:$16 sps:$4 sm:$0xff]  }
 0x582   :  { %4905 = vmatprep.subr.bf16.mxu1 %v9586_v53  ;;  %5521 = vmatprep.subr.bf16.mxu0 %v9589_v25  ;;  %v9650_v53 = vld [vmem:[#allocation11 + $0xba0] ss:$16 sps:$4 sm:$0xff]   ;;  %v9653_v25 = vld [vmem:[#allocation11 + $0xda8] ss:$16 sps:$4 sm:$0xff]  }
 0x585   :  { %4906 = vmatpush1.bf16.msra.mxu1 %v9584_v40  ;;  %5522 = vmatpush1.bf16.msra.mxu0 %v9587_v62  ;;  %v9658_v40 = vld [vmem:[#allocation11 + $0xbc4] ss:$16 sps:$4 sm:$0xff]   ;;  %v9661_v62 = vld [vmem:[#allocation11 + $0xdcc] ss:$16 sps:$4 sm:$0xff]  }
 0x586   :  { %4907 = vmatprep.subr.bf16.mxu1 %v9592_v41  ;;  %5523 = vmatprep.subr.bf16.mxu0 %v9595_v47 }
 0x589   :  { %4908 = vmatpush1.bf16.msra.mxu1 %v9590_v17  ;;  %5524 = vmatpush1.bf16.msra.mxu0 %v9593_v55 }
 0x58a   :  { %4909 = vmatprep.subr.bf16.mxu1 %v9598_v57  ;;  %5525 = vmatprep.subr.bf16.mxu0 %v9601_v49 }
 0x58d   :  { %4910 = vmatpush1.bf16.msra.mxu1 %v9596_v24  ;;  %5526 = vmatpush1.bf16.msra.mxu0 %v9599_v2 }
 0x58e   :  { %4911 = vmatprep.subr.bf16.mxu1 %v9604_v61  ;;  %5527 = vmatprep.subr.bf16.mxu0 %v9607_v56 }
 0x58f   :  { %v2910_v44 = vpop.f32.mrb[24].mxu1  ;;  %v3527_v4 = vpop.f32.mrb[32].mxu0 }
 0x590   :  { %v10829_v7 = vadd.f32 %v2910_v44, %v10809_v18  ;;  %v10832_v23 = vadd.f32 %v3527_v4, %v10812_v19  ;;  %v2912_v37 = vpop.f32.mrb[25].mxu1  ;;  %v3529_v20 = vpop.f32.mrb[33].mxu0  ;;  %v9619_v18 = vld [vmem:[#allocation11 + $0xcec] ss:$16 sps:$4 sm:$0xff]   ;;  %v9614_v19 = vld [vmem:[#allocation11 + $0xae0] ss:$16 sps:$4 sm:$0xff]  }
 0x591   :  { %v10835_v8 = vadd.f32 %v2912_v37, %v10815_v42  ;;  %v10838_v30 = vadd.f32 %v3529_v20, %v10818_v28  ;;  %v2914_v31 = vpop.f32.mrb[26].mxu1  ;;  %v3531_v13 = vpop.f32.mrb[34].mxu0  ;;  %4912 = vmatpush1.bf16.msra.mxu1 %v9602_v1  ;;  %5528 = vmatpush1.bf16.msra.mxu0 %v9605_v34  ;;  %v9625_v42 = vld [vmem:[#allocation11 + $0xd0c] ss:$16 sps:$4 sm:$0xff]   ;;  %v9620_v28 = vld [vmem:[#allocation11 + $0xb00] ss:$16 sps:$4 sm:$0xff]  }
 0x592   :  { %v2915_v38 = vpop.f32.mrb[27].mxu1  ;;  %v3532_v16 = vpop.f32.mrb[35].mxu0  ;;  %4913 = vmatprep.subr.bf16.mxu1 %v9610_v3  ;;  %5529 = vmatprep.subr.bf16.mxu0 %v9613_v14  ;;  %v9656_v1 = vld [vmem:[#allocation11 + $0xbc0] ss:$16 sps:$4 sm:$0xff]   ;;  %v9659_v34 = vld [vmem:[#allocation11 + $0xdc8] ss:$16 sps:$4 sm:$0xff]   ;;  %v10862_v31 = vpack.c.b16 %v10694_v60, %v10694_v60 }
 0x593   :  { %v9664_v44 = vld [vmem:[#allocation11 + $0xbe4] ss:$16 sps:$4 sm:$0xff]   ;;  %v9667_v4 = vld [vmem:[#allocation11 + $0xdec] ss:$16 sps:$4 sm:$0xff]   ;;  %v9677_v38 = vld [vmem:[#allocation11 + $0xe28] ss:$16 sps:$4 sm:$0xff]  }
 0x594   :  { %v9670_v37 = vld [vmem:[#allocation11 + $0xc04] ss:$16 sps:$4 sm:$0xff]   ;;  %v9673_v20 = vld [vmem:[#allocation11 + $0xe0c] ss:$16 sps:$4 sm:$0xff]   ;;  %v9680_v60 = vld [vmem:[#allocation11 + $0xc40] ss:$16 sps:$4 sm:$0xff]  }
 0x595   :  { %4914 = vmatpush1.bf16.msra.mxu1 %v9608_v11  ;;  %5530 = vmatpush1.bf16.msra.mxu0 %v9611_v12  ;;  %v9676_v13 = vld [vmem:[#allocation11 + $0xc24] ss:$16 sps:$4 sm:$0xff]   ;;  %v9679_v11 = vld [vmem:[#allocation11 + $0xe2c] ss:$16 sps:$4 sm:$0xff]   ;;  %v9674_v12 = vld [vmem:[#allocation11 + $0xc20] ss:$16 sps:$4 sm:$0xff]  }
 0x596   :  { %4915 = vmatprep.subr.bf16.mxu1 %v9616_v9  ;;  %5531 = vmatprep.subr.bf16.mxu0 %v9619_v18  ;;  %v9682_v16 = vld [vmem:[#allocation11 + $0xc44] ss:$16 sps:$4 sm:$0xff]   ;;  %v9685_v9 = vld [vmem:[#allocation11 + $0xe4c] ss:$16 sps:$4 sm:$0xff]   ;;  %v9683_v18 = vld [vmem:[#allocation11 + $0xe48] ss:$16 sps:$4 sm:$0xff]  }
 0x599   :  { %4916 = vmatpush1.bf16.msra.mxu1 %v9614_v19  ;;  %5532 = vmatpush1.bf16.msra.mxu0 %v9617_v21  ;;  %v9691_v19 = vld [vmem:[#allocation11 + $0xe6c] ss:$16 sps:$4 sm:$0xff]   ;;  %v9686_v21 = vld [vmem:[#allocation11 + $0xc60] ss:$16 sps:$4 sm:$0xff]  }
 0x59a   :  { %5188 = vmatprep.subr.bf16.mxu1 %v9622_v5  ;;  %5805 = vmatprep.subr.bf16.mxu0 %v9625_v42  ;;  %v9689_v5 = vld [vmem:[#allocation11 + $0xe68] ss:$16 sps:$4 sm:$0xff]   ;;  %v9694_v42 = vld [vmem:[#allocation11 + $0xc84] ss:$16 sps:$4 sm:$0xff]  }
 0x59c   :  { %4934 = vmatmul.mubr.bf16.vlgmr.msra.gmra.mrb[52].mxu1 %v10802_v54  ;;  %5550 = vmatmul.mubr.bf16.vlgmr.msra.gmra.mrb[60].mxu0 %v10842_v63  ;;  %v9640_v54 = vld [vmem:[#allocation11 + $0xb64] ss:$16 sps:$4 sm:$0xff]  }
 0x59d   :  { %5189 = vmatpush1.bf16.msra.mxu1 %v9620_v28  ;;  %5806 = vmatpush1.bf16.msra.mxu0 %v9623_v22  ;;  %v9697_v28 = vld [vmem:[#allocation11 + $0xe8c] ss:$16 sps:$4 sm:$0xff]   ;;  %v9692_v22 = vld [vmem:[#allocation11 + $0xc80] ss:$16 sps:$4 sm:$0xff]  }
 0x59e   :  { %5190 = vmatprep.subr.bf16.mxu1 %v9628_v26  ;;  %5807 = vmatprep.subr.bf16.mxu0 %v9631_v6  ;;  %v9695_v26 = vld [vmem:[#allocation11 + $0xe88] ss:$16 sps:$4 sm:$0xff]   ;;  %v9700_v6 = vld [vmem:[#allocation11 + $0xca4] ss:$16 sps:$4 sm:$0xff]  }
 0x59f   :  { %5220 = vmatprep.mubr.bf16.mxu1 %v10237_v58  ;;  %5837 = vmatprep.mubr.bf16.mxu0 %v10237_v58 }
 0x5a1   :  { %5191 = vmatpush1.bf16.msra.mxu1 %v9626_v27  ;;  %5808 = vmatpush1.bf16.msra.mxu0 %v9629_v29  ;;  %v9703_v27 = vld [vmem:[#allocation11 + $0xeac] ss:$16 sps:$4 sm:$0xff]   ;;  %v9698_v29 = vld [vmem:[#allocation11 + $0xca0] ss:$16 sps:$4 sm:$0xff]  }
 0x5a2   :  { %5192 = vmatprep.subr.bf16.mxu1 %v9634_v32  ;;  %5809 = vmatprep.subr.bf16.mxu0 %v9637_v33  ;;  %v9701_v32 = vld [vmem:[#allocation11 + $0xea8] ss:$16 sps:$4 sm:$0xff]   ;;  %v9706_v33 = vld [vmem:[#allocation11 + $0xcc4] ss:$16 sps:$4 sm:$0xff]  }
 0x5a5   :  { %5193 = vmatpush1.bf16.msra.mxu1 %v9632_v46  ;;  %5810 = vmatpush1.bf16.msra.mxu0 %v9635_v35  ;;  %v9709_v46 = vld [vmem:[#allocation11 + $0xecc] ss:$16 sps:$4 sm:$0xff]  }
 0x5a6   :  { %5194 = vmatprep.subr.bf16.mxu1 %v9640_v54  ;;  %5811 = vmatprep.subr.bf16.mxu0 %v9643_v39 }
 0x5a9   :  { %5195 = vmatpush1.bf16.msra.mxu1 %v9638_v43  ;;  %5812 = vmatpush1.bf16.msra.mxu0 %v9641_v0 }
 0x5aa   :  { %5196 = vmatprep.subr.bf16.mxu1 %v9646_v45  ;;  %5813 = vmatprep.subr.bf16.mxu0 %v9649_v15 }
 0x5ad   :  { %5197 = vmatpush1.bf16.msra.mxu1 %v9644_v50  ;;  %5814 = vmatpush1.bf16.msra.mxu0 %v9647_v51 }
 0x5ae   :  { %5198 = vmatprep.subr.bf16.mxu1 %v9652_v59  ;;  %5815 = vmatprep.subr.bf16.mxu0 %v9655_v52  ;;  %v9704_v52 = vld [vmem:[#allocation11 + $0xcc0] ss:$16 sps:$4 sm:$0xff]  }
 0x5af   :  { %v3198_v41 = vpop.f32.mrb[28].mxu1  ;;  %v3815_v47 = vpop.f32.mrb[36].mxu0 }
 0x5b0   :  { %v10849_v17 = vadd.f32 %v3198_v41, %v10829_v7  ;;  %v10852_v55 = vadd.f32 %v3815_v47, %v10832_v23  ;;  %v3200_v57 = vpop.f32.mrb[29].mxu1  ;;  %v3817_v49 = vpop.f32.mrb[37].mxu0  ;;  %v9662_v7 = vld [vmem:[#allocation11 + $0xbe0] ss:$16 sps:$4 sm:$0xff]   ;;  %v9665_v23 = vld [vmem:[#allocation11 + $0xde8] ss:$16 sps:$4 sm:$0xff]  }
 0x5b1   :  { %v10855_v24 = vadd.f32 %v3200_v57, %v10835_v8  ;;  %v10858_v2 = vadd.f32 %v3817_v49, %v10838_v30  ;;  %v3202_v61 = vpop.f32.mrb[30].mxu1  ;;  %v3819_v56 = vpop.f32.mrb[38].mxu0  ;;  %5199 = vmatpush1.bf16.msra.mxu1 %v9650_v53  ;;  %5816 = vmatpush1.bf16.msra.mxu0 %v9653_v25  ;;  %v9668_v8 = vld [vmem:[#allocation11 + $0xc00] ss:$16 sps:$4 sm:$0xff]   ;;  %v9671_v30 = vld [vmem:[#allocation11 + $0xe08] ss:$16 sps:$4 sm:$0xff]  }
 0x5b2   :  { %v3203_v3 = vpop.f32.mrb[31].mxu1  ;;  %v3820_v14 = vpop.f32.mrb[39].mxu0  ;;  %5200 = vmatprep.subr.bf16.mxu1 %v9658_v40  ;;  %5817 = vmatprep.subr.bf16.mxu0 %v9661_v62  ;;  %v9707_v53 = vld [vmem:[#allocation11 + $0xec8] ss:$16 sps:$4 sm:$0xff]   ;;  %v9712_v62 = vld [vmem:[#allocation11 + $0xce4] ss:$16 sps:$4 sm:$0xff]  }
 0x5b3   :  { %v9715_v41 = vld [vmem:[#allocation11 + $0xeec] ss:$16 sps:$4 sm:$0xff]   ;;  %v9710_v47 = vld [vmem:[#allocation11 + $0xce0] ss:$16 sps:$4 sm:$0xff]   ;;  %v9724_v61 = vld [vmem:[#allocation11 + $0xd24] ss:$16 sps:$4 sm:$0xff]  }
 0x5b4   :  { %v9721_v57 = vld [vmem:[#allocation11 + $0xf0c] ss:$16 sps:$4 sm:$0xff]   ;;  %v9716_v49 = vld [vmem:[#allocation11 + $0xd00] ss:$16 sps:$4 sm:$0xff]   ;;  %v9730_v3 = vld [vmem:[#allocation11 + $0xd44] ss:$16 sps:$4 sm:$0xff]  }
 0x5b5   :  { %5201 = vmatpush1.bf16.msra.mxu1 %v9656_v1  ;;  %5818 = vmatpush1.bf16.msra.mxu0 %v9659_v34  ;;  %v9727_v56 = vld [vmem:[#allocation11 + $0xf2c] ss:$16 sps:$4 sm:$0xff]   ;;  %v9722_v1 = vld [vmem:[#allocation11 + $0xd20] ss:$16 sps:$4 sm:$0xff]   ;;  %v9725_v34 = vld [vmem:[#allocation11 + $0xf28] ss:$16 sps:$4 sm:$0xff]  }
 0x5b6   :  { %5202 = vmatprep.subr.bf16.mxu1 %v9664_v44  ;;  %5819 = vmatprep.subr.bf16.mxu0 %v9667_v4  ;;  %v9733_v14 = vld [vmem:[#allocation11 + $0xf4c] ss:$16 sps:$4 sm:$0xff]   ;;  %v9731_v44 = vld [vmem:[#allocation11 + $0xf48] ss:$16 sps:$4 sm:$0xff]  }
 0x5b7   :  { %v9739_v4 = vld [vmem:[#allocation11 + $0xf6c] ss:$16 sps:$4 sm:$0xff]  }
 0x5b9   :  { %5203 = vmatpush1.bf16.msra.mxu1 %v9662_v7  ;;  %5820 = vmatpush1.bf16.msra.mxu0 %v9665_v23  ;;  %v9734_v7 = vld [vmem:[#allocation11 + $0xd60] ss:$16 sps:$4 sm:$0xff]   ;;  %v9737_v23 = vld [vmem:[#allocation11 + $0xf68] ss:$16 sps:$4 sm:$0xff]  }
 0x5ba   :  { %5476 = vmatprep.subr.bf16.mxu1 %v9670_v37  ;;  %6093 = vmatprep.subr.bf16.mxu0 %v9673_v20  ;;  %v9742_v37 = vld [vmem:[#allocation11 + $0xd84] ss:$16 sps:$4 sm:$0xff]   ;;  %v9745_v20 = vld [vmem:[#allocation11 + $0xf8c] ss:$16 sps:$4 sm:$0xff]  }
 0x5bc   :  { %5221 = vmatmul.mubr.bf16.vlgmr.msra.gmra.mrb[56].mxu1 %v10822_v48  ;;  %5838 = vmatmul.mubr.bf16.vlgmr.msra.gmra.mrb[64].mxu0 %v10862_v31  ;;  %v9688_v48 = vld [vmem:[#allocation11 + $0xc64] ss:$16 sps:$4 sm:$0xff]  }
 0x5bd   :  { %5477 = vmatpush1.bf16.msra.mxu1 %v9668_v8  ;;  %6094 = vmatpush1.bf16.msra.mxu0 %v9671_v30  ;;  %v9740_v8 = vld [vmem:[#allocation11 + $0xd80] ss:$16 sps:$4 sm:$0xff]   ;;  %v9743_v30 = vld [vmem:[#allocation11 + $0xf88] ss:$16 sps:$4 sm:$0xff]  }
 0x5be   :  { %5478 = vmatprep.subr.bf16.mxu1 %v9676_v13  ;;  %6095 = vmatprep.subr.bf16.mxu0 %v9679_v11  ;;  %v9748_v13 = vld [vmem:[#allocation11 + $0xda4] ss:$16 sps:$4 sm:$0xff]   ;;  %v9751_v11 = vld [vmem:[#allocation11 + $0xfac] ss:$16 sps:$4 sm:$0xff]  }
 0x5bf   :  { %5508 = vmatprep.mubr.bf16.mxu1 %v10237_v58  ;;  %6125 = vmatprep.mubr.bf16.mxu0 %v10237_v58 }
 0x5c1   :  { %5479 = vmatpush1.bf16.msra.mxu1 %v9674_v12  ;;  %6096 = vmatpush1.bf16.msra.mxu0 %v9677_v38  ;;  %v9746_v12 = vld [vmem:[#allocation11 + $0xda0] ss:$16 sps:$4 sm:$0xff]   ;;  %v9749_v38 = vld [vmem:[#allocation11 + $0xfa8] ss:$16 sps:$4 sm:$0xff]  }
 0x5c2   :  { %5480 = vmatprep.subr.bf16.mxu1 %v9682_v16  ;;  %6097 = vmatprep.subr.bf16.mxu0 %v9685_v9  ;;  %v9754_v16 = vld [vmem:[#allocation11 + $0xdc4] ss:$16 sps:$4 sm:$0xff]   ;;  %v9757_v9 = vld [vmem:[#allocation11 + $0xfcc] ss:$16 sps:$4 sm:$0xff]  }
 0x5c5   :  { %5481 = vmatpush1.bf16.msra.mxu1 %v9680_v60  ;;  %6098 = vmatpush1.bf16.msra.mxu0 %v9683_v18 }
 0x5c6   :  { %5482 = vmatprep.subr.bf16.mxu1 %v9688_v48  ;;  %6099 = vmatprep.subr.bf16.mxu0 %v9691_v19 }
 0x5c9   :  { %5483 = vmatpush1.bf16.msra.mxu1 %v9686_v21  ;;  %6100 = vmatpush1.bf16.msra.mxu0 %v9689_v5 }
 0x5ca   :  { %5484 = vmatprep.subr.bf16.mxu1 %v9694_v42  ;;  %6101 = vmatprep.subr.bf16.mxu0 %v9697_v28 }
 0x5cd   :  { %5485 = vmatpush1.bf16.msra.mxu1 %v9692_v22  ;;  %6102 = vmatpush1.bf16.msra.mxu0 %v9695_v26 }
 0x5ce   :  { %5486 = vmatprep.subr.bf16.mxu1 %v9700_v6  ;;  %6103 = vmatprep.subr.bf16.mxu0 %v9703_v27  ;;  %v9752_v6 = vld [vmem:[#allocation11 + $0xdc0] ss:$16 sps:$4 sm:$0xff]   ;;  %v9755_v27 = vld [vmem:[#allocation11 + $0xfc8] ss:$16 sps:$4 sm:$0xff]  }
 0x5cf   :  { %v3486_v35 = vpop.f32.mrb[32].mxu1  ;;  %v4103_v54 = vpop.f32.mrb[40].mxu0 }
 0x5d0   :  { %v10869_v39 = vadd.f32 %v3486_v35, %v10849_v17  ;;  %v10872_v43 = vadd.f32 %v4103_v54, %v10852_v55  ;;  %v3488_v0 = vpop.f32.mrb[33].mxu1  ;;  %v4105_v45 = vpop.f32.mrb[41].mxu0  ;;  %v9713_v17 = vld [vmem:[#allocation11 + $0xee8] ss:$16 sps:$4 sm:$0xff]   ;;  %v9718_v55 = vld [vmem:[#allocation11 + $0xd04] ss:$16 sps:$4 sm:$0xff]  }
 0x5d1   :  { %v10875_v15 = vadd.f32 %v3488_v0, %v10855_v24  ;;  %v10878_v50 = vadd.f32 %v4105_v45, %v10858_v2  ;;  %v3490_v51 = vpop.f32.mrb[34].mxu1  ;;  %v4107_v59 = vpop.f32.mrb[42].mxu0  ;;  %5487 = vmatpush1.bf16.msra.mxu1 %v9698_v29  ;;  %6104 = vmatpush1.bf16.msra.mxu0 %v9701_v32  ;;  %v9719_v24 = vld [vmem:[#allocation11 + $0xf08] ss:$16 sps:$4 sm:$0xff]   ;;  %v10882_v2 = vpack.c.b16 %v10702_v36, %v10702_v36  ;;  %v9728_v36 = vld [vmem:[#allocation11 + $0xd40] ss:$16 sps:$4 sm:$0xff]  }
 0x5d2   :  { %v3491_v25 = vpop.f32.mrb[35].mxu1  ;;  %v4108_v40 = vpop.f32.mrb[43].mxu0  ;;  %5488 = vmatprep.subr.bf16.mxu1 %v9706_v33  ;;  %6105 = vmatprep.subr.bf16.mxu0 %v9709_v46  ;;  %v9760_v33 = vld [vmem:[#allocation11 + $0xde4] ss:$16 sps:$4 sm:$0xff]   ;;  %v9763_v46 = vld [vmem:[#allocation11 + $0xfec] ss:$16 sps:$4 sm:$0xff]   ;;  %v10894_v0 = vpack.c.b16 %v10708_v10, %v10708_v10 }
 0x5d3   :  { %v9758_v35 = vld [vmem:[#allocation11 + $0xde0] ss:$16 sps:$4 sm:$0xff]   ;;  %v9761_v54 = vld [vmem:[#allocation11 + $0xfe8] ss:$16 sps:$4 sm:$0xff]   ;;  %v9769_v45 = vld [vmem:[#allocation11 + $0xe24] ss:$16 sps:$4 sm:$0xff]  }
 0x5d4   :  { %v9770_v51 = vld [vmem:[#allocation11 + $0xe40] ss:$16 sps:$4 sm:$0xff]   ;;  %v9775_v59 = vld [vmem:[#allocation11 + $0xe64] ss:$16 sps:$4 sm:$0xff]  }
 0x5d5   :  { %5489 = vmatpush1.bf16.msra.mxu1 %v9704_v52  ;;  %6106 = vmatpush1.bf16.msra.mxu0 %v9707_v53  ;;  %v9773_v52 = vld [vmem:[#allocation11 + $0xe60] ss:$16 sps:$4 sm:$0xff]   ;;  %v9778_v10 = vld [vmem:[#allocation11 + $0xe84] ss:$16 sps:$4 sm:$0xff]  }
 0x5d6   :  { %5490 = vmatprep.subr.bf16.mxu1 %v9712_v62  ;;  %6107 = vmatprep.subr.bf16.mxu0 %v9715_v41  ;;  %v9776_v53 = vld [vmem:[#allocation11 + $0xe80] ss:$16 sps:$4 sm:$0xff]   ;;  %v9784_v40 = vld [vmem:[#allocation11 + $0xec4] ss:$16 sps:$4 sm:$0xff]  }
 0x5d7   :  { %v9779_v25 = vld [vmem:[#allocation11 + $0xea0] ss:$16 sps:$4 sm:$0xff]  }
 0x5d9   :  { %5491 = vmatpush1.bf16.msra.mxu1 %v9710_v47  ;;  %6108 = vmatpush1.bf16.msra.mxu0 %v9713_v17 }
 0x5da   :  { %5764 = vmatprep.subr.bf16.mxu1 %v9718_v55  ;;  %6381 = vmatprep.subr.bf16.mxu0 %v9721_v57 }
 0x5dc   :  { %5509 = vmatmul.mubr.bf16.vlgmr.msra.gmra.mrb[60].mxu1 %v10842_v63  ;;  %6126 = vmatmul.mubr.bf16.vlgmr.msra.gmra.mrb[68].mxu0 %v10882_v2  ;;  %v9736_v63 = vld [vmem:[#allocation11 + $0xd64] ss:$16 sps:$4 sm:$0xff]  }
 0x5dd   :  { %5765 = vmatpush1.bf16.msra.mxu1 %v9716_v49  ;;  %6382 = vmatpush1.bf16.msra.mxu0 %v9719_v24 }
 0x5de   :  { %5766 = vmatprep.subr.bf16.mxu1 %v9724_v61  ;;  %6383 = vmatprep.subr.bf16.mxu0 %v9727_v56 }
 0x5df   :  { %5796 = vmatprep.mubr.bf16.mxu1 %v10237_v58  ;;  %6413 = vmatprep.mubr.bf16.mxu0 %v10237_v58 }
 0x5e1   :  { %5767 = vmatpush1.bf16.msra.mxu1 %v9722_v1  ;;  %6384 = vmatpush1.bf16.msra.mxu0 %v9725_v34  ;;  %v9782_v1 = vld [vmem:[#allocation11 + $0xec0] ss:$16 sps:$4 sm:$0xff]  }
 0x5e2   :  { %5768 = vmatprep.subr.bf16.mxu1 %v9730_v3  ;;  %6385 = vmatprep.subr.bf16.mxu0 %v9733_v14  ;;  %v9787_v14 = vld [vmem:[#allocation11 + $0xee4] ss:$16 sps:$4 sm:$0xff]  }
 0x5e5   :  { %5769 = vmatpush1.bf16.msra.mxu1 %v9728_v36  ;;  %6386 = vmatpush1.bf16.msra.mxu0 %v9731_v44  ;;  %v9785_v36 = vld [vmem:[#allocation11 + $0xee0] ss:$16 sps:$4 sm:$0xff]   ;;  %v9790_v44 = vld [vmem:[#allocation11 + $0xf04] ss:$16 sps:$4 sm:$0xff]  }
 0x5e6   :  { %5770 = vmatprep.subr.bf16.mxu1 %v9736_v63  ;;  %6387 = vmatprep.subr.bf16.mxu0 %v9739_v4  ;;  %v9788_v63 = vld [vmem:[#allocation11 + $0xf00] ss:$16 sps:$4 sm:$0xff]   ;;  %v9793_v4 = vld [vmem:[#allocation11 + $0xf24] ss:$16 sps:$4 sm:$0xff]  }
 0x5e9   :  { %5771 = vmatpush1.bf16.msra.mxu1 %v9734_v7  ;;  %6388 = vmatpush1.bf16.msra.mxu0 %v9737_v23  ;;  %v9791_v7 = vld [vmem:[#allocation11 + $0xf20] ss:$16 sps:$4 sm:$0xff]   ;;  %v9796_v23 = vld [vmem:[#allocation11 + $0xf44] ss:$16 sps:$4 sm:$0xff]  }
 0x5ea   :  { %5772 = vmatprep.subr.bf16.mxu1 %v9742_v37  ;;  %6389 = vmatprep.subr.bf16.mxu0 %v9745_v20  ;;  %v9794_v37 = vld [vmem:[#allocation11 + $0xf40] ss:$16 sps:$4 sm:$0xff]   ;;  %v9799_v20 = vld [vmem:[#allocation11 + $0xf64] ss:$16 sps:$4 sm:$0xff]  }
 0x5ed   :  { %5773 = vmatpush1.bf16.msra.mxu1 %v9740_v8  ;;  %6390 = vmatpush1.bf16.msra.mxu0 %v9743_v30  ;;  %v9797_v8 = vld [vmem:[#allocation11 + $0xf60] ss:$16 sps:$4 sm:$0xff]   ;;  %v9802_v30 = vld [vmem:[#allocation11 + $0xf84] ss:$16 sps:$4 sm:$0xff]  }
 0x5ee   :  { %5774 = vmatprep.subr.bf16.mxu1 %v9748_v13  ;;  %6391 = vmatprep.subr.bf16.mxu0 %v9751_v11  ;;  %v9800_v13 = vld [vmem:[#allocation11 + $0xf80] ss:$16 sps:$4 sm:$0xff]   ;;  %v9805_v11 = vld [vmem:[#allocation11 + $0xfa4] ss:$16 sps:$4 sm:$0xff]  }
 0x5ef   :  { %v3774_v60 = vpop.f32.mrb[36].mxu1  ;;  %v4402_v18 = vpop.f32.mrb[44].mxu0 }
 0x5f0   :  { %v3822_v48 = vadd.f32 %v3774_v60, %v10869_v39  ;;  %v4411_v19 = vadd.f32 %v4402_v18, %v10872_v43  ;;  %v3776_v21 = vpop.f32.mrb[37].mxu1  ;;  %v4404_v5 = vpop.f32.mrb[45].mxu0  ;;  %v9766_v39 = vld [vmem:[#allocation11 + $0xe04] ss:$16 sps:$4 sm:$0xff]   ;;  %v9764_v43 = vld [vmem:[#allocation11 + $0xe00] ss:$16 sps:$4 sm:$0xff]  }
 0x5f1   :  { %v3823_v42 = vadd.f32 %v3776_v21, %v10875_v15  ;;  %v4412_v28 = vadd.f32 %v4404_v5, %v10878_v50  ;;  %v3778_v22 = vpop.f32.mrb[38].mxu1  ;;  %v4406_v26 = vpop.f32.mrb[46].mxu0  ;;  %5775 = vmatpush1.bf16.msra.mxu1 %v9746_v12  ;;  %6392 = vmatpush1.bf16.msra.mxu0 %v9749_v38  ;;  %v9767_v15 = vld [vmem:[#allocation11 + $0xe20] ss:$16 sps:$4 sm:$0xff]   ;;  %v9772_v50 = vld [vmem:[#allocation11 + $0xe44] ss:$16 sps:$4 sm:$0xff]  }
 0x5f2   :  { %v3779_v29 = vpop.f32.mrb[39].mxu1  ;;  %v4407_v32 = vpop.f32.mrb[47].mxu0  ;;  %5776 = vmatprep.subr.bf16.mxu1 %v9754_v16  ;;  %6393 = vmatprep.subr.bf16.mxu0 %v9757_v9  ;;  %v9808_v12 = vld [vmem:[#allocation11 + $0xfc4] ss:$16 sps:$4 sm:$0xff]  }
 0x5f3   :  { %v9811_v26 = vld [vmem:[#allocation11 + $0xfe4] ss:$16 sps:$4 sm:$0xff]  }
 0x5f5   :  { %5777 = vmatpush1.bf16.msra.mxu1 %v9752_v6  ;;  %6394 = vmatpush1.bf16.msra.mxu0 %v9755_v27  ;;  %v9809_v6 = vld [vmem:[#allocation11 + $0xfe0] ss:$16 sps:$4 sm:$0xff]  }
 0x5f6   :  { %5778 = vmatprep.subr.bf16.mxu1 %v9760_v33  ;;  %6395 = vmatprep.subr.bf16.mxu0 %v9763_v46 }
 0x5f9   :  { %5779 = vmatpush1.bf16.msra.mxu1 %v9758_v35  ;;  %6396 = vmatpush1.bf16.msra.mxu0 %v9761_v54 }
 0x5fa   :  { %6052 = vmatprep.subr.bf16.mxu1 %v9766_v39 }
 0x5fc   :  { %5797 = vmatmul.mubr.bf16.vlgmr.msra.gmra.mrb[64].mxu1 %v10862_v31  ;;  %6414 = vmatmul.mubr.bf16.vlgmr.msra.gmra.mrb[72].mxu0 %v10894_v0  ;;  %v9781_v31 = vld [vmem:[#allocation11 + $0xea4] ss:$16 sps:$4 sm:$0xff]  }
 0x5fd   :  { %6053 = vmatpush1.bf16.msra.mxu1 %v9764_v43  ;;  %6084 = vmatprep.mubr.bf16.mxu1 %v10237_v58 }
 0x5fe   :  { %6054 = vmatprep.subr.bf16.mxu1 %v9769_v45 }
 0x601   :  { %6055 = vmatpush1.bf16.msra.mxu1 %v9767_v15 }
 0x602   :  { %6056 = vmatprep.subr.bf16.mxu1 %v9772_v50 }
 0x605   :  { %6057 = vmatpush1.bf16.msra.mxu1 %v9770_v51  ;;  %v9812_v51 = vld [vmem:[#allocation12] ss:$16 sps:$4 sm:$0xff]  }
 0x606   :  { %6058 = vmatprep.subr.bf16.mxu1 %v9775_v59  ;;  %v9814_v59 = vld [vmem:[#allocation12 + $0x4] ss:$16 sps:$4 sm:$0xff]  }
 0x609   :  { %6059 = vmatpush1.bf16.msra.mxu1 %v9773_v52  ;;  %v9815_v52 = vld [vmem:[#allocation12 + $0x8] ss:$16 sps:$4 sm:$0xff]  }
 0x60a   :  { %6060 = vmatprep.subr.bf16.mxu1 %v9778_v10  ;;  %v9817_v10 = vld [vmem:[#allocation12 + $0xc] ss:$16 sps:$4 sm:$0xff]  }
 0x60b   :  { %7333 = vmatprep.subr.bf16.mxu0 %v9817_v10  ;;  %v9893_v10 = vld [vmem:[#allocation12 + $0x1a8] ss:$16 sps:$4 sm:$0xff]  }
 0x60c   :  { %7334 = vmatpush1.bf16.msra.mxu0 %v9815_v52  ;;  %v9890_v52 = vld [vmem:[#allocation12 + $0x1a0] ss:$16 sps:$4 sm:$0xff]  }
 0x60d   :  { %6061 = vmatpush1.bf16.msra.mxu1 %v9776_v53  ;;  %v9820_v53 = vld [vmem:[#allocation12 + $0x24] ss:$16 sps:$4 sm:$0xff]  }
 0x60e   :  { %6062 = vmatprep.subr.bf16.mxu1 %v9781_v31  ;;  %v9823_v31 = vld [vmem:[#allocation12 + $0x2c] ss:$16 sps:$4 sm:$0xff]  }
 0x60f   :  { %v4062_v62 = vpop.f32.mrb[40].mxu1  ;;  %v4689_v41 = vpop.f32.mrb[48].mxu0  ;;  %7335 = vmatprep.subr.bf16.mxu0 %v9823_v31 }
 0x610   :  { %v4110_v47 = vadd.f32 %v4062_v62, %v3822_v48  ;;  %v4698_v17 = vadd.f32 %v4689_v41, %v4411_v19  ;;  %v4064_v55 = vpop.f32.mrb[41].mxu1  ;;  %v4691_v57 = vpop.f32.mrb[49].mxu0  ;;  %v9829_v62 = vld [vmem:[#allocation12 + $0x4c] ss:$16 sps:$4 sm:$0xff]   ;;  %v9824_v41 = vld [vmem:[#allocation12 + $0x40] ss:$16 sps:$4 sm:$0xff]  }
 0x611   :  { %v4111_v49 = vadd.f32 %v4064_v55, %v3823_v42  ;;  %v4699_v24 = vadd.f32 %v4691_v57, %v4412_v28  ;;  %v4066_v61 = vpop.f32.mrb[42].mxu1  ;;  %v4693_v56 = vpop.f32.mrb[50].mxu0  ;;  %6063 = vmatpush1.bf16.msra.mxu1 %v9779_v25  ;;  %v9806_v42 = vld [vmem:[#allocation11 + $0xfc0] ss:$16 sps:$4 sm:$0xff]   ;;  %v9821_v25 = vld [vmem:[#allocation12 + $0x28] ss:$16 sps:$4 sm:$0xff]  }
 0x612   :  { %v4067_v34 = vpop.f32.mrb[43].mxu1  ;;  %v4694_v3 = vpop.f32.mrb[51].mxu0  ;;  %6064 = vmatprep.subr.bf16.mxu1 %v9784_v40  ;;  %v9826_v40 = vld [vmem:[#allocation12 + $0x44] ss:$16 sps:$4 sm:$0xff]   ;;  %7336 = vmatpush1.bf16.msra.mxu0 %v9821_v25  ;;  %v9835_v55 = vld [vmem:[#allocation12 + $0x6c] ss:$16 sps:$4 sm:$0xff]  }
 0x613   :  { %7337 = vmatprep.subr.bf16.mxu0 %v9829_v62  ;;  %v9830_v57 = vld [vmem:[#allocation12 + $0x60] ss:$16 sps:$4 sm:$0xff]   ;;  %v9841_v61 = vld [vmem:[#allocation12 + $0x8c] ss:$16 sps:$4 sm:$0xff]   ;;  %v9844_v34 = vld [vmem:[#allocation12 + $0xa4] ss:$16 sps:$4 sm:$0xff]  }
 0x614   :  { %v9836_v56 = vld [vmem:[#allocation12 + $0x80] ss:$16 sps:$4 sm:$0xff]   ;;  %v9847_v3 = vld [vmem:[#allocation12 + $0xac] ss:$16 sps:$4 sm:$0xff]  }
 0x615   :  { %6065 = vmatpush1.bf16.msra.mxu1 %v9782_v1  ;;  %v9839_v1 = vld [vmem:[#allocation12 + $0x88] ss:$16 sps:$4 sm:$0xff]  }
 0x616   :  { %6066 = vmatprep.subr.bf16.mxu1 %v9787_v14  ;;  %v9842_v14 = vld [vmem:[#allocation12 + $0xa0] ss:$16 sps:$4 sm:$0xff]  }
 0x619   :  { %6067 = vmatpush1.bf16.msra.mxu1 %v9785_v36  ;;  %v9845_v36 = vld [vmem:[#allocation12 + $0xa8] ss:$16 sps:$4 sm:$0xff]  }
 0x61a   :  { %6340 = vmatprep.subr.bf16.mxu1 %v9790_v44 }
 0x61c   :  { %6085 = vmatmul.mubr.bf16.vlgmr.msra.gmra.mrb[68].mxu1 %v10882_v2  ;;  %v9803_v2 = vld [vmem:[#allocation11 + $0xfa0] ss:$16 sps:$4 sm:$0xff]  }
 0x61d   :  { %6341 = vmatpush1.bf16.msra.mxu1 %v9788_v63  ;;  %6372 = vmatprep.mubr.bf16.mxu1 %v10237_v58 }
 0x61e   :  { %6342 = vmatprep.subr.bf16.mxu1 %v9793_v4 }
 0x621   :  { %6343 = vmatpush1.bf16.msra.mxu1 %v9791_v7 }
 0x622   :  { %6344 = vmatprep.subr.bf16.mxu1 %v9796_v23 }
 0x625   :  { %6345 = vmatpush1.bf16.msra.mxu1 %v9794_v37 }
 0x626   :  { %6346 = vmatprep.subr.bf16.mxu1 %v9799_v20 }
 0x629   :  { %6347 = vmatpush1.bf16.msra.mxu1 %v9797_v8 }
 0x62a   :  { %6348 = vmatprep.subr.bf16.mxu1 %v9802_v30 }
 0x62d   :  { %6349 = vmatpush1.bf16.msra.mxu1 %v9800_v13 }
 0x62e   :  { %6350 = vmatprep.subr.bf16.mxu1 %v9805_v11  ;;  %v9848_v11 = vld [vmem:[#allocation12 + $0xc0] ss:$16 sps:$4 sm:$0xff]  }
 0x62f   :  { %v4361_v38 = vpop.f32.mrb[44].mxu1  ;;  %v4976_v58 = vpop.f32.mrb[52].mxu0 }
 0x630   :  { %v4409_v16 = vadd.f32 %v4361_v38, %v4110_v47  ;;  %v4985_v9 = vadd.f32 %v4976_v58, %v4698_v17  ;;  %v4363_v60 = vpop.f32.mrb[45].mxu1  ;;  %v4978_v18 = vpop.f32.mrb[53].mxu0  ;;  %v9827_v47 = vld [vmem:[#allocation12 + $0x48] ss:$16 sps:$4 sm:$0xff]   ;;  %v9832_v17 = vld [vmem:[#allocation12 + $0x64] ss:$16 sps:$4 sm:$0xff]  }
 0x631   :  { %v4410_v48 = vadd.f32 %v4363_v60, %v4111_v49  ;;  %v4986_v19 = vadd.f32 %v4978_v18, %v4699_v24  ;;  %v4365_v21 = vpop.f32.mrb[46].mxu1  ;;  %v4980_v5 = vpop.f32.mrb[54].mxu0  ;;  %6351 = vmatpush1.bf16.msra.mxu1 %v9803_v2  ;;  %7338 = vmatpush1.bf16.msra.mxu0 %v9827_v47  ;;  %v9833_v49 = vld [vmem:[#allocation12 + $0x68] ss:$16 sps:$4 sm:$0xff]   ;;  %v9838_v24 = vld [vmem:[#allocation12 + $0x84] ss:$16 sps:$4 sm:$0xff]  }
 0x632   :  { %v4366_v28 = vpop.f32.mrb[47].mxu1  ;;  %v4981_v22 = vpop.f32.mrb[55].mxu0  ;;  %6352 = vmatprep.subr.bf16.mxu1 %v9808_v12  ;;  %7339 = vmatprep.subr.bf16.mxu0 %v9835_v55  ;;  %v9850_v2 = vld [vmem:[#allocation12 + $0xc4] ss:$16 sps:$4 sm:$0xff]   ;;  %v9851_v58 = vld [vmem:[#allocation12 + $0xc8] ss:$16 sps:$4 sm:$0xff]  }
 0x633   :  { %v9854_v60 = vld [vmem:[#allocation12 + $0xe0] ss:$16 sps:$4 sm:$0xff]   ;;  %v9859_v18 = vld [vmem:[#allocation12 + $0xec] ss:$16 sps:$4 sm:$0xff]   ;;  %v9868_v28 = vld [vmem:[#allocation12 + $0x124] ss:$16 sps:$4 sm:$0xff]  }
 0x634   :  { %v9865_v21 = vld [vmem:[#allocation12 + $0x10c] ss:$16 sps:$4 sm:$0xff]   ;;  %v9860_v5 = vld [vmem:[#allocation12 + $0x100] ss:$16 sps:$4 sm:$0xff]  }
 0x635   :  { %6353 = vmatpush1.bf16.msra.mxu1 %v9806_v42  ;;  %7340 = vmatpush1.bf16.msra.mxu0 %v9833_v49  ;;  %v9863_v42 = vld [vmem:[#allocation12 + $0x108] ss:$16 sps:$4 sm:$0xff]   ;;  %v9871_v22 = vld [vmem:[#allocation12 + $0x12c] ss:$16 sps:$4 sm:$0xff]  }
 0x636   :  { %6354 = vmatprep.subr.bf16.mxu1 %v9811_v26  ;;  %7341 = vmatprep.subr.bf16.mxu0 %v9841_v61  ;;  %v9866_v26 = vld [vmem:[#allocation12 + $0x120] ss:$16 sps:$4 sm:$0xff]   ;;  %v9898_v61 = vld [vmem:[#allocation12 + $0x1c4] ss:$16 sps:$4 sm:$0xff]  }
 0x639   :  { %6355 = vmatpush1.bf16.msra.mxu1 %v9809_v6  ;;  %7342 = vmatpush1.bf16.msra.mxu0 %v9839_v1  ;;  %v9869_v6 = vld [vmem:[#allocation12 + $0x128] ss:$16 sps:$4 sm:$0xff]   ;;  %v9901_v1 = vld [vmem:[#allocation12 + $0x1cc] ss:$16 sps:$4 sm:$0xff]  }
 0x63a   :  { %7251 = vmatprep.subr.bf16.mxu1 %v9814_v59  ;;  %7343 = vmatprep.subr.bf16.mxu0 %v9847_v3  ;;  %v9895_v59 = vld [vmem:[#allocation12 + $0x1ac] ss:$16 sps:$4 sm:$0xff]  }
 0x63b   :  { %v9907_v3 = vld [vmem:[#allocation12 + $0x1ec] ss:$16 sps:$4 sm:$0xff]  }
 0x63c   :  { %6373 = vmatmul.mubr.bf16.vlgmr.msra.gmra.mrb[72].mxu1 %v10894_v0  ;;  %v9818_v0 = vld [vmem:[#allocation12 + $0x20] ss:$16 sps:$4 sm:$0xff]  }
 0x63d   :  { %7252 = vmatpush1.bf16.msra.mxu1 %v9812_v51  ;;  %7344 = vmatpush1.bf16.msra.mxu0 %v9845_v36  ;;  %v9892_v51 = vld [vmem:[#allocation12 + $0x1a4] ss:$16 sps:$4 sm:$0xff]   ;;  %v9905_v36 = vld [vmem:[#allocation12 + $0x1e8] ss:$16 sps:$4 sm:$0xff]  }
 0x63e   :  { %7253 = vmatprep.subr.bf16.mxu1 %v9820_v53 }
 0x641   :  { %7254 = vmatpush1.bf16.msra.mxu1 %v9818_v0 }
 0x642   :  { %7255 = vmatprep.subr.bf16.mxu1 %v9826_v40 }
 0x645   :  { %7256 = vmatpush1.bf16.msra.mxu1 %v9824_v41 }
 0x646   :  { %7257 = vmatprep.subr.bf16.mxu1 %v9832_v17 }
 0x649   :  { %7258 = vmatpush1.bf16.msra.mxu1 %v9830_v57 }
 0x64a   :  { %7259 = vmatprep.subr.bf16.mxu1 %v9838_v24  ;;  %v9896_v24 = vld [vmem:[#allocation12 + $0x1c0] ss:$16 sps:$4 sm:$0xff]  }
 0x64d   :  { %7260 = vmatpush1.bf16.msra.mxu1 %v9836_v56  ;;  %v9899_v56 = vld [vmem:[#allocation12 + $0x1c8] ss:$16 sps:$4 sm:$0xff]  }
 0x64e   :  { %7261 = vmatprep.subr.bf16.mxu1 %v9844_v34  ;;  %v9904_v34 = vld [vmem:[#allocation12 + $0x1e4] ss:$16 sps:$4 sm:$0xff]  }
 0x64f   :  { %v4648_v27 = vpop.f32.mrb[48].mxu1  ;;  %v5263_v29 = vpop.f32.mrb[56].mxu0 }
 0x650   :  { %v4696_v32 = vadd.f32 %v4648_v27, %v4409_v16  ;;  %v5272_v33 = vadd.f32 %v5263_v29, %v4985_v9  ;;  %v4650_v46 = vpop.f32.mrb[49].mxu1  ;;  %v5265_v35 = vpop.f32.mrb[57].mxu0  ;;  %v9853_v16 = vld [vmem:[#allocation12 + $0xcc] ss:$16 sps:$4 sm:$0xff]   ;;  %v9856_v9 = vld [vmem:[#allocation12 + $0xe4] ss:$16 sps:$4 sm:$0xff]  }
 0x651   :  { %v4697_v54 = vadd.f32 %v4650_v46, %v4410_v48  ;;  %v5273_v39 = vadd.f32 %v5265_v35, %v4986_v19  ;;  %v4652_v43 = vpop.f32.mrb[50].mxu1  ;;  %v5267_v45 = vpop.f32.mrb[58].mxu0  ;;  %7262 = vmatpush1.bf16.msra.mxu1 %v9842_v14  ;;  %7345 = vmatprep.subr.bf16.mxu0 %v9853_v16  ;;  %v9857_v48 = vld [vmem:[#allocation12 + $0xe8] ss:$16 sps:$4 sm:$0xff]   ;;  %v9862_v19 = vld [vmem:[#allocation12 + $0x104] ss:$16 sps:$4 sm:$0xff]  }
 0x652   :  { %v4653_v15 = vpop.f32.mrb[51].mxu1  ;;  %v5268_v50 = vpop.f32.mrb[59].mxu0  ;;  %7263 = vmatprep.subr.bf16.mxu1 %v9850_v2  ;;  %7346 = vmatpush1.bf16.msra.mxu0 %v9851_v58  ;;  %v9874_v27 = vld [vmem:[#allocation12 + $0x144] ss:$16 sps:$4 sm:$0xff]   ;;  %v9877_v29 = vld [vmem:[#allocation12 + $0x14c] ss:$16 sps:$4 sm:$0xff]  }
 0x653   :  { %7347 = vmatprep.subr.bf16.mxu0 %v9859_v18  ;;  %v9880_v46 = vld [vmem:[#allocation12 + $0x164] ss:$16 sps:$4 sm:$0xff]   ;;  %v9883_v35 = vld [vmem:[#allocation12 + $0x16c] ss:$16 sps:$4 sm:$0xff]   ;;  %v9884_v15 = vld [vmem:[#allocation12 + $0x180] ss:$16 sps:$4 sm:$0xff]  }
 0x654   :  { %v9886_v43 = vld [vmem:[#allocation12 + $0x184] ss:$16 sps:$4 sm:$0xff]   ;;  %v9889_v45 = vld [vmem:[#allocation12 + $0x18c] ss:$16 sps:$4 sm:$0xff]   ;;  %v9887_v50 = vld [vmem:[#allocation12 + $0x188] ss:$16 sps:$4 sm:$0xff]  }
 0x655   :  { %7264 = vmatpush1.bf16.msra.mxu1 %v9848_v11  ;;  %v9902_v14 = vld [vmem:[#allocation12 + $0x1e0] ss:$16 sps:$4 sm:$0xff]  }
 0x656   :  { %7265 = vmatprep.subr.bf16.mxu1 %v9856_v9  ;;  %7348 = vmatpush1.bf16.msra.mxu0 %v9857_v48 }
 0x657   :  { %7349 = vmatprep.subr.bf16.mxu0 %v9865_v21 }
 0x659   :  { %7266 = vmatpush1.bf16.msra.mxu1 %v9854_v60 }
 0x65a   :  { %7267 = vmatprep.subr.bf16.mxu1 %v9862_v19  ;;  %7350 = vmatpush1.bf16.msra.mxu0 %v9863_v42 }
 0x65b   :  { %7351 = vmatprep.subr.bf16.mxu0 %v9871_v22 }
 0x65d   :  { %7268 = vmatpush1.bf16.msra.mxu1 %v9860_v5 }
 0x65e   :  { %7269 = vmatprep.subr.bf16.mxu1 %v9868_v28  ;;  %7352 = vmatpush1.bf16.msra.mxu0 %v9869_v6 }
 0x65f   :  { %7353 = vmatprep.subr.bf16.mxu0 %v9877_v29 }
 0x661   :  { %7270 = vmatpush1.bf16.msra.mxu1 %v9866_v26 }
 0x662   :  { %7271 = vmatprep.subr.bf16.mxu1 %v9874_v27 }
 0x66f   :  { %v4935_v44 = vpop.f32.mrb[52].mxu1  ;;  %v5551_v63 = vpop.f32.mrb[60].mxu0 }
 0x670   :  { %v10902_v4 = vadd.f32 %v4935_v44, %v4696_v32  ;;  %v10904_v7 = vadd.f32 %v5551_v63, %v5272_v33  ;;  %v4937_v23 = vpop.f32.mrb[53].mxu1  ;;  %v5553_v37 = vpop.f32.mrb[61].mxu0  ;;  %v9872_v32 = vld [vmem:[#allocation12 + $0x140] ss:$16 sps:$4 sm:$0xff]   ;;  %v9875_v33 = vld [vmem:[#allocation12 + $0x148] ss:$16 sps:$4 sm:$0xff]  }
 0x671   :  { %v10906_v20 = vadd.f32 %v4937_v23, %v4697_v54  ;;  %v10908_v8 = vadd.f32 %v5553_v37, %v5273_v39  ;;  %v4939_v30 = vpop.f32.mrb[54].mxu1  ;;  %v5555_v13 = vpop.f32.mrb[62].mxu0  ;;  %7272 = vmatpush1.bf16.msra.mxu1 %v9872_v32  ;;  %v9878_v54 = vld [vmem:[#allocation12 + $0x160] ss:$16 sps:$4 sm:$0xff]   ;;  %7354 = vmatpush1.bf16.msra.mxu0 %v9875_v33  ;;  %v9881_v39 = vld [vmem:[#allocation12 + $0x168] ss:$16 sps:$4 sm:$0xff]  }
 0x672   :  { %v4940_v12 = vpop.f32.mrb[55].mxu1  ;;  %v5556_v38 = vpop.f32.mrb[63].mxu0  ;;  %7273 = vmatprep.subr.bf16.mxu1 %v9880_v46  ;;  %7355 = vmatprep.subr.bf16.mxu0 %v9883_v35  ;;  %v9910_v44 = vld [vmem:[#allocation12 + $0x204] ss:$16 sps:$4 sm:$0xff]   ;;  %v9913_v63 = vld [vmem:[#allocation12 + $0x20c] ss:$16 sps:$4 sm:$0xff]   ;;  %v6428_v46 = vlaneseq }
 0x674   :  { %v10916_v35 = vshrl.u32 %v6428_v46, 7  ;;  %v9973_v46 = vld [vmem:[#allocation12 + $0x34c] ss:$16 sps:$4 sm:$0xff]  }
 0x675   :  { %7274 = vmatpush1.bf16.msra.mxu1 %v9878_v54  ;;  %7356 = vmatpush1.bf16.msra.mxu0 %v9881_v39 }
 0x676   :  { %7275 = vmatprep.subr.bf16.mxu1 %v9886_v43  ;;  %7357 = vmatprep.subr.bf16.mxu0 %v9889_v45  ;;  %v6442_v54 = vsub.s32 3, %v10916_v35  ;;  %v6430_v39 = vsub.s32 0, %v10916_v35  ;;  %v10920_v43 = vld [vmem:[#allocation15] ss:$4 sm:$0xf]  ;;  %v6434_v45 = vsub.s32 1, %v10916_v35 }
 0x679   :  { %7276 = vmatpush1.bf16.msra.mxu1 %v9884_v15  ;;  %7358 = vmatpush1.bf16.msra.mxu0 %v9887_v50  ;;  %v6443_v15 = vrot.slane %v10920_v43, %v6442_v54  ;;  %v6431_v50 = vrot.slane %v10920_v43, %v6430_v39 }
 0x67a   :  { %7277 = vmatprep.subr.bf16.mxu1 %v9892_v51  ;;  %7359 = vmatprep.subr.bf16.mxu0 %v9895_v59  ;;  %v6435_v59 = vrot.slane %v10920_v43, %v6434_v45 }
 0x67d   :  { %7278 = vmatpush1.bf16.msra.mxu1 %v9890_v52  ;;  %7360 = vmatpush1.bf16.msra.mxu0 %v9893_v10 }
 0x67e   :  { %7279 = vmatprep.subr.bf16.mxu1 %v9898_v61  ;;  %7361 = vmatprep.subr.bf16.mxu0 %v9901_v1  ;;  %v9916_v61 = vld [vmem:[#allocation12 + $0x224] ss:$16 sps:$4 sm:$0xff]  }
 0x681   :  { %7280 = vmatpush1.bf16.msra.mxu1 %v9896_v24  ;;  %7362 = vmatpush1.bf16.msra.mxu0 %v9899_v56  ;;  %v9919_v56 = vld [vmem:[#allocation12 + $0x22c] ss:$16 sps:$4 sm:$0xff]  }
 0x682   :  { %7281 = vmatprep.subr.bf16.mxu1 %v9904_v34  ;;  %7363 = vmatprep.subr.bf16.mxu0 %v9907_v3  ;;  %v9914_v34 = vld [vmem:[#allocation12 + $0x220] ss:$16 sps:$4 sm:$0xff]   ;;  %v9917_v3 = vld [vmem:[#allocation12 + $0x228] ss:$16 sps:$4 sm:$0xff]  }
 0x685   :  { %7282 = vmatpush1.bf16.msra.mxu1 %v9902_v14  ;;  %7364 = vmatpush1.bf16.msra.mxu0 %v9905_v36  ;;  %v9922_v14 = vld [vmem:[#allocation12 + $0x244] ss:$16 sps:$4 sm:$0xff]   ;;  %v9925_v36 = vld [vmem:[#allocation12 + $0x24c] ss:$16 sps:$4 sm:$0xff]  }
 0x686   :  { %7292 = vmatprep.subr.bf16.mxu1 %v9910_v44  ;;  %7374 = vmatprep.subr.bf16.mxu0 %v9913_v63  ;;  %v9920_v44 = vld [vmem:[#allocation12 + $0x240] ss:$16 sps:$4 sm:$0xff]   ;;  %v9923_v63 = vld [vmem:[#allocation12 + $0x248] ss:$16 sps:$4 sm:$0xff]  }
 0x68f   :  { %v5222_v53 = vpop.f32.mrb[56].mxu1  ;;  %v5839_v31 = vpop.f32.mrb[64].mxu0 }
 0x690   :  { %v5270_v0 = vadd.f32 %v5222_v53, %v10902_v4  ;;  %v5848_v25 = vadd.f32 %v5839_v31, %v10904_v7  ;;  %v5224_v40 = vpop.f32.mrb[57].mxu1  ;;  %v5841_v62 = vpop.f32.mrb[65].mxu0 }
 0x691   :  { %v5271_v41 = vadd.f32 %v5224_v40, %v10906_v20  ;;  %v5849_v47 = vadd.f32 %v5841_v62, %v10908_v8  ;;  %v5226_v17 = vpop.f32.mrb[58].mxu1  ;;  %v5843_v55 = vpop.f32.mrb[66].mxu0 }
 0x692   :  { %v5227_v57 = vpop.f32.mrb[59].mxu1  ;;  %v5844_v49 = vpop.f32.mrb[67].mxu0 }
 0x693   :  { %v9908_v57 = vld [vmem:[#allocation12 + $0x200] ss:$16 sps:$4 sm:$0xff]   ;;  %v9911_v49 = vld [vmem:[#allocation12 + $0x208] ss:$16 sps:$4 sm:$0xff]  }
 0x6af   :  { %v5510_v4 = vpop.f32.mrb[60].mxu1  ;;  %v6127_v7 = vpop.f32.mrb[68].mxu0 }
 0x6b0   :  { %v5558_v23 = vadd.f32 %v5510_v4, %v5270_v0  ;;  %v6136_v37 = vadd.f32 %v6127_v7, %v5848_v25  ;;  %v5512_v20 = vpop.f32.mrb[61].mxu1  ;;  %v6129_v8 = vpop.f32.mrb[69].mxu0  ;;  %v9928_v4 = vld [vmem:[#allocation12 + $0x264] ss:$16 sps:$4 sm:$0xff]   ;;  %v9931_v7 = vld [vmem:[#allocation12 + $0x26c] ss:$16 sps:$4 sm:$0xff]  }
 0x6b1   :  { %v5559_v30 = vadd.f32 %v5512_v20, %v5271_v41  ;;  %v6137_v13 = vadd.f32 %v6129_v8, %v5849_v47  ;;  %v5514_v11 = vpop.f32.mrb[62].mxu1  ;;  %v6131_v2 = vpop.f32.mrb[70].mxu0  ;;  %v9934_v20 = vld [vmem:[#allocation12 + $0x284] ss:$16 sps:$4 sm:$0xff]   ;;  %v9937_v8 = vld [vmem:[#allocation12 + $0x28c] ss:$16 sps:$4 sm:$0xff]  }
 0x6b2   :  { %v5515_v12 = vpop.f32.mrb[63].mxu1  ;;  %v6132_v38 = vpop.f32.mrb[71].mxu0  ;;  %v9940_v11 = vld [vmem:[#allocation12 + $0x2a4] ss:$16 sps:$4 sm:$0xff]   ;;  %v9943_v2 = vld [vmem:[#allocation12 + $0x2ac] ss:$16 sps:$4 sm:$0xff]  }
 0x6b3   :  { %v9938_v12 = vld [vmem:[#allocation12 + $0x2a0] ss:$16 sps:$4 sm:$0xff]   ;;  %v9941_v38 = vld [vmem:[#allocation12 + $0x2a8] ss:$16 sps:$4 sm:$0xff]  }
 0x6cf   :  { %v5798_v58 = vpop.f32.mrb[64].mxu1  ;;  %v6415_v16 = vpop.f32.mrb[72].mxu0 }
 0x6d0   :  { %v5846_v9 = vadd.f32 %v5798_v58, %v5558_v23  ;;  %v10914_v60 = vadd.f32 %v6415_v16, %v6136_v37  ;;  %v5800_v18 = vpop.f32.mrb[65].mxu1  ;;  %v6417_v48 = vpop.f32.mrb[73].mxu0  ;;  %v9926_v23 = vld [vmem:[#allocation12 + $0x260] ss:$16 sps:$4 sm:$0xff]   ;;  %v9929_v37 = vld [vmem:[#allocation12 + $0x268] ss:$16 sps:$4 sm:$0xff]  }
 0x6d1   :  { %v5847_v19 = vadd.f32 %v5800_v18, %v5559_v30  ;;  %v6425_v21 = vadd.f32 %v6417_v48, %v6137_v13  ;;  %v5802_v5 = vpop.f32.mrb[66].mxu1  ;;  %v6419_v42 = vpop.f32.mrb[74].mxu0  ;;  %v9932_v30 = vld [vmem:[#allocation12 + $0x280] ss:$16 sps:$4 sm:$0xff]   ;;  %v9935_v13 = vld [vmem:[#allocation12 + $0x288] ss:$16 sps:$4 sm:$0xff]  }
 0x6d2   :  { %v5803_v28 = vpop.f32.mrb[67].mxu1  ;;  %v6420_v22 = vpop.f32.mrb[75].mxu0  ;;  %v9946_v58 = vld [vmem:[#allocation12 + $0x2c4] ss:$16 sps:$4 sm:$0xff]   ;;  %v9949_v16 = vld [vmem:[#allocation12 + $0x2cc] ss:$16 sps:$4 sm:$0xff]  }
 0x6d3   :  { %v6451_v0 = vadd.f32 %v6443_v15, %v6425_v21  ;;  %v9947_v18 = vld [vmem:[#allocation12 + $0x2c8] ss:$16 sps:$4 sm:$0xff]   ;;  %v9952_v48 = vld [vmem:[#allocation12 + $0x2e4] ss:$16 sps:$4 sm:$0xff]   ;;  %v9950_v21 = vld [vmem:[#allocation12 + $0x2e0] ss:$16 sps:$4 sm:$0xff]  }
 0x6d4   :  { %v9953_v5 = vld [vmem:[#allocation12 + $0x2e8] ss:$16 sps:$4 sm:$0xff]   ;;  %v9958_v42 = vld [vmem:[#allocation12 + $0x304] ss:$16 sps:$4 sm:$0xff]   ;;  %v9961_v28 = vld [vmem:[#allocation12 + $0x30c] ss:$16 sps:$4 sm:$0xff]  }
 0x6d5   :  { %v6455_v17 = vmax.f32 %v6451_v0, 0.0  ;;  %v9956_v22 = vld [vmem:[#allocation12 + $0x300] ss:$16 sps:$4 sm:$0xff]  }
 0x6d6   :  { %v9968_v15 = vld [vmem:[#allocation12 + $0x340] ss:$16 sps:$4 sm:$0xff]  }
 0x6d7   :  { %v6459_v1 = vpack.c.bf16 %v6455_v17, %v6455_v17  ;;  %v9980_v0 = vld [vmem:[#allocation12 + $0x380] ss:$16 sps:$4 sm:$0xff]   ;;  %v9989_v17 = vld [vmem:[#allocation12 + $0x3a8] ss:$16 sps:$4 sm:$0xff]  }
 0x6ef   :  { %v6086_v26 = vpop.f32.mrb[68].mxu1 }
 0x6f0   :  { %v6134_v6 = vadd.f32 %v6086_v26, %v5846_v9  ;;  %v6088_v27 = vpop.f32.mrb[69].mxu1  ;;  %v9944_v9 = vld [vmem:[#allocation12 + $0x2c0] ss:$16 sps:$4 sm:$0xff]   ;;  %v9959_v26 = vld [vmem:[#allocation12 + $0x308] ss:$16 sps:$4 sm:$0xff]  }
 0x6f1   :  { %v6135_v29 = vadd.f32 %v6088_v27, %v5847_v19  ;;  %v6090_v32 = vpop.f32.mrb[70].mxu1  ;;  %v9955_v19 = vld [vmem:[#allocation12 + $0x2ec] ss:$16 sps:$4 sm:$0xff]  }
 0x6f2   :  { %v6091_v33 = vpop.f32.mrb[71].mxu1  ;;  %v9967_v27 = vld [vmem:[#allocation12 + $0x32c] ss:$16 sps:$4 sm:$0xff]   ;;  %v9965_v32 = vld [vmem:[#allocation12 + $0x328] ss:$16 sps:$4 sm:$0xff]  }
 0x6f3   :  { %v9970_v33 = vld [vmem:[#allocation12 + $0x344] ss:$16 sps:$4 sm:$0xff]  }
 0x70f   :  { %v6374_v51 = vpop.f32.mrb[72].mxu1 }
 0x710   :  { %v6422_v52 = vadd.f32 %v6374_v51, %v6134_v6  ;;  %v6376_v10 = vpop.f32.mrb[73].mxu1  ;;  %v9964_v6 = vld [vmem:[#allocation12 + $0x324] ss:$16 sps:$4 sm:$0xff]  }
 0x711   :  { %v6423_v53 = vadd.f32 %v6376_v10, %v6135_v29  ;;  %v6378_v31 = vpop.f32.mrb[74].mxu1  ;;  %v9962_v29 = vld [vmem:[#allocation12 + $0x320] ss:$16 sps:$4 sm:$0xff]   ;;  %v9976_v51 = vld [vmem:[#allocation12 + $0x364] ss:$16 sps:$4 sm:$0xff]  }
 0x712   :  { %v6448_v25 = vadd.f32 %v6431_v50, %v6422_v52  ;;  %v6379_v40 = vpop.f32.mrb[75].mxu1  ;;  %v9971_v50 = vld [vmem:[#allocation12 + $0x348] ss:$16 sps:$4 sm:$0xff]   ;;  %v9974_v52 = vld [vmem:[#allocation12 + $0x360] ss:$16 sps:$4 sm:$0xff]  }
 0x713   :  { %v6449_v62 = vadd.f32 %v6435_v59, %v6423_v53  ;;  %v9979_v59 = vld [vmem:[#allocation12 + $0x36c] ss:$16 sps:$4 sm:$0xff]   ;;  %v9977_v10 = vld [vmem:[#allocation12 + $0x368] ss:$16 sps:$4 sm:$0xff]   ;;  %v9982_v53 = vld [vmem:[#allocation12 + $0x384] ss:$16 sps:$4 sm:$0xff]  }
 0x714   :  { %v6452_v41 = vmax.f32 %v6448_v25, 0.0  ;;  %v9985_v31 = vld [vmem:[#allocation12 + $0x38c] ss:$16 sps:$4 sm:$0xff]   ;;  %v9983_v25 = vld [vmem:[#allocation12 + $0x388] ss:$16 sps:$4 sm:$0xff]   ;;  %v6438_v40 = vsub.s32 2, %v10916_v35 }
 0x715   :  { %v6453_v47 = vmax.f32 %v6449_v62, 0.0  ;;  %v9988_v62 = vld [vmem:[#allocation12 + $0x3a4] ss:$16 sps:$4 sm:$0xff]  }
 0x716   :  { %v6456_v24 = vpack.c.bf16 %v6452_v41, %v6452_v41  ;;  %v9991_v41 = vld [vmem:[#allocation12 + $0x3ac] ss:$16 sps:$4 sm:$0xff]  }
 0x717   :  { %v6457_v55 = vpack.c.bf16 %v6453_v47, %v6453_v47  ;;  %v9986_v47 = vld [vmem:[#allocation12 + $0x3a0] ss:$16 sps:$4 sm:$0xff]  }
 0x719   :  { %7283 = vmatprep.mubr.bf16.mxu1 %v6457_v55  ;;  %7365 = vmatprep.mubr.bf16.mxu0 %v6457_v55  ;;  %v6439_v55 = vrot.slane %v10920_v43, %v6438_v40  ;;  %v10004_v43 = vld [vmem:[#allocation14 + $0x40] sm:$0xff]  }
 0x71a   :  { %7284 = vmatmul.mubr.bf16.vlgmr.msra.gmra.mrb[76].mxu1 %v6456_v24  ;;  %7366 = vmatmul.mubr.bf16.vlgmr.msra.gmra.mrb[76].mxu0 %v6456_v24  ;;  %v9992_v24 = vld [vmem:[#allocation12 + $0x3c0] ss:$16 sps:$4 sm:$0xff]  }
 0x71b   :  { %7293 = vmatpush1.bf16.msra.mxu1 %v9908_v57  ;;  %7375 = vmatpush1.bf16.msra.mxu0 %v9911_v49  ;;  %v9994_v57 = vld [vmem:[#allocation12 + $0x3c4] ss:$16 sps:$4 sm:$0xff]   ;;  %v9997_v49 = vld [vmem:[#allocation12 + $0x3cc] ss:$16 sps:$4 sm:$0xff]  }
 0x71c   :  { %7324 = vmatprep.mubr.bf16.mxu1 %v6459_v1  ;;  %7406 = vmatprep.mubr.bf16.mxu0 %v6459_v1  ;;  %v10000_v1 = vld [vmem:[#allocation12 + $0x3e4] ss:$16 sps:$4 sm:$0xff]  }
 0x71d   :  { %7294 = vmatprep.subr.bf16.mxu1 %v9916_v61  ;;  %7376 = vmatprep.subr.bf16.mxu0 %v9919_v56  ;;  %v9995_v61 = vld [vmem:[#allocation12 + $0x3c8] ss:$16 sps:$4 sm:$0xff]   ;;  %v6450_v56 = vadd.f32 %v6439_v55, %v10914_v60 }
 0x71e   :  { %v10008_v60 = vld [vmem:[#allocation14 + $0x48] sm:$0xff]  }
 0x71f   :  { %7295 = vmatpush1.bf16.msra.mxu1 %v9914_v34  ;;  %7377 = vmatpush1.bf16.msra.mxu0 %v9917_v3  ;;  %v10003_v34 = vld [vmem:[#allocation12 + $0x3ec] ss:$16 sps:$4 sm:$0xff]   ;;  %v9998_v3 = vld [vmem:[#allocation12 + $0x3e0] ss:$16 sps:$4 sm:$0xff]  }
 0x720   :  { %7296 = vmatprep.subr.bf16.mxu1 %v9922_v14  ;;  %7378 = vmatprep.subr.bf16.mxu0 %v9925_v36  ;;  %v10001_v14 = vld [vmem:[#allocation12 + $0x3e8] ss:$16 sps:$4 sm:$0xff]   ;;  %v6454_v36 = vmax.f32 %v6450_v56, 0.0 }
 0x723   :  { %7297 = vmatpush1.bf16.msra.mxu1 %v9920_v44  ;;  %7379 = vmatpush1.bf16.msra.mxu0 %v9923_v63  ;;  %v10005_v44 = vld [vmem:[#allocation14 + $0xc0] sm:$0xff]  }
 0x724   :  { %7298 = vmatprep.subr.bf16.mxu1 %v9928_v4  ;;  %7380 = vmatprep.subr.bf16.mxu0 %v9931_v7  ;;  %v10006_v63 = vld [vmem:[#allocation14] sm:$0xff]   ;;  %v6458_v7 = vpack.c.bf16 %v6454_v36, %v6454_v36 }
 0x725   :  { %v10007_v4 = vld [vmem:[#allocation14 + $0x80] sm:$0xff]  }
 0x727   :  { %7299 = vmatpush1.bf16.msra.mxu1 %v9926_v23  ;;  %7381 = vmatpush1.bf16.msra.mxu0 %v9929_v37  ;;  %v10009_v23 = vld [vmem:[#allocation14 + $0xc8] sm:$0xff]  }
 0x728   :  { %7300 = vmatprep.subr.bf16.mxu1 %v9934_v20  ;;  %7382 = vmatprep.subr.bf16.mxu0 %v9937_v8  ;;  %v10010_v37 = vld [vmem:[#allocation14 + $0x8] sm:$0xff]   ;;  %v10012_v8 = vld [vmem:[#allocation14 + $0x50] sm:$0xff]  }
 0x729   :  { %v10011_v20 = vld [vmem:[#allocation14 + $0x88] sm:$0xff]  }
 0x72b   :  { %7301 = vmatpush1.bf16.msra.mxu1 %v9932_v30  ;;  %7383 = vmatpush1.bf16.msra.mxu0 %v9935_v13  ;;  %v10013_v30 = vld [vmem:[#allocation14 + $0xd0] sm:$0xff]  }
 0x72c   :  { %7302 = vmatprep.subr.bf16.mxu1 %v9940_v11  ;;  %7384 = vmatprep.subr.bf16.mxu0 %v9943_v2  ;;  %v10014_v13 = vld [vmem:[#allocation14 + $0x10] sm:$0xff]   ;;  %v10016_v2 = vld [vmem:[#allocation14 + $0x58] sm:$0xff]  }
 0x72d   :  { %v10015_v11 = vld [vmem:[#allocation14 + $0x90] sm:$0xff]  }
 0x72f   :  { %7303 = vmatpush1.bf16.msra.mxu1 %v9938_v12  ;;  %7385 = vmatpush1.bf16.msra.mxu0 %v9941_v38  ;;  %v10017_v12 = vld [vmem:[#allocation14 + $0xd8] sm:$0xff]  }
 0x730   :  { %7304 = vmatprep.subr.bf16.mxu1 %v9946_v58  ;;  %7386 = vmatprep.subr.bf16.mxu0 %v9949_v16  ;;  %v10018_v38 = vld [vmem:[#allocation14 + $0x18] sm:$0xff]   ;;  %v10020_v16 = vld [vmem:[#allocation14 + $0x60] sm:$0xff]  }
 0x731   :  { %v10019_v58 = vld [vmem:[#allocation14 + $0x98] sm:$0xff]  }
 0x733   :  { %7305 = vmatpush1.bf16.msra.mxu1 %v9944_v9  ;;  %7387 = vmatpush1.bf16.msra.mxu0 %v9947_v18  ;;  %v10021_v9 = vld [vmem:[#allocation14 + $0xe0] sm:$0xff]  }
 0x734   :  { %7306 = vmatprep.subr.bf16.mxu1 %v9952_v48  ;;  %7388 = vmatprep.subr.bf16.mxu0 %v9955_v19  ;;  %v10022_v18 = vld [vmem:[#allocation14 + $0x20] sm:$0xff]   ;;  %v10024_v19 = vld [vmem:[#allocation14 + $0x68] sm:$0xff]  }
 0x735   :  { %v10023_v48 = vld [vmem:[#allocation14 + $0xa0] sm:$0xff]  }
 0x737   :  { %7307 = vmatpush1.bf16.msra.mxu1 %v9950_v21  ;;  %7389 = vmatpush1.bf16.msra.mxu0 %v9953_v5  ;;  %v10025_v21 = vld [vmem:[#allocation14 + $0xe8] sm:$0xff]  }
 0x738   :  { %7308 = vmatprep.subr.bf16.mxu1 %v9958_v42  ;;  %7390 = vmatprep.subr.bf16.mxu0 %v9961_v28  ;;  %v10026_v5 = vld [vmem:[#allocation14 + $0x28] sm:$0xff]   ;;  %v10028_v28 = vld [vmem:[#allocation14 + $0x70] sm:$0xff]  }
 0x739   :  { %v10027_v42 = vld [vmem:[#allocation14 + $0xa8] sm:$0xff]  }
 0x73b   :  { %7309 = vmatpush1.bf16.msra.mxu1 %v9956_v22  ;;  %7391 = vmatpush1.bf16.msra.mxu0 %v9959_v26  ;;  %v10029_v22 = vld [vmem:[#allocation14 + $0xf0] sm:$0xff]  }
 0x73c   :  { %7310 = vmatprep.subr.bf16.mxu1 %v9964_v6  ;;  %7392 = vmatprep.subr.bf16.mxu0 %v9967_v27  ;;  %v10030_v26 = vld [vmem:[#allocation14 + $0x30] sm:$0xff]   ;;  %v10032_v27 = vld [vmem:[#allocation14 + $0x78] sm:$0xff]  }
 0x73d   :  { %v10031_v6 = vld [vmem:[#allocation14 + $0xb0] sm:$0xff]  }
 0x73f   :  { %7311 = vmatpush1.bf16.msra.mxu1 %v9962_v29  ;;  %7393 = vmatpush1.bf16.msra.mxu0 %v9965_v32  ;;  %v10033_v29 = vld [vmem:[#allocation14 + $0xf8] sm:$0xff]  }
 0x740   :  { %7312 = vmatprep.subr.bf16.mxu1 %v9970_v33  ;;  %7394 = vmatprep.subr.bf16.mxu0 %v9973_v46  ;;  %v10034_v32 = vld [vmem:[#allocation14 + $0x38] sm:$0xff]   ;;  %v6589_v46 = vld [vmem:[#allocation15 + $0x1] ss:$4 sm:$0xf] }
 0x741   :  { %v10035_v33 = vld [vmem:[#allocation14 + $0xb8] sm:$0xff]  }
 0x743   :  { %7313 = vmatpush1.bf16.msra.mxu1 %v9968_v15  ;;  %7395 = vmatpush1.bf16.msra.mxu0 %v9971_v50  ;;  %v6594_v15 = vrot.slane %v6589_v46, %v6430_v39  ;;  %v6602_v50 = vrot.slane %v6589_v46, %v6438_v40 }
 0x744   :  { %7314 = vmatprep.subr.bf16.mxu1 %v9976_v51  ;;  %7396 = vmatprep.subr.bf16.mxu0 %v9979_v59  ;;  %v6598_v51 = vrot.slane %v6589_v46, %v6434_v45  ;;  %v6606_v59 = vrot.slane %v6589_v46, %v6442_v54 }
 0x747   :  { %7315 = vmatpush1.bf16.msra.mxu1 %v9974_v52  ;;  %7397 = vmatpush1.bf16.msra.mxu0 %v9977_v10 }
 0x748   :  { %7316 = vmatprep.subr.bf16.mxu1 %v9982_v53  ;;  %7398 = vmatprep.subr.bf16.mxu0 %v9985_v31 }
 0x74b   :  { %7317 = vmatpush1.bf16.msra.mxu1 %v9980_v0  ;;  %7399 = vmatpush1.bf16.msra.mxu0 %v9983_v25 }
 0x74c   :  { %7318 = vmatprep.subr.bf16.mxu1 %v9988_v62  ;;  %7400 = vmatprep.subr.bf16.mxu0 %v9991_v41 }
 0x74f   :  { %7319 = vmatpush1.bf16.msra.mxu1 %v9986_v47  ;;  %7401 = vmatpush1.bf16.msra.mxu0 %v9989_v17 }
 0x750   :  { %7320 = vmatprep.subr.bf16.mxu1 %v9994_v57  ;;  %7402 = vmatprep.subr.bf16.mxu0 %v9997_v49 }
 0x753   :  { %7321 = vmatpush1.bf16.msra.mxu1 %v9992_v24  ;;  %7403 = vmatpush1.bf16.msra.mxu0 %v9995_v61 }
 0x754   :  { %7322 = vmatprep.subr.bf16.mxu1 %v10000_v1  ;;  %7404 = vmatprep.subr.bf16.mxu0 %v10003_v34  ;;  %v8495_v34 = vld [vmem:[#allocation15 + $0x2] ss:$0 sm:$0xff] }
 0x757   :  { %7323 = vmatpush1.bf16.msra.mxu1 %v9998_v3  ;;  %7405 = vmatpush1.bf16.msra.mxu0 %v10001_v14 }
 0x758   :  { %8636 = vmatprep.subr.bf16.mxu1 %v10004_v43  ;;  %8658 = vmatprep.subr.bf16.mxu0 %v10005_v44 }
 0x75a   :  { %7325 = vmatmul.mubr.bf16.vlgmr.msra.gmra.mrb[76].mxu1 %v6458_v7  ;;  %7407 = vmatmul.mubr.bf16.vlgmr.msra.gmra.mrb[76].mxu0 %v6458_v7 }
 0x75b   :  { %8637 = vmatpush3.bf16.msra.mxu1 %v10006_v63  ;;  %8659 = vmatpush3.bf16.msra.mxu0 %v10007_v4 }
 0x75c   :  { %8638 = vmatprep.subr.bf16.mxu1 %v10008_v60  ;;  %8660 = vmatprep.subr.bf16.mxu0 %v10009_v23 }
 0x75f   :  { %8639 = vmatpush3.bf16.msra.mxu1 %v10010_v37  ;;  %8661 = vmatpush3.bf16.msra.mxu0 %v10011_v20 }
 0x760   :  { %8640 = vmatprep.subr.bf16.mxu1 %v10012_v8  ;;  %8662 = vmatprep.subr.bf16.mxu0 %v10013_v30 }
 0x763   :  { %8641 = vmatpush3.bf16.msra.mxu1 %v10014_v13  ;;  %8663 = vmatpush3.bf16.msra.mxu0 %v10015_v11 }
 0x764   :  { %8642 = vmatprep.subr.bf16.mxu1 %v10016_v2  ;;  %8664 = vmatprep.subr.bf16.mxu0 %v10017_v12 }
 0x767   :  { %8643 = vmatpush3.bf16.msra.mxu1 %v10018_v38  ;;  %8665 = vmatpush3.bf16.msra.mxu0 %v10019_v58 }
 0x768   :  { %8644 = vmatprep.subr.bf16.mxu1 %v10020_v16  ;;  %8666 = vmatprep.subr.bf16.mxu0 %v10021_v9 }
 0x76b   :  { %8645 = vmatpush3.bf16.msra.mxu1 %v10022_v18  ;;  %8667 = vmatpush3.bf16.msra.mxu0 %v10023_v48 }
 0x76c   :  { %8646 = vmatprep.subr.bf16.mxu1 %v10024_v19  ;;  %8668 = vmatprep.subr.bf16.mxu0 %v10025_v21 }
 0x76f   :  { %8647 = vmatpush3.bf16.msra.mxu1 %v10026_v5  ;;  %8669 = vmatpush3.bf16.msra.mxu0 %v10027_v42 }
 0x770   :  { %8648 = vmatprep.subr.bf16.mxu1 %v10028_v28  ;;  %8670 = vmatprep.subr.bf16.mxu0 %v10029_v22 }
 0x773   :  { %8649 = vmatpush3.bf16.msra.mxu1 %v10030_v26  ;;  %8671 = vmatpush3.bf16.msra.mxu0 %v10031_v6 }
 0x774   :  { %8650 = vmatprep.subr.bf16.mxu1 %v10032_v27  ;;  %8672 = vmatprep.subr.bf16.mxu0 %v10033_v29 }
 0x777   :  { %8651 = vmatpush3.bf16.msra.mxu1 %v10034_v32  ;;  %8673 = vmatpush3.bf16.msra.mxu0 %v10035_v33 }
 0x82d   :  { %v7326_v52 = vpop.f32.mrb[76].mxu1  ;;  %v7408_v10 = vpop.f32.mrb[76].mxu0 }
 0x82e   :  { %v8896_v53 = vadd.f32 %v7326_v52, %v6594_v15  ;;  %v8898_v31 = vadd.f32 %v7408_v10, %v6602_v50  ;;  %v7328_v0 = vpop.f32.mrb[77].mxu1  ;;  %v7410_v25 = vpop.f32.mrb[77].mxu0 }
 0x82f   :  { %v8897_v62 = vadd.f32 %v7328_v0, %v6598_v51  ;;  %v8899_v41 = vadd.f32 %v7410_v25, %v6606_v59  ;;  %v7330_v47 = vpop.f32.mrb[78].mxu1  ;;  %v7412_v17 = vpop.f32.mrb[78].mxu0 }
 0x830   :  { %v7415_v39 = vmax.f32 %v8896_v53, 0.0  ;;  %v7417_v55 = vmax.f32 %v8898_v31, 0.0  ;;  %v7331_v57 = vpop.f32.mrb[79].mxu1  ;;  %v7413_v40 = vpop.f32.mrb[79].mxu0 }
 0x831   :  { %v7416_v49 = vmax.f32 %v8897_v62, 0.0  ;;  %v7418_v24 = vmax.f32 %v8899_v41, 0.0 }
 0x832   :  { %v7419_v35 = vpack.c.bf16 %v7415_v39, %v7415_v39  ;;  %v7421_v54 = vpack.c.bf16 %v7417_v55, %v7417_v55 }
 0x833   :  { %v7420_v45 = vpack.c.bf16 %v7416_v49, %v7416_v49  ;;  %v7422_v61 = vpack.c.bf16 %v7418_v24, %v7418_v24 }
 0x835   :  { %7716 = vmatprep.mubr.bf16.mxu1 %v7420_v45  ;;  %7756 = vmatprep.mubr.bf16.mxu0 %v7422_v61 }
 0x836   :  { %7717 = vmatmul.mubr.bf16.vlgmr.msra.gmra.mrb[80].mxu1 %v7419_v35  ;;  %7757 = vmatmul.mubr.bf16.vlgmr.msra.gmra.mrb[80].mxu0 %v7421_v54 }
 0x909   :  { %v8652_v56 = vpop.f32.mrb[80].mxu1  ;;  %v8674_v1 = vpop.f32.mrb[80].mxu0 }
 0x90a   :  { %v8653_v3 = vpop.f32.mrb[81].mxu1  ;;  %v8675_v14 = vpop.f32.mrb[81].mxu0 }
 0x90b   :  { %v8654_v36 = vadd.f32 %v8653_v3, %v8652_v56  ;;  %v8676_v43 = vadd.f32 %v8675_v14, %v8674_v1  ;;  %v8655_v44 = vpop.f32.mrb[82].mxu1  ;;  %v8677_v63 = vpop.f32.mrb[82].mxu0 }
 0x90c   :  { %v8656_v4 = vpop.f32.mrb[83].mxu1  ;;  %v8678_v7 = vpop.f32.mrb[83].mxu0 }
 0x90d   :  { %v7719_v60 = vadd.f32 %v8654_v36, %v8495_v34 }
 0x90f   :  { %v7759_v23 = vadd.f32 %v8676_v43, %v7719_v60 }
 0x911   :  { %7764 = vst [vmem:[%s10956_s8] sm:$0xf] %v7759_v23 }
 0x912   :  { %7769 = vsyncpa [#allocation5], 1 }
 0x913   :  { %7770 = vsyncpa [#allocation7], 1 }
 0x914   :  { %7771 = vsyncpa [#allocation10], 1 }
 0x915   :  { %7772 = vsyncpa [#allocation13], 1 }
 0x916   :  { %7773 = vsyncpa [#allocation16], 1 }

</bundles_post_ra>
